<compile_context>
chip_gen: v7x
topology: tpu7x:2x2x1
jax: 0.10.0
libtpu: 0.0.40
codegen_flags: <defaults>
</compile_context>

<pallas_src>
import functools

import jax
import jax.numpy as jnp
from jax.experimental import pallas as pl
from jax.experimental.pallas import tpu as pltpu


# ----------------------------- Pallas kernel ------------------------------- #

def _unet_fused_kernel(x_ref, w0_ref, b0_ref, w1_ref, b1_ref, w2_ref, b2_ref,
                       w3_ref, b3_ref, mask_ref, out_ref,
                       apad_a_ref, apad_b_ref, patch0_ref, patch_ref,
                       act3_ref, acc_ref,
                       *, H, W, Nb, cin, cmid, cout):
    Wp = W + 2
    HpWp = (H + 2) * Wp
    span = (H - 1) * Wp + W               # flat conv-output width per image
    maskf = mask_ref[...]                 # (1, Nb*span) f32 {0,1}: valid columns

    def zero_halos(dst_ref):
        # Only the top padded row (+ row-1 left halo cell) and the bottom padded
        # row (+ row-H right halo cell) are never touched by the interior store;
        # every other halo column receives an exact zero from the masked store.
        # Re-zeroed every grid step (cheap, and required under "parallel").
        rows = dst_ref.shape[0]
        for b in range(Nb):
            s = b * HpWp
            dst_ref[:, s:s + Wp + 1] = jnp.zeros((rows, Wp + 1), jnp.bfloat16)
            dst_ref[:, s + Wp + 1 + span:s + HpWp] = jnp.zeros(
                (rows, Wp + 1), jnp.bfloat16)

    def store_padded(dst_ref, y_relu):
        # Zero the 2 out-of-row garbage columns per row (they land exactly on
        # halo columns of the next padded buffer), then store the interior.
        zero_halos(dst_ref)
        ym = y_relu * maskf
        for b in range(Nb):
            s = b * HpWp + Wp + 1
            dst_ref[:, s:s + span] = (
                ym[:, b * span:(b + 1) * span].astype(jnp.bfloat16))

    # ---- enc[0]: 3x3 conv (cin -> cmid); K is tiny, keep a full 9-tap im2col -
    for b in range(Nb):
        for k in range(9):
            ky, kx = k // 3, k % 3
            o = ky * Wp + kx
            patch0_ref[k * cin:(k + 1) * cin, b * span:(b + 1) * span] = (
                x_ref[b, :, o:o + span])
    acc_ref[...] = jnp.dot(w0_ref[...], patch0_ref[...],
                           preferred_element_type=jnp.float32)
    store_padded(apad_a_ref, jnp.maximum(acc_ref[...] + b0_ref[...], 0.0))

    # ---- enc[2] / dec[0]: 3x3 conv (cmid -> cmid); per-ky im2col, 3 matmuls --
    # TODO(synk): on v6e, derive the kx=+1/+2 windows from the kx=0 window with
    # pltpu.roll (XLU) instead of misaligned lane slices to relieve vld/vst.
    def conv3x3_mid(src_ref, w_ref, b_ref):
        for ky in range(3):
            for b in range(Nb):
                base = b * HpWp + ky * Wp
                for kx in range(3):
                    patch_ref[kx * cmid:(kx + 1) * cmid,
                              b * span:(b + 1) * span] = (
                        src_ref[:, base + kx:base + kx + span])
            part = jnp.dot(w_ref[ky], patch_ref[...],
                           preferred_element_type=jnp.float32)
            if ky == 0:
                acc_ref[...] = part
            else:
                acc_ref[...] += part
        return jnp.maximum(acc_ref[...] + b_ref[...], 0.0)

    store_padded(apad_b_ref, conv3x3_mid(apad_a_ref, w1_ref, b1_ref))
    # dec[0] output only feeds the 1x1 conv -> no mask / no padded store needed
    # (its garbage columns become output columns the wrapper crops).
    act3_ref[...] = conv3x3_mid(apad_b_ref, w2_ref, b2_ref).astype(jnp.bfloat16)

    # ---- dec[2]: 1x1 conv (cmid -> cout); lane-dense (cout, Nb*span) result --
    y = jnp.dot(w3_ref[...], act3_ref[...],
                preferred_element_type=jnp.float32) + b3_ref[...]
    for b in range(Nb):
        out_ref[b, :, :] = y[:, b * span:(b + 1) * span]


# ------------------------------ JAX wrappers -------------------------------- #

def prepare_params(params):
    """Convert PyTorch-layout (Cout, Cin, kH, kW) params to kernel layouts (once)."""
    w0, b0 = params["enc0"]
    w1, b1 = params["enc1"]
    w2, b2 = params["dec0"]
    w3, b3 = params["dec1"]
    cmid, cin = w0.shape[0], w0.shape[1]
    cout = w3.shape[0]

    def conv3_w_full(w):        # (Cout, 9*Cin), tap order (ky, kx, c) — layer 0
        co, ci = w.shape[0], w.shape[1]
        return jnp.transpose(w, (0, 2, 3, 1)).reshape(co, 9 * ci).astype(jnp.bfloat16)

    def conv3_w_per_ky(w):      # (3[ky], Cout, 3[kx]*Cin) — layers 1/2
        co, ci = w.shape[0], w.shape[1]
        return jnp.transpose(w, (2, 0, 3, 1)).reshape(3, co, 3 * ci).astype(jnp.bfloat16)

    return {
        "w0": conv3_w_full(w0),   "b0": b0.reshape(cmid, 1).astype(jnp.float32),
        "w1": conv3_w_per_ky(w1), "b1": b1.reshape(cmid, 1).astype(jnp.float32),
        "w2": conv3_w_per_ky(w2), "b2": b2.reshape(cmid, 1).astype(jnp.float32),
        "w3": w3.reshape(cout, cmid).astype(jnp.bfloat16),
        "b3": b3.reshape(cout, 1).astype(jnp.float32),
    }


def _pick_images_per_step(N, bytes_per_image, vmem_budget=28 * 1024 * 1024):
    """Largest divisor of N within the VMEM budget, while keeping >=2 grid steps
    when N>=2 so both v7x TensorCores get work (v5e/v6e are single-TC)."""
    nb_max = max(1, vmem_budget // max(bytes_per_image, 1))
    best = 1
    for d in range(1, N + 1):
        if N % d != 0 or d > nb_max:
            continue
        if N >= 2 and N // d < 2:
            continue
        best = d
    return best


@jax.jit
def unet_forward(x_nchw, kp):
    """x_nchw: (N, Cin, H, W) f32 -> (N, Cout, H, W) f32 (NCHW, like PyTorch)."""
    N, cin, H, W = x_nchw.shape
    cmid = kp["w1"].shape[1]
    cout = kp["w3"].shape[0]
    Hp, Wp = H + 2, W + 2
    HpWp = Hp * Wp
    span = (H - 1) * Wp + W

    # Rough per-image VMEM scratch footprint (used to cap images-per-step).
    bytes_per_image = (2 * cmid * HpWp * 2      # padded act ping/pong (bf16)
                       + 9 * cin * span * 2     # layer-0 im2col patch
                       + 3 * cmid * span * 2    # per-ky im2col patch
                       + cmid * span * 2        # dec0 activations (bf16)
                       + cmid * span * 4        # f32 accumulator
                       + 2 * cin * HpWp * 2     # double-buffered input block
                       + 2 * cout * span * 4)   # double-buffered output block
    Nb = _pick_images_per_step(N, bytes_per_image)

    # Wrapper-side zero-pad + flatten + bf16 cast (tiny fused XLA op); layer-0
    # input is intentionally quantized to bf16 before the MXU matmul.
    x_pad = jnp.pad(x_nchw.astype(jnp.bfloat16),
                    ((0, 0), (0, 0), (1, 1), (1, 1))).reshape(N, cin, HpWp)

    # Valid-column mask over the flat conv output, tiled per image in the step.
    mask = ((jnp.arange(span, dtype=jnp.int32) % Wp) < W).astype(jnp.float32)
    mask = jnp.tile(mask, (Nb,)).reshape(1, Nb * span)

    flops = 2 * N * H * W * (cmid * cin * 9 + 2 * cmid * cmid * 9 + cout * cmid)
    bytes_accessed = (x_pad.size * 2 + N * cout * span * 4 + mask.size * 4
                      + sum(int(v.size) * v.dtype.itemsize for v in kp.values()))

    kernel = functools.partial(_unet_fused_kernel, H=H, W=W, Nb=Nb,
                               cin=cin, cmid=cmid, cout=cout)
    y_flat = pl.pallas_call(
        kernel,
        out_shape=jax.ShapeDtypeStruct((N, cout, span), jnp.float32),
        grid=(N // Nb,),
        in_specs=[
            pl.BlockSpec((Nb, cin, HpWp), lambda n: (n, 0, 0)),      # padded x
            pl.BlockSpec((cmid, 9 * cin), lambda n: (0, 0)),         # enc0 w
            pl.BlockSpec((cmid, 1), lambda n: (0, 0)),               # enc0 b
            pl.BlockSpec((3, cmid, 3 * cmid), lambda n: (0, 0, 0)),  # enc1 w
            pl.BlockSpec((cmid, 1), lambda n: (0, 0)),               # enc1 b
            pl.BlockSpec((3, cmid, 3 * cmid), lambda n: (0, 0, 0)),  # dec0 w
            pl.BlockSpec((cmid, 1), lambda n: (0, 0)),               # dec0 b
            pl.BlockSpec((cout, cmid), lambda n: (0, 0)),            # dec1 w
            pl.BlockSpec((cout, 1), lambda n: (0, 0)),               # dec1 b
            pl.BlockSpec((1, Nb * span), lambda n: (0, 0)),          # valid mask
        ],
        out_specs=pl.BlockSpec((Nb, cout, span), lambda n: (n, 0, 0)),
        scratch_shapes=[
            pltpu.VMEM((cmid, Nb * HpWp), jnp.bfloat16),      # padded act (ping)
            pltpu.VMEM((cmid, Nb * HpWp), jnp.bfloat16),      # padded act (pong)
            pltpu.VMEM((9 * cin, Nb * span), jnp.bfloat16),   # layer-0 im2col
            pltpu.VMEM((3 * cmid, Nb * span), jnp.bfloat16),  # per-ky im2col
            pltpu.VMEM((cmid, Nb * span), jnp.bfloat16),      # dec0 activations
            pltpu.VMEM((cmid, Nb * span), jnp.float32),       # f32 accumulator
        ],
        compiler_params=pltpu.CompilerParams(
            dimension_semantics=("parallel",),
            vmem_limit_bytes=48 * 1024 * 1024),
        cost_estimate=pl.CostEstimate(flops=int(flops), transcendentals=0,
                                      bytes_accessed=int(bytes_accessed)),
    )(x_pad, kp["w0"], kp["b0"], kp["w1"], kp["b1"], kp["w2"], kp["b2"],
      kp["w3"], kp["b3"], mask)

    # Lane-dense kernel output is the flat conv map with 2 garbage columns per
    # row (except the last); cropping them here is REQUIRED for correctness.
    y_pad = jnp.pad(y_flat, ((0, 0), (0, 0), (0, H * Wp - span)))
    return y_pad.reshape(N, cout, H, Wp)[:, :, :, :W]


def init_unet_params(key, in_channels=3, out_channels=1):
    """PyTorch-Conv2d-style init: U(-1/sqrt(fan_in), +1/sqrt(fan_in))."""
    def conv_params(k, cout, cin, ksz):
        kw, kb = jax.random.split(k)
        fan_in = cin * ksz * ksz
        bound = 1.0 / jnp.sqrt(fan_in)
        w = jax.random.uniform(kw, (cout, cin, ksz, ksz), jnp.float32, -bound, bound)
        b = jax.random.uniform(kb, (cout,), jnp.float32, -bound, bound)
        return w, b

    k1, k2, k3, k4 = jax.random.split(key, 4)
    return {
        "enc0": conv_params(k1, 64, in_channels, 3),
        "enc1": conv_params(k2, 64, 64, 3),
        "dec0": conv_params(k3, 64, 64, 3),
        "dec1": conv_params(k4, out_channels, 64, 1),
    }


# Pure-JAX reference (correctness check only).
def _conv_ref(x, w, b, pad, in_dtype):
    y = jax.lax.conv_general_dilated(
        x.astype(in_dtype), w.astype(in_dtype), (1, 1),
        [(pad, pad), (pad, pad)],
        dimension_numbers=("NCHW", "OIHW", "NCHW"),
        preferred_element_type=jnp.float32)
    return y + b[None, :, None, None].astype(jnp.float32)


def unet_ref(x, params, in_dtype=jnp.float32):
    x = jnp.maximum(_conv_ref(x, *params["enc0"], 1, in_dtype), 0.0)
    x = jnp.maximum(_conv_ref(x, *params["enc1"], 1, in_dtype), 0.0)
    x = jnp.maximum(_conv_ref(x, *params["dec0"], 1, in_dtype), 0.0)
    return _conv_ref(x, *params["dec1"], 0, in_dtype)


if __name__ == "__main__":
    key = jax.random.PRNGKey(0)
    kx, kp_key = jax.random.split(key)
    x = jax.random.normal(kx, (2, 3, 16, 16), jnp.float32)      # NCHW like PyTorch
    params = init_unet_params(kp_key, in_channels=3, out_channels=1)
    kparams = prepare_params(params)                            # one-time layout prep

    out = jax.block_until_ready(unet_forward(x, kparams))
    assert out.shape == (2, 1, 16, 16), out.shape

    # Tight check vs a reference with the same bf16 quantization points.
    ref_bf16 = unet_ref(x, params, in_dtype=jnp.bfloat16)
    err16 = float(jnp.max(jnp.abs(out - ref_bf16)))
    assert jnp.allclose(out, ref_bf16, atol=1e-3, rtol=1e-3), err16

    # Loose sanity check vs the full-f32 reference (bounds the bf16-matmul error).
    ref_f32 = unet_ref(x, params, in_dtype=jnp.float32)
    err32 = float(jnp.max(jnp.abs(out - ref_f32)))
    assert jnp.allclose(out, ref_f32, atol=3e-2, rtol=3e-2), err32

    print("KERNEL_OK")
</pallas_src>

<mosaic_0001>
module attributes {stable_mosaic.version = 11 : i64} {
  func.func @_unet_fused_kernel(%arg0: i32, %arg1: memref<1x3x324xbf16, #tpu.memory_space<vmem>>, %arg2: memref<64x27xbf16, #tpu.memory_space<vmem>>, %arg3: memref<64x1xf32, #tpu.memory_space<vmem>>, %arg4: memref<3x64x192xbf16, #tpu.memory_space<vmem>>, %arg5: memref<64x1xf32, #tpu.memory_space<vmem>>, %arg6: memref<3x64x192xbf16, #tpu.memory_space<vmem>>, %arg7: memref<64x1xf32, #tpu.memory_space<vmem>>, %arg8: memref<1x64xbf16, #tpu.memory_space<vmem>>, %arg9: memref<1x1xf32, #tpu.memory_space<vmem>>, %arg10: memref<1x286xf32, #tpu.memory_space<vmem>>, %arg11: memref<1x1x286xf32, #tpu.memory_space<vmem>>, %arg12: memref<64x324xbf16, #tpu.memory_space<vmem>>, %arg13: memref<64x324xbf16, #tpu.memory_space<vmem>>, %arg14: memref<27x286xbf16, #tpu.memory_space<vmem>>, %arg15: memref<192x286xbf16, #tpu.memory_space<vmem>>, %arg16: memref<64x286xbf16, #tpu.memory_space<vmem>>, %arg17: memref<64x286xf32, #tpu.memory_space<vmem>>) attributes {dimension_semantics = [#tpu.dimension_semantics<parallel>], iteration_bounds = array<i64: 2>, scalar_prefetch = 0 : i64, scratch_operands = 6 : i64, tpu.core_type = #tpu.core_type<tc>, window_params = [{transform_indices = @transform_0, window_bounds = array<i64: 1, 3, 324>}, {pipeline_mode = #tpu.pipeline_mode<synchronous>, transform_indices = @transform_1, window_bounds = array<i64: 64, 27>}, {pipeline_mode = #tpu.pipeline_mode<synchronous>, transform_indices = @transform_2, window_bounds = array<i64: 64, 1>}, {pipeline_mode = #tpu.pipeline_mode<synchronous>, transform_indices = @transform_3, window_bounds = array<i64: 3, 64, 192>}, {pipeline_mode = #tpu.pipeline_mode<synchronous>, transform_indices = @transform_4, window_bounds = array<i64: 64, 1>}, {pipeline_mode = #tpu.pipeline_mode<synchronous>, transform_indices = @transform_5, window_bounds = array<i64: 3, 64, 192>}, {pipeline_mode = #tpu.pipeline_mode<synchronous>, transform_indices = @transform_6, window_bounds = array<i64: 64, 1>}, {pipeline_mode = #tpu.pipeline_mode<synchronous>, transform_indices = @transform_7, window_bounds = array<i64: 1, 64>}, {pipeline_mode = #tpu.pipeline_mode<synchronous>, transform_indices = @transform_8, window_bounds = array<i64: 1, 1>}, {pipeline_mode = #tpu.pipeline_mode<synchronous>, transform_indices = @transform_9, window_bounds = array<i64: 1, 286>}, {transform_indices = @transform_10, window_bounds = array<i64: 1, 1, 286>}]} {
    %c0 = arith.constant 0 : index
    %c0_0 = arith.constant 0 : index
    %0 = vector.load %arg10[%c0, %c0_0] : memref<1x286xf32, #tpu.memory_space<vmem>>, vector<1x286xf32>
    %c0_1 = arith.constant 0 : index
    %c0_2 = arith.constant 0 : index
    %c0_3 = arith.constant 0 : index
    %1 = vector.load %arg1[%c0_1, %c0_2, %c0_3] : memref<1x3x324xbf16, #tpu.memory_space<vmem>>, vector<1x3x286xbf16>
    %2 = vector.shape_cast %1 : vector<1x3x286xbf16> to vector<3x286xbf16>
    %c0_4 = arith.constant 0 : index
    %c0_5 = arith.constant 0 : index
    %3 = vector.load %arg14[%c0_4, %c0_5] : memref<27x286xbf16, #tpu.memory_space<vmem>>, vector<3x286xbf16>
    tpu.vector_store %arg14[%c0_4, %c0_5], %2 {strides = array<i32>} : memref<27x286xbf16, #tpu.memory_space<vmem>>, vector<3x286xbf16>,
    %c0_6 = arith.constant 0 : index
    %c0_7 = arith.constant 0 : index
    %c1 = arith.constant 1 : index
    %4 = vector.load %arg1[%c0_6, %c0_7, %c1] : memref<1x3x324xbf16, #tpu.memory_space<vmem>>, vector<1x3x286xbf16>
    %5 = vector.shape_cast %4 : vector<1x3x286xbf16> to vector<3x286xbf16>
    %c3 = arith.constant 3 : index
    %c0_8 = arith.constant 0 : index
    %6 = vector.load %arg14[%c3, %c0_8] : memref<27x286xbf16, #tpu.memory_space<vmem>>, vector<3x286xbf16>
    tpu.vector_store %arg14[%c3, %c0_8], %5 {strides = array<i32>} : memref<27x286xbf16, #tpu.memory_space<vmem>>, vector<3x286xbf16>,
    %c0_9 = arith.constant 0 : index
    %c0_10 = arith.constant 0 : index
    %c2 = arith.constant 2 : index
    %7 = vector.load %arg1[%c0_9, %c0_10, %c2] : memref<1x3x324xbf16, #tpu.memory_space<vmem>>, vector<1x3x286xbf16>
    %8 = vector.shape_cast %7 : vector<1x3x286xbf16> to vector<3x286xbf16>
    %c6 = arith.constant 6 : index
    %c0_11 = arith.constant 0 : index
    %9 = vector.load %arg14[%c6, %c0_11] : memref<27x286xbf16, #tpu.memory_space<vmem>>, vector<3x286xbf16>
    tpu.vector_store %arg14[%c6, %c0_11], %8 {strides = array<i32>} : memref<27x286xbf16, #tpu.memory_space<vmem>>, vector<3x286xbf16>,
    %c0_12 = arith.constant 0 : index
    %c0_13 = arith.constant 0 : index
    %c18 = arith.constant 18 : index
    %10 = vector.load %arg1[%c0_12, %c0_13, %c18] : memref<1x3x324xbf16, #tpu.memory_space<vmem>>, vector<1x3x286xbf16>
    %11 = vector.shape_cast %10 : vector<1x3x286xbf16> to vector<3x286xbf16>
    %c9 = arith.constant 9 : index
    %c0_14 = arith.constant 0 : index
    %12 = vector.load %arg14[%c9, %c0_14] : memref<27x286xbf16, #tpu.memory_space<vmem>>, vector<3x286xbf16>
    tpu.vector_store %arg14[%c9, %c0_14], %11 {strides = array<i32>} : memref<27x286xbf16, #tpu.memory_space<vmem>>, vector<3x286xbf16>,
    %c0_15 = arith.constant 0 : index
    %c0_16 = arith.constant 0 : index
    %c19 = arith.constant 19 : index
    %13 = vector.load %arg1[%c0_15, %c0_16, %c19] : memref<1x3x324xbf16, #tpu.memory_space<vmem>>, vector<1x3x286xbf16>
    %14 = vector.shape_cast %13 : vector<1x3x286xbf16> to vector<3x286xbf16>
    %c12 = arith.constant 12 : index
    %c0_17 = arith.constant 0 : index
    %15 = vector.load %arg14[%c12, %c0_17] : memref<27x286xbf16, #tpu.memory_space<vmem>>, vector<3x286xbf16>
    tpu.vector_store %arg14[%c12, %c0_17], %14 {strides = array<i32>} : memref<27x286xbf16, #tpu.memory_space<vmem>>, vector<3x286xbf16>,
    %c0_18 = arith.constant 0 : index
    %c0_19 = arith.constant 0 : index
    %c20 = arith.constant 20 : index
    %16 = vector.load %arg1[%c0_18, %c0_19, %c20] : memref<1x3x324xbf16, #tpu.memory_space<vmem>>, vector<1x3x286xbf16>
    %17 = vector.shape_cast %16 : vector<1x3x286xbf16> to vector<3x286xbf16>
    %c15 = arith.constant 15 : index
    %c0_20 = arith.constant 0 : index
    %18 = vector.load %arg14[%c15, %c0_20] : memref<27x286xbf16, #tpu.memory_space<vmem>>, vector<3x286xbf16>
    tpu.vector_store %arg14[%c15, %c0_20], %17 {strides = array<i32>} : memref<27x286xbf16, #tpu.memory_space<vmem>>, vector<3x286xbf16>,
    %c0_21 = arith.constant 0 : index
    %c0_22 = arith.constant 0 : index
    %c36 = arith.constant 36 : index
    %19 = vector.load %arg1[%c0_21, %c0_22, %c36] : memref<1x3x324xbf16, #tpu.memory_space<vmem>>, vector<1x3x286xbf16>
    %20 = vector.shape_cast %19 : vector<1x3x286xbf16> to vector<3x286xbf16>
    %c18_23 = arith.constant 18 : index
    %c0_24 = arith.constant 0 : index
    %21 = vector.load %arg14[%c18_23, %c0_24] : memref<27x286xbf16, #tpu.memory_space<vmem>>, vector<3x286xbf16>
    tpu.vector_store %arg14[%c18_23, %c0_24], %20 {strides = array<i32>} : memref<27x286xbf16, #tpu.memory_space<vmem>>, vector<3x286xbf16>,
    %c0_25 = arith.constant 0 : index
    %c0_26 = arith.constant 0 : index
    %c37 = arith.constant 37 : index
    %22 = vector.load %arg1[%c0_25, %c0_26, %c37] : memref<1x3x324xbf16, #tpu.memory_space<vmem>>, vector<1x3x286xbf16>
    %23 = vector.shape_cast %22 : vector<1x3x286xbf16> to vector<3x286xbf16>
    %c21 = arith.constant 21 : index
    %c0_27 = arith.constant 0 : index
    %24 = vector.load %arg14[%c21, %c0_27] : memref<27x286xbf16, #tpu.memory_space<vmem>>, vector<3x286xbf16>
    tpu.vector_store %arg14[%c21, %c0_27], %23 {strides = array<i32>} : memref<27x286xbf16, #tpu.memory_space<vmem>>, vector<3x286xbf16>,
    %c0_28 = arith.constant 0 : index
    %c0_29 = arith.constant 0 : index
    %c38 = arith.constant 38 : index
    %25 = vector.load %arg1[%c0_28, %c0_29, %c38] : memref<1x3x324xbf16, #tpu.memory_space<vmem>>, vector<1x3x286xbf16>
    %26 = vector.shape_cast %25 : vector<1x3x286xbf16> to vector<3x286xbf16>
    %c24 = arith.constant 24 : index
    %c0_30 = arith.constant 0 : index
    %27 = vector.load %arg14[%c24, %c0_30] : memref<27x286xbf16, #tpu.memory_space<vmem>>, vector<3x286xbf16>
    tpu.vector_store %arg14[%c24, %c0_30], %26 {strides = array<i32>} : memref<27x286xbf16, #tpu.memory_space<vmem>>, vector<3x286xbf16>,
    %c0_31 = arith.constant 0 : index
    %c0_32 = arith.constant 0 : index
    %28 = vector.load %arg2[%c0_31, %c0_32] : memref<64x27xbf16, #tpu.memory_space<vmem>>, vector<64x27xbf16>
    %c0_33 = arith.constant 0 : index
    %c0_34 = arith.constant 0 : index
    %29 = vector.load %arg14[%c0_33, %c0_34] : memref<27x286xbf16, #tpu.memory_space<vmem>>, vector<27x286xbf16>
    %cst = arith.constant dense<0.000000e+00> : vector<64x286xf32>
    %30 = tpu.matmul %28, %29, %cst {dimension_numbers = #tpu.dot_dimension_numbers<[1], [0], [0], [1], [0, 0, 1, 1], [], []>} : vector<64x27xbf16>, vector<27x286xbf16>, vector<64x286xf32> -> vector<64x286xf32>
    %c0_35 = arith.constant 0 : index
    %c0_36 = arith.constant 0 : index
    %31 = vector.load %arg17[%c0_35, %c0_36] : memref<64x286xf32, #tpu.memory_space<vmem>>, vector<64x286xf32>
    tpu.vector_store %arg17[%c0_35, %c0_36], %30 {strides = array<i32>} : memref<64x286xf32, #tpu.memory_space<vmem>>, vector<64x286xf32>,
    %c0_37 = arith.constant 0 : index
    %c0_38 = arith.constant 0 : index
    %32 = vector.load %arg17[%c0_37, %c0_38] : memref<64x286xf32, #tpu.memory_space<vmem>>, vector<64x286xf32>
    %c0_39 = arith.constant 0 : index
    %c0_40 = arith.constant 0 : index
    %33 = vector.load %arg3[%c0_39, %c0_40] : memref<64x1xf32, #tpu.memory_space<vmem>>, vector<64x1xf32>
    %34 = vector.broadcast %33 : vector<64x1xf32> to vector<64x286xf32>
    %35 = arith.addf %32, %34 : vector<64x286xf32>
    %cst_41 = arith.constant 0.000000e+00 : f32
    %36 = vector.broadcast %cst_41 : f32 to vector<64x286xf32>
    %37 = arith.maximumf %35, %36 : vector<64x286xf32>
    %cst_42 = arith.constant 0.000000e+00 : bf16
    %38 = vector.broadcast %cst_42 : bf16 to vector<64x19xbf16>
    %c0_43 = arith.constant 0 : index
    %c0_44 = arith.constant 0 : index
    %39 = vector.load %arg12[%c0_43, %c0_44] : memref<64x324xbf16, #tpu.memory_space<vmem>>, vector<64x19xbf16>
    tpu.vector_store %arg12[%c0_43, %c0_44], %38 {strides = array<i32>} : memref<64x324xbf16, #tpu.memory_space<vmem>>, vector<64x19xbf16>,
    %cst_45 = arith.constant 0.000000e+00 : bf16
    %40 = vector.broadcast %cst_45 : bf16 to vector<64x19xbf16>
    %c0_46 = arith.constant 0 : index
    %c305 = arith.constant 305 : index
    %41 = vector.load %arg12[%c0_46, %c305] : memref<64x324xbf16, #tpu.memory_space<vmem>>, vector<64x19xbf16>
    tpu.vector_store %arg12[%c0_46, %c305], %40 {strides = array<i32>} : memref<64x324xbf16, #tpu.memory_space<vmem>>, vector<64x19xbf16>,
    %42 = vector.broadcast %0 : vector<1x286xf32> to vector<64x286xf32>
    %43 = arith.mulf %37, %42 : vector<64x286xf32>
    %44 = arith.truncf %43 : vector<64x286xf32> to vector<64x286xbf16>
    %c0_47 = arith.constant 0 : index
    %c19_48 = arith.constant 19 : index
    %45 = vector.load %arg12[%c0_47, %c19_48] : memref<64x324xbf16, #tpu.memory_space<vmem>>, vector<64x286xbf16>
    tpu.vector_store %arg12[%c0_47, %c19_48], %44 {strides = array<i32>} : memref<64x324xbf16, #tpu.memory_space<vmem>>, vector<64x286xbf16>,
    %c0_49 = arith.constant 0 : index
    %c0_50 = arith.constant 0 : index
    %46 = vector.load %arg12[%c0_49, %c0_50] : memref<64x324xbf16, #tpu.memory_space<vmem>>, vector<64x286xbf16>
    %c0_51 = arith.constant 0 : index
    %c0_52 = arith.constant 0 : index
    %47 = vector.load %arg15[%c0_51, %c0_52] : memref<192x286xbf16, #tpu.memory_space<vmem>>, vector<64x286xbf16>
    tpu.vector_store %arg15[%c0_51, %c0_52], %46 {strides = array<i32>} : memref<192x286xbf16, #tpu.memory_space<vmem>>, vector<64x286xbf16>,
    %c0_53 = arith.constant 0 : index
    %c1_54 = arith.constant 1 : index
    %48 = vector.load %arg12[%c0_53, %c1_54] : memref<64x324xbf16, #tpu.memory_space<vmem>>, vector<64x286xbf16>
    %c64 = arith.constant 64 : index
    %c0_55 = arith.constant 0 : index
    %49 = vector.load %arg15[%c64, %c0_55] : memref<192x286xbf16, #tpu.memory_space<vmem>>, vector<64x286xbf16>
    tpu.vector_store %arg15[%c64, %c0_55], %48 {strides = array<i32>} : memref<192x286xbf16, #tpu.memory_space<vmem>>, vector<64x286xbf16>,
    %c0_56 = arith.constant 0 : index
    %c2_57 = arith.constant 2 : index
    %50 = vector.load %arg12[%c0_56, %c2_57] : memref<64x324xbf16, #tpu.memory_space<vmem>>, vector<64x286xbf16>
    %c128 = arith.constant 128 : index
    %c0_58 = arith.constant 0 : index
    %51 = vector.load %arg15[%c128, %c0_58] : memref<192x286xbf16, #tpu.memory_space<vmem>>, vector<64x286xbf16>
    tpu.vector_store %arg15[%c128, %c0_58], %50 {strides = array<i32>} : memref<192x286xbf16, #tpu.memory_space<vmem>>, vector<64x286xbf16>,
    %c0_59 = arith.constant 0 : index
    %c0_60 = arith.constant 0 : index
    %c0_61 = arith.constant 0 : index
    %52 = vector.load %arg4[%c0_59, %c0_60, %c0_61] : memref<3x64x192xbf16, #tpu.memory_space<vmem>>, vector<1x64x192xbf16>
    %53 = vector.shape_cast %52 : vector<1x64x192xbf16> to vector<64x192xbf16>
    %c0_62 = arith.constant 0 : index
    %c0_63 = arith.constant 0 : index
    %54 = vector.load %arg15[%c0_62, %c0_63] : memref<192x286xbf16, #tpu.memory_space<vmem>>, vector<192x286xbf16>
    %cst_64 = arith.constant dense<0.000000e+00> : vector<64x286xf32>
    %55 = tpu.matmul %53, %54, %cst_64 {dimension_numbers = #tpu.dot_dimension_numbers<[1], [0], [0], [1], [0, 0, 1, 1], [], []>} : vector<64x192xbf16>, vector<192x286xbf16>, vector<64x286xf32> -> vector<64x286xf32>
    %c0_65 = arith.constant 0 : index
    %c0_66 = arith.constant 0 : index
    %56 = vector.load %arg17[%c0_65, %c0_66] : memref<64x286xf32, #tpu.memory_space<vmem>>, vector<64x286xf32>
    tpu.vector_store %arg17[%c0_65, %c0_66], %55 {strides = array<i32>} : memref<64x286xf32, #tpu.memory_space<vmem>>, vector<64x286xf32>,
    %c0_67 = arith.constant 0 : index
    %c18_68 = arith.constant 18 : index
    %57 = vector.load %arg12[%c0_67, %c18_68] : memref<64x324xbf16, #tpu.memory_space<vmem>>, vector<64x286xbf16>
    %c0_69 = arith.constant 0 : index
    %c0_70 = arith.constant 0 : index
    %58 = vector.load %arg15[%c0_69, %c0_70] : memref<192x286xbf16, #tpu.memory_space<vmem>>, vector<64x286xbf16>
    tpu.vector_store %arg15[%c0_69, %c0_70], %57 {strides = array<i32>} : memref<192x286xbf16, #tpu.memory_space<vmem>>, vector<64x286xbf16>,
    %c0_71 = arith.constant 0 : index
    %c19_72 = arith.constant 19 : index
    %59 = vector.load %arg12[%c0_71, %c19_72] : memref<64x324xbf16, #tpu.memory_space<vmem>>, vector<64x286xbf16>
    %c64_73 = arith.constant 64 : index
    %c0_74 = arith.constant 0 : index
    %60 = vector.load %arg15[%c64_73, %c0_74] : memref<192x286xbf16, #tpu.memory_space<vmem>>, vector<64x286xbf16>
    tpu.vector_store %arg15[%c64_73, %c0_74], %59 {strides = array<i32>} : memref<192x286xbf16, #tpu.memory_space<vmem>>, vector<64x286xbf16>,
    %c0_75 = arith.constant 0 : index
    %c20_76 = arith.constant 20 : index
    %61 = vector.load %arg12[%c0_75, %c20_76] : memref<64x324xbf16, #tpu.memory_space<vmem>>, vector<64x286xbf16>
    %c128_77 = arith.constant 128 : index
    %c0_78 = arith.constant 0 : index
    %62 = vector.load %arg15[%c128_77, %c0_78] : memref<192x286xbf16, #tpu.memory_space<vmem>>, vector<64x286xbf16>
    tpu.vector_store %arg15[%c128_77, %c0_78], %61 {strides = array<i32>} : memref<192x286xbf16, #tpu.memory_space<vmem>>, vector<64x286xbf16>,
    %c1_79 = arith.constant 1 : index
    %c0_80 = arith.constant 0 : index
    %c0_81 = arith.constant 0 : index
    %63 = vector.load %arg4[%c1_79, %c0_80, %c0_81] : memref<3x64x192xbf16, #tpu.memory_space<vmem>>, vector<1x64x192xbf16>
    %64 = vector.shape_cast %63 : vector<1x64x192xbf16> to vector<64x192xbf16>
    %c0_82 = arith.constant 0 : index
    %c0_83 = arith.constant 0 : index
    %65 = vector.load %arg15[%c0_82, %c0_83] : memref<192x286xbf16, #tpu.memory_space<vmem>>, vector<192x286xbf16>
    %cst_84 = arith.constant dense<0.000000e+00> : vector<64x286xf32>
    %66 = tpu.matmul %64, %65, %cst_84 {dimension_numbers = #tpu.dot_dimension_numbers<[1], [0], [0], [1], [0, 0, 1, 1], [], []>} : vector<64x192xbf16>, vector<192x286xbf16>, vector<64x286xf32> -> vector<64x286xf32>
    %c0_85 = arith.constant 0 : index
    %c0_86 = arith.constant 0 : index
    %67 = vector.load %arg17[%c0_85, %c0_86] : memref<64x286xf32, #tpu.memory_space<vmem>>, vector<64x286xf32>
    %68 = arith.addf %67, %66 : vector<64x286xf32>
    %c0_87 = arith.constant 0 : index
    %c0_88 = arith.constant 0 : index
    %69 = vector.load %arg17[%c0_87, %c0_88] : memref<64x286xf32, #tpu.memory_space<vmem>>, vector<64x286xf32>
    tpu.vector_store %arg17[%c0_87, %c0_88], %68 {strides = array<i32>} : memref<64x286xf32, #tpu.memory_space<vmem>>, vector<64x286xf32>,
    %c0_89 = arith.constant 0 : index
    %c36_90 = arith.constant 36 : index
    %70 = vector.load %arg12[%c0_89, %c36_90] : memref<64x324xbf16, #tpu.memory_space<vmem>>, vector<64x286xbf16>
    %c0_91 = arith.constant 0 : index
    %c0_92 = arith.constant 0 : index
    %71 = vector.load %arg15[%c0_91, %c0_92] : memref<192x286xbf16, #tpu.memory_space<vmem>>, vector<64x286xbf16>
    tpu.vector_store %arg15[%c0_91, %c0_92], %70 {strides = array<i32>} : memref<192x286xbf16, #tpu.memory_space<vmem>>, vector<64x286xbf16>,
    %c0_93 = arith.constant 0 : index
    %c37_94 = arith.constant 37 : index
    %72 = vector.load %arg12[%c0_93, %c37_94] : memref<64x324xbf16, #tpu.memory_space<vmem>>, vector<64x286xbf16>
    %c64_95 = arith.constant 64 : index
    %c0_96 = arith.constant 0 : index
    %73 = vector.load %arg15[%c64_95, %c0_96] : memref<192x286xbf16, #tpu.memory_space<vmem>>, vector<64x286xbf16>
    tpu.vector_store %arg15[%c64_95, %c0_96], %72 {strides = array<i32>} : memref<192x286xbf16, #tpu.memory_space<vmem>>, vector<64x286xbf16>,
    %c0_97 = arith.constant 0 : index
    %c38_98 = arith.constant 38 : index
    %74 = vector.load %arg12[%c0_97, %c38_98] : memref<64x324xbf16, #tpu.memory_space<vmem>>, vector<64x286xbf16>
    %c128_99 = arith.constant 128 : index
    %c0_100 = arith.constant 0 : index
    %75 = vector.load %arg15[%c128_99, %c0_100] : memref<192x286xbf16, #tpu.memory_space<vmem>>, vector<64x286xbf16>
    tpu.vector_store %arg15[%c128_99, %c0_100], %74 {strides = array<i32>} : memref<192x286xbf16, #tpu.memory_space<vmem>>, vector<64x286xbf16>,
    %c2_101 = arith.constant 2 : index
    %c0_102 = arith.constant 0 : index
    %c0_103 = arith.constant 0 : index
    %76 = vector.load %arg4[%c2_101, %c0_102, %c0_103] : memref<3x64x192xbf16, #tpu.memory_space<vmem>>, vector<1x64x192xbf16>
    %77 = vector.shape_cast %76 : vector<1x64x192xbf16> to vector<64x192xbf16>
    %c0_104 = arith.constant 0 : index
    %c0_105 = arith.constant 0 : index
    %78 = vector.load %arg15[%c0_104, %c0_105] : memref<192x286xbf16, #tpu.memory_space<vmem>>, vector<192x286xbf16>
    %cst_106 = arith.constant dense<0.000000e+00> : vector<64x286xf32>
    %79 = tpu.matmul %77, %78, %cst_106 {dimension_numbers = #tpu.dot_dimension_numbers<[1], [0], [0], [1], [0, 0, 1, 1], [], []>} : vector<64x192xbf16>, vector<192x286xbf16>, vector<64x286xf32> -> vector<64x286xf32>
    %c0_107 = arith.constant 0 : index
    %c0_108 = arith.constant 0 : index
    %80 = vector.load %arg17[%c0_107, %c0_108] : memref<64x286xf32, #tpu.memory_space<vmem>>, vector<64x286xf32>
    %81 = arith.addf %80, %79 : vector<64x286xf32>
    %c0_109 = arith.constant 0 : index
    %c0_110 = arith.constant 0 : index
    %82 = vector.load %arg17[%c0_109, %c0_110] : memref<64x286xf32, #tpu.memory_space<vmem>>, vector<64x286xf32>
    tpu.vector_store %arg17[%c0_109, %c0_110], %81 {strides = array<i32>} : memref<64x286xf32, #tpu.memory_space<vmem>>, vector<64x286xf32>,
    %c0_111 = arith.constant 0 : index
    %c0_112 = arith.constant 0 : index
    %83 = vector.load %arg17[%c0_111, %c0_112] : memref<64x286xf32, #tpu.memory_space<vmem>>, vector<64x286xf32>
    %c0_113 = arith.constant 0 : index
    %c0_114 = arith.constant 0 : index
    %84 = vector.load %arg5[%c0_113, %c0_114] : memref<64x1xf32, #tpu.memory_space<vmem>>, vector<64x1xf32>
    %85 = vector.broadcast %84 : vector<64x1xf32> to vector<64x286xf32>
    %86 = arith.addf %83, %85 : vector<64x286xf32>
    %cst_115 = arith.constant 0.000000e+00 : f32
    %87 = vector.broadcast %cst_115 : f32 to vector<64x286xf32>
    %88 = arith.maximumf %86, %87 : vector<64x286xf32>
    %cst_116 = arith.constant 0.000000e+00 : bf16
    %89 = vector.broadcast %cst_116 : bf16 to vector<64x19xbf16>
    %c0_117 = arith.constant 0 : index
    %c0_118 = arith.constant 0 : index
    %90 = vector.load %arg13[%c0_117, %c0_118] : memref<64x324xbf16, #tpu.memory_space<vmem>>, vector<64x19xbf16>
    tpu.vector_store %arg13[%c0_117, %c0_118], %89 {strides = array<i32>} : memref<64x324xbf16, #tpu.memory_space<vmem>>, vector<64x19xbf16>,
    %cst_119 = arith.constant 0.000000e+00 : bf16
    %91 = vector.broadcast %cst_119 : bf16 to vector<64x19xbf16>
    %c0_120 = arith.constant 0 : index
    %c305_121 = arith.constant 305 : index
    %92 = vector.load %arg13[%c0_120, %c305_121] : memref<64x324xbf16, #tpu.memory_space<vmem>>, vector<64x19xbf16>
    tpu.vector_store %arg13[%c0_120, %c305_121], %91 {strides = array<i32>} : memref<64x324xbf16, #tpu.memory_space<vmem>>, vector<64x19xbf16>,
    %93 = vector.broadcast %0 : vector<1x286xf32> to vector<64x286xf32>
    %94 = arith.mulf %88, %93 : vector<64x286xf32>
    %95 = arith.truncf %94 : vector<64x286xf32> to vector<64x286xbf16>
    %c0_122 = arith.constant 0 : index
    %c19_123 = arith.constant 19 : index
    %96 = vector.load %arg13[%c0_122, %c19_123] : memref<64x324xbf16, #tpu.memory_space<vmem>>, vector<64x286xbf16>
    tpu.vector_store %arg13[%c0_122, %c19_123], %95 {strides = array<i32>} : memref<64x324xbf16, #tpu.memory_space<vmem>>, vector<64x286xbf16>,
    %c0_124 = arith.constant 0 : index
    %c0_125 = arith.constant 0 : index
    %97 = vector.load %arg13[%c0_124, %c0_125] : memref<64x324xbf16, #tpu.memory_space<vmem>>, vector<64x286xbf16>
    %c0_126 = arith.constant 0 : index
    %c0_127 = arith.constant 0 : index
    %98 = vector.load %arg15[%c0_126, %c0_127] : memref<192x286xbf16, #tpu.memory_space<vmem>>, vector<64x286xbf16>
    tpu.vector_store %arg15[%c0_126, %c0_127], %97 {strides = array<i32>} : memref<192x286xbf16, #tpu.memory_space<vmem>>, vector<64x286xbf16>,
    %c0_128 = arith.constant 0 : index
    %c1_129 = arith.constant 1 : index
    %99 = vector.load %arg13[%c0_128, %c1_129] : memref<64x324xbf16, #tpu.memory_space<vmem>>, vector<64x286xbf16>
    %c64_130 = arith.constant 64 : index
    %c0_131 = arith.constant 0 : index
    %100 = vector.load %arg15[%c64_130, %c0_131] : memref<192x286xbf16, #tpu.memory_space<vmem>>, vector<64x286xbf16>
    tpu.vector_store %arg15[%c64_130, %c0_131], %99 {strides = array<i32>} : memref<192x286xbf16, #tpu.memory_space<vmem>>, vector<64x286xbf16>,
    %c0_132 = arith.constant 0 : index
    %c2_133 = arith.constant 2 : index
    %101 = vector.load %arg13[%c0_132, %c2_133] : memref<64x324xbf16, #tpu.memory_space<vmem>>, vector<64x286xbf16>
    %c128_134 = arith.constant 128 : index
    %c0_135 = arith.constant 0 : index
    %102 = vector.load %arg15[%c128_134, %c0_135] : memref<192x286xbf16, #tpu.memory_space<vmem>>, vector<64x286xbf16>
    tpu.vector_store %arg15[%c128_134, %c0_135], %101 {strides = array<i32>} : memref<192x286xbf16, #tpu.memory_space<vmem>>, vector<64x286xbf16>,
    %c0_136 = arith.constant 0 : index
    %c0_137 = arith.constant 0 : index
    %c0_138 = arith.constant 0 : index
    %103 = vector.load %arg6[%c0_136, %c0_137, %c0_138] : memref<3x64x192xbf16, #tpu.memory_space<vmem>>, vector<1x64x192xbf16>
    %104 = vector.shape_cast %103 : vector<1x64x192xbf16> to vector<64x192xbf16>
    %c0_139 = arith.constant 0 : index
    %c0_140 = arith.constant 0 : index
    %105 = vector.load %arg15[%c0_139, %c0_140] : memref<192x286xbf16, #tpu.memory_space<vmem>>, vector<192x286xbf16>
    %cst_141 = arith.constant dense<0.000000e+00> : vector<64x286xf32>
    %106 = tpu.matmul %104, %105, %cst_141 {dimension_numbers = #tpu.dot_dimension_numbers<[1], [0], [0], [1], [0, 0, 1, 1], [], []>} : vector<64x192xbf16>, vector<192x286xbf16>, vector<64x286xf32> -> vector<64x286xf32>
    %c0_142 = arith.constant 0 : index
    %c0_143 = arith.constant 0 : index
    %107 = vector.load %arg17[%c0_142, %c0_143] : memref<64x286xf32, #tpu.memory_space<vmem>>, vector<64x286xf32>
    tpu.vector_store %arg17[%c0_142, %c0_143], %106 {strides = array<i32>} : memref<64x286xf32, #tpu.memory_space<vmem>>, vector<64x286xf32>,
    %c0_144 = arith.constant 0 : index
    %c18_145 = arith.constant 18 : index
    %108 = vector.load %arg13[%c0_144, %c18_145] : memref<64x324xbf16, #tpu.memory_space<vmem>>, vector<64x286xbf16>
    %c0_146 = arith.constant 0 : index
    %c0_147 = arith.constant 0 : index
    %109 = vector.load %arg15[%c0_146, %c0_147] : memref<192x286xbf16, #tpu.memory_space<vmem>>, vector<64x286xbf16>
    tpu.vector_store %arg15[%c0_146, %c0_147], %108 {strides = array<i32>} : memref<192x286xbf16, #tpu.memory_space<vmem>>, vector<64x286xbf16>,
    %c0_148 = arith.constant 0 : index
    %c19_149 = arith.constant 19 : index
    %110 = vector.load %arg13[%c0_148, %c19_149] : memref<64x324xbf16, #tpu.memory_space<vmem>>, vector<64x286xbf16>
    %c64_150 = arith.constant 64 : index
    %c0_151 = arith.constant 0 : index
    %111 = vector.load %arg15[%c64_150, %c0_151] : memref<192x286xbf16, #tpu.memory_space<vmem>>, vector<64x286xbf16>
    tpu.vector_store %arg15[%c64_150, %c0_151], %110 {strides = array<i32>} : memref<192x286xbf16, #tpu.memory_space<vmem>>, vector<64x286xbf16>,
    %c0_152 = arith.constant 0 : index
    %c20_153 = arith.constant 20 : index
    %112 = vector.load %arg13[%c0_152, %c20_153] : memref<64x324xbf16, #tpu.memory_space<vmem>>, vector<64x286xbf16>
    %c128_154 = arith.constant 128 : index
    %c0_155 = arith.constant 0 : index
    %113 = vector.load %arg15[%c128_154, %c0_155] : memref<192x286xbf16, #tpu.memory_space<vmem>>, vector<64x286xbf16>
    tpu.vector_store %arg15[%c128_154, %c0_155], %112 {strides = array<i32>} : memref<192x286xbf16, #tpu.memory_space<vmem>>, vector<64x286xbf16>,
    %c1_156 = arith.constant 1 : index
    %c0_157 = arith.constant 0 : index
    %c0_158 = arith.constant 0 : index
    %114 = vector.load %arg6[%c1_156, %c0_157, %c0_158] : memref<3x64x192xbf16, #tpu.memory_space<vmem>>, vector<1x64x192xbf16>
    %115 = vector.shape_cast %114 : vector<1x64x192xbf16> to vector<64x192xbf16>
    %c0_159 = arith.constant 0 : index
    %c0_160 = arith.constant 0 : index
    %116 = vector.load %arg15[%c0_159, %c0_160] : memref<192x286xbf16, #tpu.memory_space<vmem>>, vector<192x286xbf16>
    %cst_161 = arith.constant dense<0.000000e+00> : vector<64x286xf32>
    %117 = tpu.matmul %115, %116, %cst_161 {dimension_numbers = #tpu.dot_dimension_numbers<[1], [0], [0], [1], [0, 0, 1, 1], [], []>} : vector<64x192xbf16>, vector<192x286xbf16>, vector<64x286xf32> -> vector<64x286xf32>
    %c0_162 = arith.constant 0 : index
    %c0_163 = arith.constant 0 : index
    %118 = vector.load %arg17[%c0_162, %c0_163] : memref<64x286xf32, #tpu.memory_space<vmem>>, vector<64x286xf32>
    %119 = arith.addf %118, %117 : vector<64x286xf32>
    %c0_164 = arith.constant 0 : index
    %c0_165 = arith.constant 0 : index
    %120 = vector.load %arg17[%c0_164, %c0_165] : memref<64x286xf32, #tpu.memory_space<vmem>>, vector<64x286xf32>
    tpu.vector_store %arg17[%c0_164, %c0_165], %119 {strides = array<i32>} : memref<64x286xf32, #tpu.memory_space<vmem>>, vector<64x286xf32>,
    %c0_166 = arith.constant 0 : index
    %c36_167 = arith.constant 36 : index
    %121 = vector.load %arg13[%c0_166, %c36_167] : memref<64x324xbf16, #tpu.memory_space<vmem>>, vector<64x286xbf16>
    %c0_168 = arith.constant 0 : index
    %c0_169 = arith.constant 0 : index
    %122 = vector.load %arg15[%c0_168, %c0_169] : memref<192x286xbf16, #tpu.memory_space<vmem>>, vector<64x286xbf16>
    tpu.vector_store %arg15[%c0_168, %c0_169], %121 {strides = array<i32>} : memref<192x286xbf16, #tpu.memory_space<vmem>>, vector<64x286xbf16>,
    %c0_170 = arith.constant 0 : index
    %c37_171 = arith.constant 37 : index
    %123 = vector.load %arg13[%c0_170, %c37_171] : memref<64x324xbf16, #tpu.memory_space<vmem>>, vector<64x286xbf16>
    %c64_172 = arith.constant 64 : index
    %c0_173 = arith.constant 0 : index
    %124 = vector.load %arg15[%c64_172, %c0_173] : memref<192x286xbf16, #tpu.memory_space<vmem>>, vector<64x286xbf16>
    tpu.vector_store %arg15[%c64_172, %c0_173], %123 {strides = array<i32>} : memref<192x286xbf16, #tpu.memory_space<vmem>>, vector<64x286xbf16>,
    %c0_174 = arith.constant 0 : index
    %c38_175 = arith.constant 38 : index
    %125 = vector.load %arg13[%c0_174, %c38_175] : memref<64x324xbf16, #tpu.memory_space<vmem>>, vector<64x286xbf16>
    %c128_176 = arith.constant 128 : index
    %c0_177 = arith.constant 0 : index
    %126 = vector.load %arg15[%c128_176, %c0_177] : memref<192x286xbf16, #tpu.memory_space<vmem>>, vector<64x286xbf16>
    tpu.vector_store %arg15[%c128_176, %c0_177], %125 {strides = array<i32>} : memref<192x286xbf16, #tpu.memory_space<vmem>>, vector<64x286xbf16>,
    %c2_178 = arith.constant 2 : index
    %c0_179 = arith.constant 0 : index
    %c0_180 = arith.constant 0 : index
    %127 = vector.load %arg6[%c2_178, %c0_179, %c0_180] : memref<3x64x192xbf16, #tpu.memory_space<vmem>>, vector<1x64x192xbf16>
    %128 = vector.shape_cast %127 : vector<1x64x192xbf16> to vector<64x192xbf16>
    %c0_181 = arith.constant 0 : index
    %c0_182 = arith.constant 0 : index
    %129 = vector.load %arg15[%c0_181, %c0_182] : memref<192x286xbf16, #tpu.memory_space<vmem>>, vector<192x286xbf16>
    %cst_183 = arith.constant dense<0.000000e+00> : vector<64x286xf32>
    %130 = tpu.matmul %128, %129, %cst_183 {dimension_numbers = #tpu.dot_dimension_numbers<[1], [0], [0], [1], [0, 0, 1, 1], [], []>} : vector<64x192xbf16>, vector<192x286xbf16>, vector<64x286xf32> -> vector<64x286xf32>
    %c0_184 = arith.constant 0 : index
    %c0_185 = arith.constant 0 : index
    %131 = vector.load %arg17[%c0_184, %c0_185] : memref<64x286xf32, #tpu.memory_space<vmem>>, vector<64x286xf32>
    %132 = arith.addf %131, %130 : vector<64x286xf32>
    %c0_186 = arith.constant 0 : index
    %c0_187 = arith.constant 0 : index
    %133 = vector.load %arg17[%c0_186, %c0_187] : memref<64x286xf32, #tpu.memory_space<vmem>>, vector<64x286xf32>
    tpu.vector_store %arg17[%c0_186, %c0_187], %132 {strides = array<i32>} : memref<64x286xf32, #tpu.memory_space<vmem>>, vector<64x286xf32>,
    %c0_188 = arith.constant 0 : index
    %c0_189 = arith.constant 0 : index
    %134 = vector.load %arg17[%c0_188, %c0_189] : memref<64x286xf32, #tpu.memory_space<vmem>>, vector<64x286xf32>
    %c0_190 = arith.constant 0 : index
    %c0_191 = arith.constant 0 : index
    %135 = vector.load %arg7[%c0_190, %c0_191] : memref<64x1xf32, #tpu.memory_space<vmem>>, vector<64x1xf32>
    %136 = vector.broadcast %135 : vector<64x1xf32> to vector<64x286xf32>
    %137 = arith.addf %134, %136 : vector<64x286xf32>
    %cst_192 = arith.constant 0.000000e+00 : f32
    %138 = vector.broadcast %cst_192 : f32 to vector<64x286xf32>
    %139 = arith.maximumf %137, %138 : vector<64x286xf32>
    %140 = arith.truncf %139 : vector<64x286xf32> to vector<64x286xbf16>
    %c0_193 = arith.constant 0 : index
    %c0_194 = arith.constant 0 : index
    %141 = vector.load %arg16[%c0_193, %c0_194] : memref<64x286xbf16, #tpu.memory_space<vmem>>, vector<64x286xbf16>
    tpu.vector_store %arg16[%c0_193, %c0_194], %140 {strides = array<i32>} : memref<64x286xbf16, #tpu.memory_space<vmem>>, vector<64x286xbf16>,
    %c0_195 = arith.constant 0 : index
    %c0_196 = arith.constant 0 : index
    %142 = vector.load %arg8[%c0_195, %c0_196] : memref<1x64xbf16, #tpu.memory_space<vmem>>, vector<1x64xbf16>
    %c0_197 = arith.constant 0 : index
    %c0_198 = arith.constant 0 : index
    %143 = vector.load %arg16[%c0_197, %c0_198] : memref<64x286xbf16, #tpu.memory_space<vmem>>, vector<64x286xbf16>
    %cst_199 = arith.constant dense<0.000000e+00> : vector<1x286xf32>
    %144 = tpu.matmul %142, %143, %cst_199 {dimension_numbers = #tpu.dot_dimension_numbers<[1], [0], [0], [1], [0, 0, 1, 1], [], []>} : vector<1x64xbf16>, vector<64x286xbf16>, vector<1x286xf32> -> vector<1x286xf32>
    %c0_200 = arith.constant 0 : index
    %c0_201 = arith.constant 0 : index
    %145 = vector.load %arg9[%c0_200, %c0_201] : memref<1x1xf32, #tpu.memory_space<vmem>>, vector<1x1xf32>
    %146 = vector.broadcast %145 : vector<1x1xf32> to vector<1x286xf32>
    %147 = arith.addf %144, %146 : vector<1x286xf32>
    %c0_202 = arith.constant 0 : index
    %c0_203 = arith.constant 0 : index
    %c0_204 = arith.constant 0 : index
    %148 = vector.load %arg11[%c0_202, %c0_203, %c0_204] : memref<1x1x286xf32, #tpu.memory_space<vmem>>, vector<1x1x286xf32>
    %149 = vector.shape_cast %148 : vector<1x1x286xf32> to vector<1x286xf32>
    %150 = vector.shape_cast %147 : vector<1x286xf32> to vector<1x1x286xf32>
    tpu.vector_store %arg11[%c0_202, %c0_203, %c0_204], %150 {strides = array<i32>} : memref<1x1x286xf32, #tpu.memory_space<vmem>>, vector<1x1x286xf32>,
    return
  }
  func.func @transform_0(%arg0: i32) -> (i32, i32, i32) {
    %c0_i32 = arith.constant 0 : i32
    %c0_i32_0 = arith.constant 0 : i32
    %c0_i32_1 = arith.constant 0 : i32
    return %arg0, %c0_i32, %c0_i32_0 : i32, i32, i32
  }
  func.func @transform_1(%arg0: i32) -> (i32, i32) {
    %c0_i32 = arith.constant 0 : i32
    %c0_i32_0 = arith.constant 0 : i32
    %c0_i32_1 = arith.constant 0 : i32
    return %c0_i32, %c0_i32_0 : i32, i32
  }
  func.func @transform_2(%arg0: i32) -> (i32, i32) {
    %c0_i32 = arith.constant 0 : i32
    %c0_i32_0 = arith.constant 0 : i32
    %c0_i32_1 = arith.constant 0 : i32
    return %c0_i32, %c0_i32_0 : i32, i32
  }
  func.func @transform_3(%arg0: i32) -> (i32, i32, i32) {
    %c0_i32 = arith.constant 0 : i32
    %c0_i32_0 = arith.constant 0 : i32
    %c0_i32_1 = arith.constant 0 : i32
    %c0_i32_2 = arith.constant 0 : i32
    return %c0_i32, %c0_i32_0, %c0_i32_1 : i32, i32, i32
  }
  func.func @transform_4(%arg0: i32) -> (i32, i32) {
    %c0_i32 = arith.constant 0 : i32
    %c0_i32_0 = arith.constant 0 : i32
    %c0_i32_1 = arith.constant 0 : i32
    return %c0_i32, %c0_i32_0 : i32, i32
  }
  func.func @transform_5(%arg0: i32) -> (i32, i32, i32) {
    %c0_i32 = arith.constant 0 : i32
    %c0_i32_0 = arith.constant 0 : i32
    %c0_i32_1 = arith.constant 0 : i32
    %c0_i32_2 = arith.constant 0 : i32
    return %c0_i32, %c0_i32_0, %c0_i32_1 : i32, i32, i32
  }
  func.func @transform_6(%arg0: i32) -> (i32, i32) {
    %c0_i32 = arith.constant 0 : i32
    %c0_i32_0 = arith.constant 0 : i32
    %c0_i32_1 = arith.constant 0 : i32
    return %c0_i32, %c0_i32_0 : i32, i32
  }
  func.func @transform_7(%arg0: i32) -> (i32, i32) {
    %c0_i32 = arith.constant 0 : i32
    %c0_i32_0 = arith.constant 0 : i32
    %c0_i32_1 = arith.constant 0 : i32
    return %c0_i32, %c0_i32_0 : i32, i32
  }
  func.func @transform_8(%arg0: i32) -> (i32, i32) {
    %c0_i32 = arith.constant 0 : i32
    %c0_i32_0 = arith.constant 0 : i32
    %c0_i32_1 = arith.constant 0 : i32
    return %c0_i32, %c0_i32_0 : i32, i32
  }
  func.func @transform_9(%arg0: i32) -> (i32, i32) {
    %c0_i32 = arith.constant 0 : i32
    %c0_i32_0 = arith.constant 0 : i32
    %c0_i32_1 = arith.constant 0 : i32
    return %c0_i32, %c0_i32_0 : i32, i32
  }
  func.func @transform_10(%arg0: i32) -> (i32, i32, i32) {
    %c0_i32 = arith.constant 0 : i32
    %c0_i32_0 = arith.constant 0 : i32
    %c0_i32_1 = arith.constant 0 : i32
    return %arg0, %c0_i32, %c0_i32_0 : i32, i32, i32
  }
}

</mosaic_0001>

<bundles_post_ra>
// kernel: unet_forward.1
= control target key start
LH: loop header
LB: loop body
LE: loop exit
PB: predicated region body
PF: predicated region fallthrough
CT: control target
= control target key end

     0   :  { %s5339_s15 = smov 0   ;;  %s7459_s0 = inlined_call_operand.vmem [shape: bf16[2,3,324], index: 0, kind: input, shape index: {}]   ;;  %s7460_s1 = inlined_call_operand.vmem [shape: bf16[64,27], index: 1, kind: input, shape index: {}]   ;;  %s7461_s2 = inlined_call_operand.vmem [shape: f32[64,1], index: 2, kind: input, shape index: {}]   ;;  %s7462_s3 = inlined_call_operand.vmem [shape: bf16[3,64,192], index: 3, kind: input, shape index: {}]   ;;  %s7463_s4 = inlined_call_operand.vmem [shape: f32[64,1], index: 4, kind: input, shape index: {}]   ;;  %s7464_s5 = inlined_call_operand.vmem [shape: bf16[3,64,192], index: 5, kind: input, shape index: {}]   ;;  %s7465_s6 = inlined_call_operand.vmem [shape: f32[64,1], index: 6, kind: input, shape index: {}]   ;;  %s7466_s7 = inlined_call_operand.vmem [shape: bf16[1,64], index: 7, kind: input, shape index: {}]   ;;  %s7467_s8 = inlined_call_operand.<no memory space> [shape: f32[1,1], index: 8, kind: input, shape index: {}]   ;;  %s7468_s9 = inlined_call_operand.vmem [shape: f32[1,286], index: 9, kind: input, shape index: {}]   ;;  %s7469_s10 = inlined_call_operand.vmem [shape: f32[2,1,286], index: 10, kind: output, shape index: {}]  }
   0x1   :  { %v15_v0 = vstv %s7467_s8 }
   0x2   :  { %16 = vst [vmem:[#allocation8] sm:$0x1] %v15_v0 }
   0x3 LB: > { %s4943_s16 = sadd.s32 4294967295, %s5264_s15   ;;  %p4947_p0 = scmp.ge.s32.totalorder %s5264_s15, 1  ;;  %s5264_s15 = sphi %s5339_s15, %s22_s15  }
   0x4   : > { %p314_p1 = scmp.lt.s32.totalorder %s5264_s15, 3 }
   0x6   : > { %p315_p2 = pnand %p4947_p0, %p314_p1 }
   0x7   : > { %p351_p3 = scmp.lt.s32.totalorder (!%p315_p2), %s4943_s16, 1  ;;  %v368_v1 = vlaneseq (!%p315_p2)  ;;  %v5266_v2 = vmov (!%p315_p2), 1983009808   ;;  %s5267_s20 = smov (!%p315_p2), 109   ;;  %vm7472_vm0 = vcmask (!%p315_p2), 238592   ;;  %vm381_vm4 = vcmask (!%p315_p2), 1041408  }
   0x8   : > { %318 = sbr.rel (%p315_p2) target bundleno = 2022 (0x7e6), region = 60  ;;  %v366_v3 = vunpack.c.l.s4 (!%p315_p2), %v5266_v2  ;;  %s5268_s21 = smov (!%p315_p2), 92   ;;  %vm382_vm1 = vsmask.f32 (!%p315_p2), 1280  ;;  %vm560_vm3 = vsmask.f32 (!%p315_p2), 7954 }
   0x9   : > { %v5350_v4 = vshrl.u32 (!%p315_p2), %v368_v1, 7  ;;  %s5269_s22 = smov (!%p315_p2), 126   ;;  %s5270_s23 = smov (!%p315_p2), 127   ;;  %vm5410_vm2 = vmand (!%p315_p2), %vm7472_vm0, %vm382_vm1  ;;  %vm7473_vm5 = vsmask.f32 (!%p315_p2), 7938  ;;  %vm384_vm6 = vcmask (!%p315_p2), 1045508  }
   0xa   : > { %v367_v5 = vunpack.c.0.s8 (!%p315_p2), %v366_v3  ;;  %s5271_s24 = smov (!%p315_p2), 110   ;;  %s5272_s25 = smov (!%p315_p2), 108   ;;  %vm5425_vm7 = vmand (!%p315_p2), %vm381_vm4, %vm7473_vm5  ;;  %vm385_vm10 = vsmask.f32 (!%p315_p2), 5376  ;;  %vm7470_vm12 = vcmask (!%p315_p2), 220160   ;;  %vm7475_vm15 = vcmask (!%p315_p2), 1043458  }
   0xb   : > { %s5273_s26 = smov (!%p315_p2), 91   ;;  %vm5430_vm8 = vmand (!%p315_p2), %vm384_vm6, %vm560_vm3  ;;  %s5274_s27 = smov (!%p315_p2), 90   ;;  %vm7476_vm3 = vcmask (!%p315_p2), 240642   ;;  %vm7481_vm9 = vsmask.f32 (!%p315_p2), 256  ;;  %vm7480_vm0 = vcmask (!%p315_p2), 237568  }
   0xc   : > { %v5354_v6 = vsub.s32 (!%p315_p2), %v367_v5, %v5350_v4  ;;  %vm5445_vm11 = vmand (!%p315_p2), %vm381_vm4, %vm382_vm1  ;;  %vm599_vm1 = vsmask.f32 (!%p315_p2), 3328  ;;  %vm7477_vm4 = vcmask (!%p315_p2), 1047558   ;;  %vm7484_vm5 = vcmask (!%p315_p2), 1042433   ;;  %s5277_s12 = smov (!%p315_p2), 19  }
   0xd   : > { %vm5458_vm13 = vmand (!%p315_p2), %vm384_vm6, %vm385_vm10  ;;  %vm602_vm6 = vsmask.f32 (!%p315_p2), 7424 }
   0xe   : > { %vm7471_vm14 = vmor (!%p315_p2), %vm5458_vm13, %vm5445_vm11 }
   0xf   : > { %s7588_s16 = smov (!%p351_p3, %s4943_s16), 1  ;;  %vm5501_vm10 = vmand %vm7475_vm15, %vm599_vm1 }
  0x10   : > { %s5134_s8 = smul.u32 6, %s7588_s16 }
  0x11   : > { %s5135_s28 = smul.u32 3, %s7588_s16 }
  0x12   : > { %s5359_s19 = scalar_lea.vmem %s7459_s0, %s5134_s8 }
  0x13   : > { %v570_v7 = vld [vmem:[%s5359_s19] sm:$0x3f]  ;;  %s359_s11 = scalar_lea.vmem %s7469_s10, %s5135_s28 }
  0x14   : > { %v687_v8 = vld [vmem:[%s5359_s19] sm:$0x3f]  ;;  %v586_v10 = vrot.slane %v570_v7, %v5354_v6  ;;  %v572_v11 = vcombine.low %v570_v7, %v570_v7 }
  0x15   : > { %v456_v9 = vld [vmem:[%s5359_s19] sm:$0x3f]  ;;  %v696_v12 = vrot.slane %v687_v8, %v5354_v6  ;;  %v689_v13 = vcombine.high %v687_v8, %v687_v8 }
  0x16   : > { %v396_v14 = vld [vmem:[%s5359_s19] sm:$0x3f]  ;;  %v465_v15 = vrot.slane %v456_v9, %v5354_v6  ;;  %v458_v16 = vcombine.high %v456_v9, %v456_v9  ;;  %589 = vrot.lane.b32.xlu1 %v586_v10, %s5267_s20  ;;  %v579_v21 = vrot.slane %v572_v11, %v5354_v6 }
  0x17   : > { %v405_v17 = vrot.slane %v396_v14, %v5354_v6  ;;  %v398_v18 = vcombine.high %v396_v14, %v396_v14  ;;  %v516_v19 = vld [vmem:[%s5359_s19] sm:$0x3f]  ;;  %v704_v20 = vrot.slane %v696_v12, 7  ;;  %v703_v22 = vrot.slane %v689_v13, %v5354_v6  ;;  %v393_v12 = vld [vmem:[#allocation4 + $0x8] sm:$0x3] }
  0x18   : > { %v525_v23 = vrot.slane %v516_v19, %v5354_v6  ;;  %v5374_v24 = vrot.slane %v465_v15, 5  ;;  %v5377_v25 = vrot.slane %v458_v16, %v5354_v6  ;;  %v613_v30 = vld [vmem:[%s5359_s19] sm:$0x3f]  ;;  %v518_v38 = vcombine.high %v516_v19, %v516_v19 }
  0x19   : > { %v414_v26 = vshrl.u32 %v405_v17, 16  ;;  %v417_v27 = vshll.u32 %v405_v17, 16  ;;  %706 = vrot.lane.b32.xlu0 %v704_v20, %s5268_s21  ;;  %v705_v28 = vrot.slane %v703_v22, 7  ;;  %v412_v29 = vrot.slane %v398_v18, %v5354_v6  ;;  %v729_v41 = vld [vmem:[%s5359_s19] sm:$0x3f] }
  0x1a   : > { %v475_v31 = vrot.slane %v5374_v24, 4  ;;  %v474_v32 = vrot.slane %v5377_v25, 5  ;;  %v534_v34 = vshrl.u32 %v525_v23, 16  ;;  %587 = vrot.lane.b32.xlu1 %v579_v21, %s5267_s20  ;;  %v615_v40 = vcombine.high %v613_v30, %v613_v30  ;;  %v5399_v2 = vld [vmem:[%s5359_s19] sm:$0x3f] }
  0x1b   : > { %v416_v33 = vrot.slane %v414_v26, 6  ;;  %v419_v35 = vrot.slane %v417_v27, 7  ;;  %v422_v36 = vshrl.u32 %v412_v29, 16  ;;  %v425_v37 = vshll.u32 %v412_v29, 16  ;;  %v785_v21 = vld [vmem:[%s5359_s19] sm:$0x3f] }
  0x1c   : > { %v476_v39 = vrot.slane %v474_v32, 4  ;;  %v532_v44 = vrot.slane %v518_v38, %v5354_v6  ;;  %v622_v45 = vrot.slane %v613_v30, %v5354_v6  ;;  %v629_v46 = vrot.slane %v615_v40, %v5354_v6  ;;  %v1098_v40 = vld [vmem:[%s7461_s2 + $0x8] sm:$0xff] }
  0x1d   : > { %481 = vrot.lane.b32.xlu0 %v475_v31, %s5269_s22  ;;  %v424_v42 = vrot.slane %v422_v36, 6  ;;  %v427_v43 = vrot.slane %v425_v37, 7  ;;  %v738_v50 = vrot.slane %v729_v41, %v5354_v6  ;;  %v420_v51 = vor.u32 %v419_v35, %v416_v33  ;;  %v388_v35 = vld [vmem:[#allocation4] sm:$0x33] }
  0x1e   : > { %708 = vrot.lane.b32.xlu1 %v705_v28, %s5268_s21  ;;  %v541_v48 = vshrl.u32 %v532_v44, 16  ;;  %v544_v49 = vshll.u32 %v532_v44, 16  ;;  %v536_v52 = vrot.slane %v534_v34, 7  ;;  %v537_v53 = vshll.u32 %v525_v23, 16  ;;  %v5454_v36 = vld [vmem:[%s7460_s1] sm:$0xff]   ;;  %v1103_v44 = vld [vmem:[%s7461_s2 + $0x30] sm:$0xff] }
  0x1f   : > { %v428_v47 = vor.u32 %v427_v43, %v424_v42  ;;  %v631_v55 = vshll.u32 %v622_v45, 16  ;;  %v635_v56 = vshll.u32 %v629_v46, 16  ;;  %v731_v57 = vcombine.high %v729_v41, %v729_v41  ;;  %5114 = vmatprep.mubr.msk.bf16.mxu1 %vm7470_vm12, %v5454_v36  ;;  %v1099_v41 = vld [vmem:[%s7461_s2 + $0x10] sm:$0xff]  ;;  %v1101_v42 = vld [vmem:[%s7461_s2 + $0x20] sm:$0xff]  ;;  %v1100_v43 = vld [vmem:[%s7461_s2 + $0x18] sm:$0xff] }
  0x20   : > { %v543_v54 = vrot.slane %v541_v48, 7  ;;  %v747_v59 = vshrl.u32 %v738_v50, 16  ;;  %v750_v60 = vshll.u32 %v738_v50, 16  ;;  %v539_v61 = vor.u32 %v537_v53, %v536_v52  ;;  %vm609_vm12 = vmand %vm7476_vm3, %vm599_vm1  ;;  %v610_v48 = vld [vmem:[#allocation4 + $0x14] sm:$0xc] }
  0x21   : > { %483 = vrot.lane.b32.xlu0 %v476_v39, %s5269_s22  ;;  %v633_v62 = vrot.slane %v631_v55, 5  ;;  %v637_v63 = vrot.slane %v635_v56, 5  ;;  %v745_v0 = vrot.slane %v731_v57, %v5354_v6  ;;  %v638_v7 = vshrl.u32 %v622_v45, 16  ;;  %v1097_v39 = vld [vmem:[%s7461_s2] sm:$0xff]  ;;  %v1102_v45 = vld [vmem:[%s7461_s2 + $0x28] sm:$0xff] }
  0x22   : > { %431 = vrot.lane.b32.xlu1 %v428_v47, %s5270_s23  ;;  %v546_v58 = vor.u32 %v544_v49, %v543_v54  ;;  %v749_v3 = vrot.slane %v747_v59, 5  ;;  %v752_v5 = vrot.slane %v750_v60, 6  ;;  %v364_v8 = vcombine.high %v5399_v2, %v5399_v2  ;;  %v605_v59 = vld [vmem:[#allocation4 + $0xc] sm:$0xcc] }
  0x23   : > { %v5159_v9 = vpack.i.bf16 %v637_v63, %v633_v62  ;;  %v755_v10 = vshrl.u32 %v745_v0, 16  ;;  %v758_v11 = vshll.u32 %v745_v0, 16  ;;  %v640_v15 = vrot.slane %v638_v7, 4  ;;  %v513_v7 = vld [vmem:[#allocation4 + $0x14] sm:$0x1] }
  0x24   : > { %v378_v13 = vrot.slane %v364_v8, %v5354_v6  ;;  %v753_v14 = vor.u32 %v752_v5, %v749_v3  ;;  %v7487_v16 = vmov 0  ;;  %v643_v19 = vshrl.u32 %v629_v46, 16  ;;  %v1104_v46 = vld [vmem:[%s7461_s2 + $0x38] sm:$0xff] }
  0x25   : > { %429 = vrot.lane.b32.xlu0 %v420_v51, %s5270_s23  ;;  %v7488_v16 = vsel %vm5410_vm2, 4294967295, %v7487_v16  ;;  %v757_v17 = vrot.slane %v755_v10, 5  ;;  %v760_v18 = vrot.slane %v758_v11, 6  ;;  %v794_v22 = vrot.slane %v785_v21, %v5354_v6  ;;  %v722_v10 = vld [vmem:[#allocation4 + $0x18] sm:$0x66] }
  0x26   : > { %549 = vrot.lane.b32.xlu1 %v546_v58, %s5271_s24  ;;  %v394_v20 = vsel %vm5410_vm2, %v378_v13, %v393_v12  ;;  %v641_v23 = vor.u32 %v640_v15, %v633_v62  ;;  %v787_v26 = vcombine.high %v785_v21, %v785_v21  ;;  %v645_v27 = vrot.slane %v643_v19, 4  ;;  %v726_v62 = vld [vmem:[#allocation4 + $0x20] sm:$0x6] }
  0x27   : > { %395 = vst [vmem:[#allocation4 + $0x8] sm:$0x3] %v394_v20  ;;  %v7489_v28 = vmov 0  ;;  %v7491_v29 = vmov 0  ;;  %v7493_v33 = vmov 0  ;;  %v371_v34 = vrot.slane %v5399_v2, %v5354_v6 }
  0x28   : > { %v7490_v28 = vsel %vm5425_vm7, 4294967295, %v7489_v28  ;;  %v7492_v29 = vsel %vm5430_vm8, 4294967295, %v7491_v29  ;;  %v642_v25 = vrot.slane %v641_v23, 4  ;;  %v801_v30 = vrot.slane %v787_v26, %v5354_v6 }
  0x29   : > { %547 = vrot.lane.b32.xlu0 %v539_v61, %s5271_s24  ;;  %v646_v31 = vor.u32 %v645_v27, %v637_v63  ;;  %v7494_v33 = vsel %vm5445_vm11, 4294967295, %v7493_v33  ;;  %v7495_v37 = vmov 0  ;;  %v389_v6 = vsel %vm7471_vm14, %v371_v34, %v388_v35  ;;  %vm5507_vm14 = vmand %vm7477_vm4, %vm602_vm6 }
  0x2a   : > { %477 = vrot.lane.b32.xlu1 %v5374_v24, %s5269_s22  ;;  %v761_v24 = vor.u32 %v760_v18, %v757_v17  ;;  %v7496_v37 = vsel %vm5458_vm13, 4294967295, %v7495_v37  ;;  %390 = vst [vmem:[#allocation4] sm:$0x33] %v389_v6  ;;  %v5275_v38 = vmov 0   ;;  %vm717_vm11 = vsmask.f32 2304  ;;  %vm5517_vm4 = vmand %vm7480_vm0, %vm7481_vm9 }
  0x2b   : > { %942 = vmatprep.mubr.bf16.mxu0 %v5275_v38  ;;  %5164 = vset.pattern.permute.xlu1 %v5275_v38  ;;  %vm7485_vm1 = vcmask 1046533   ;;  %vm719_vm3 = vsmask.f32 6400  ;;  %v7501_v54 = vmov 0  ;;  %vm501_vm13 = vcmask 1040384  }
  0x2c   : > { %5165 = vset.pattern.permute.xlu0 %v5275_v38  ;;  %v7502_v54 = vsel %vm5517_vm4, 4294967295, %v7501_v54  ;;  %vm5528_vm15 = vmand %vm7485_vm1, %vm719_vm3  ;;  %vm504_vm6 = vcmask 1044484   ;;  %vm505_vm0 = vsmask.f32 4352  ;;  %vm435_vm9 = vcmask 1043456  }
  0x2d   : > { %5160 = vrot.lane.b32.xlu0 %v5159_v9, %s5272_s25  ;;  %vm7507_vm7 = vcmask 239617   ;;  %vm7513_vm3 = vcmask 891904   ;;  %vm7486_vm1 = vcmask 752640   ;;  %vm5545_vm4 = vmand %vm504_vm6, %vm505_vm0  ;;  %vm490_vm0 = vcmask 1031168  }
  0x2e   : > { %762 = vrot.lane.b32.xlu1 %v753_v14, %s5273_s26  ;;  %vm5534_vm8 = vmand %vm7507_vm7, %vm717_vm11  ;;  %vm442_vm7 = vsmask.f32 7942  ;;  %vm7517_vm6 = vcmask 239617   ;;  %v453_v15 = vld [vmem:[#allocation4 + $0x8] sm:$0x6] }
  0x31   : > { %479 = vrot.lane.b32.xlu0 %v474_v32, %s5269_s22  ;;  %v647_v32 = vrot.slane %v646_v31, 4 }
  0x32   : > { %802 = vrot.lane.b32.xlu1 %v794_v22, %s5274_s27  ;;  %v508_v22 = vld [vmem:[#allocation4 + $0xc] sm:$0x11] }
  0x35   : > { %764 = vrot.lane.b32.xlu0 %v761_v24, %s5273_s26 }
  0x36   : > { %652 = vrot.lane.b32.xlu1 %v642_v25, %s5272_s25 }
  0x39   : > { %804 = vrot.lane.b32.xlu0 %v801_v30, %s5274_s27 }
  0x3a   : > { %1107 = vperm.xlu1 %5164, %v1097_v39  }
  0x3d   : > { %654 = vrot.lane.b32.xlu0 %v647_v32, %s5272_s25 }
  0x3e   : > { %1117 = vperm.xlu1 %5164, %v1099_v41  }
  0x41   : > { %1112 = vperm.xlu0 %5165, %v1098_v40   ;;  %v448_v40 = vld [vmem:[#allocation4] sm:$0x66] }
  0x42   : > { %1122 = vperm.xlu1 %5164, %v1100_v43  }
  0x45   : > { %1127 = vperm.xlu0 %5165, %v1101_v42  }
  0x46   : > { %1132 = vperm.xlu1 %5164, %v1102_v45  }
  0x49   : > { %1137 = vperm.xlu0 %5165, %v1103_v44  }
  0x4a   : > { %1142 = vperm.xlu1 %5164, %v1104_v46  }
  0x88   : > { %v590_v50 = vpop.permute.xlu1 %589 }
  0x89   : > { %v611_v51 = vsel %vm609_vm12, %v590_v50, %v610_v48  ;;  %v592_v53 = vrot.slane %v590_v50, 4  ;;  %vm5523_vm12 = vmand %vm7484_vm5, %vm717_vm11  ;;  %vm7510_vm5 = vsmask.f32 256 }
  0x8a   : > { %612 = vst [vmem:[#allocation4 + $0x14] sm:$0xc] %v611_v51  ;;  %vm5540_vm2 = vmand %vm501_vm13, %vm7510_vm5  ;;  %vm445_vm13 = vsmask.f32 7958 }
  0x8b   : > { %v707_v52 = vpop.permute.xlu0 %706  ;;  %vm7516_vm11 = vmor %vm5507_vm14, %vm5501_vm10  ;;  %vm7520_vm14 = vnez %v7502_v54  ;;  %vm7521_vm10 = vcmask 1042433  }
  0x8c   : > { %v588_v55 = vpop.permute.xlu1 %587  ;;  %v710_v8 = vrot.slane %v707_v52, 4  ;;  %vm721_vm5 = vmor %vm5528_vm15, %vm5523_vm12  ;;  %vm437_vm15 = vcmask 1039360  }
  0x8d   : > { %v591_v57 = vrot.slane %v588_v55, 4 }
  0x8f   : > { %v482_v60 = vpop.permute.xlu0 %481  ;;  %v593_v63 = vsel %vm435_vm9, %v591_v57, %v592_v53 }
  0x90   : > { %v595_v2 = vsel %vm7513_vm3, %v588_v55, %v593_v63  ;;  %v709_v3 = vpop.permute.xlu1 %708  ;;  %vm5562_vm3 = vmand %vm7517_vm6, %vm442_vm7  ;;  %v487_v17 = vrot.slane %v482_v60, 4  ;;  %vm7524_vm6 = vcmask 1046533  }
  0x91   : > { %v606_v9 = vsel %vm7516_vm11, %v595_v2, %v605_v59  ;;  %v711_v11 = vrot.slane %v709_v3, 4  ;;  %v727_v12 = vsel %vm5534_vm8, %v709_v3, %v726_v62  ;;  %vm507_vm8 = vmor %vm5545_vm4, %vm5540_vm2  ;;  %vm554_vm2 = vcmask 900096   ;;  %v681_v55 = vld [vmem:[#allocation4 + $0x14] sm:$0x8] }
  0x92   : > { %607 = vst [vmem:[#allocation4 + $0xc] sm:$0xcc] %v606_v9  ;;  %728 = vst [vmem:[#allocation4 + $0x20] sm:$0x6] %v727_v12  ;;  %vm669_vm4 = vcmask 1043459   ;;  %v1206_v59 = vsub.s32 0, %v5350_v4 }
  0x93   : > { %v484_v13 = vpop.permute.xlu0 %483  ;;  %v712_v18 = vsel %vm435_vm9, %v710_v8, %v711_v11  ;;  %vm5576_vm11 = vmand %vm7521_vm10, %vm442_vm7  ;;  %vm7527_vm7 = vsmask.f32 7938  ;;  %vm672_vm10 = vcmask 1047559  }
  0x94   : > { %v488_v19 = vrot.slane %v484_v13, 4  ;;  %v514_v20 = vsel %vm7520_vm14, %v484_v13, %v513_v7  ;;  %v714_v21 = vsel %vm7486_vm1, %v707_v52, %v712_v18  ;;  %v432_v24 = vpop.permute.xlu1 %431  ;;  %vm5588_vm14 = vmand %vm7524_vm6, %vm445_vm13  ;;  %vm773_vm1 = vsmask.f32 7946  ;;  %v5185_v52 = vld [vmem:[%s7460_s1 + $0x10] sm:$0xff]  }
  0x95   : > { %515 = vst [vmem:[#allocation4 + $0x14] sm:$0x1] %v514_v20  ;;  %v723_v26 = vsel %vm721_vm5, %v714_v21, %v722_v10  ;;  %v434_v30 = vrot.slane %v432_v24, 4  ;;  %v454_v31 = vsel %vm5562_vm3, %v432_v24, %v453_v15  ;;  %vm447_vm12 = vmor %vm5588_vm14, %vm5576_vm11  ;;  %vm7528_vm5 = vcmask 238592   ;;  %v816_v20 = vld [vmem:[#allocation4 + $0x2c] sm:$0x3] }
  0x96   : > { %v492_v27 = vsel %vm435_vm9, %v487_v17, %v488_v19  ;;  %724 = vst [vmem:[#allocation4 + $0x18] sm:$0x66] %v723_v26  ;;  %455 = vst [vmem:[#allocation4 + $0x8] sm:$0x6] %v454_v31  ;;  %vm499_vm3 = vcmask 240643  }
  0x97   : > { %v493_v32 = vsel %vm490_vm0, %v482_v60, %v492_v27  ;;  %v430_v34 = vpop.permute.xlu0 %429  ;;  %vm5607_vm13 = vmand %vm7528_vm5, %vm7527_vm7  ;;  %vm673_vm11 = vsmask.f32 7966  ;;  %vm7535_vm7 = vnez %v7492_v29  ;;  %vm7536_vm5 = vnez %v7490_v28 }
  0x98   : > { %v509_v35 = vsel %vm507_vm8, %v493_v32, %v508_v22  ;;  %v433_v6 = vrot.slane %v430_v34, 4  ;;  %v550_v39 = vpop.permute.xlu1 %549  ;;  %vm670_vm8 = vsmask.f32 7950 }
  0x99   : > { %510 = vst [vmem:[#allocation4 + $0xc] sm:$0x11] %v509_v35  ;;  %v552_v43 = vrot.slane %v550_v39, 4  ;;  %vm5615_vm6 = vmand %vm669_vm4, %vm670_vm8  ;;  %vm661_vm4 = vcmask 883712   ;;  %v676_v3 = vld [vmem:[#allocation4 + $0xc] sm:$0x88] }
  0x9a   : > { %v436_v41 = vsel %vm435_vm9, %v433_v6, %v434_v30  ;;  %vm680_vm14 = vmand %vm499_vm3, %vm670_vm8  ;;  %v782_v9 = vld [vmem:[#allocation4 + $0x20] sm:$0xc] }
  0x9b   : > { %v438_v44 = vsel %vm437_vm15, %v430_v34, %v436_v41  ;;  %v548_v45 = vpop.permute.xlu0 %547  ;;  %v813_v34 = vld [vmem:[#allocation4 + $0x24] sm:$0x33] }
  0x9c   : > { %v551_v46 = vrot.slane %v548_v45, 4  ;;  %v567_v47 = vld [vmem:[#allocation4 + $0x14] sm:$0x3]  ;;  %v449_v48 = vsel %vm447_vm12, %v438_v44, %v448_v40  ;;  %v478_v50 = vpop.permute.xlu1 %477  ;;  %vm5621_vm12 = vmand %vm672_vm10, %vm673_vm11  ;;  %vm775_vm10 = vsmask.f32 7962  ;;  %vm7538_vm11 = vcmask 1043458  }
  0x9d   : > { %v568_v49 = vsel %vm5607_vm13, %v550_v39, %v567_v47  ;;  %450 = vst [vmem:[#allocation4] sm:$0x66] %v449_v48  ;;  %vm7537_vm13 = vmor %vm7535_vm7, %vm7536_vm5  ;;  %v485_v2 = vrot.slane %v478_v50, 4  ;;  %v778_v23 = vld [vmem:[#allocation4 + $0x18] sm:$0xcc] }
  0x9e   : > { %v553_v51 = vsel %vm435_vm9, %v551_v46, %v552_v43  ;;  %569 = vst [vmem:[#allocation4 + $0x14] sm:$0x3] %v568_v49  ;;  %vm675_vm8 = vmor %vm5621_vm12, %vm5615_vm6  ;;  %vm7542_vm12 = vcmask 1047558   ;;  %v5276_v46 = vmov 65535  }
  0x9f   : > { %v555_v53 = vsel %vm554_vm2, %v548_v45, %v553_v51  ;;  %v5161_v54 = vpop.permute.xlu0 %5160  ;;  %vm5638_vm7 = vmand %vm7538_vm11, %vm773_vm1  ;;  %vm7547_vm11 = vnez %v7494_v33 }
  0xa0   : > { %v563_v56 = vld [vmem:[#allocation4 + $0xc] sm:$0x33]  ;;  %v5163_v57 = vunpack.i.h.bf16 %v5161_v54  ;;  %v5162_v58 = vunpack.i.l.bf16 %v5161_v54  ;;  %v763_v61 = vpop.permute.xlu1 %762  ;;  %vm5647_vm5 = vmand %vm7542_vm12, %vm775_vm10  ;;  %vm7546_vm10 = vnez %v7496_v37  ;;  %vm898_vm12 = vcmask 1045504  }
  0xa1   : > { %v564_v60 = vsel %vm7537_vm13, %v555_v53, %v563_v56  ;;  %v766_v14 = vrot.slane %v763_v61, 4  ;;  %vm7545_vm13 = vnez %v7488_v16 }
  0xa2   : > { %565 = vst [vmem:[#allocation4 + $0xc] sm:$0x33] %v564_v60  ;;  %v657_v62 = vrot.slane %v5163_v57, 4  ;;  %v656_v63 = vrot.slane %v5162_v58, 4  ;;  %v682_v0 = vsel %vm680_vm14, %v5163_v57, %v681_v55  ;;  %vm7541_vm14 = vcmask 240642   ;;  %v5186_v55 = vld [vmem:[%s7460_s1 + $0x18] sm:$0xff]  }
  0xa3   : > { %v480_v5 = vpop.permute.xlu0 %479  ;;  %683 = vst [vmem:[#allocation4 + $0x14] sm:$0x8] %v682_v0  ;;  %vm781_vm6 = vmand %vm7541_vm14, %vm773_vm1  ;;  %vm7549_vm14 = vcmask 237568  }
  0xa4   : > { %v660_v28 = vsel %vm435_vm9, %v656_v63, %v657_v62  ;;  %v486_v29 = vrot.slane %v480_v5, 4  ;;  %500 = vst.msk [vmem:[#allocation4 + $0x8] sm:$0x8] %vm499_vm3, %v480_v5  ;;  %v803_v10 = vpop.permute.xlu1 %802  ;;  %vm769_vm3 = vcmask 744448   ;;  %vm777_vm1 = vmor %vm5647_vm5, %vm5638_vm7  ;;  %v1210_v62 = vsub.s32 1, %v5350_v4 }
  0xa5   : > { %v662_v8 = vsel %vm661_vm4, %v5162_v58, %v660_v28  ;;  %v806_v22 = vrot.slane %v803_v10, 4  ;;  %vm7548_vm7 = vmor %vm7546_vm10, %vm7547_vm11 }
  0xa6   : > { %v677_v11 = vsel %vm675_vm8, %v662_v8, %v676_v3  ;;  %v489_v12 = vsel %vm435_vm9, %v485_v2, %v486_v29  ;;  %vm809_vm8 = vcmask 736256  }
  0xa7   : > { %678 = vst [vmem:[#allocation4 + $0xc] sm:$0x88] %v677_v11  ;;  %v491_v15 = vsel %vm490_vm0, %v478_v50, %v489_v12  ;;  %v765_v17 = vpop.permute.xlu0 %764  ;;  %v5183_v50 = vld [vmem:[%s7460_s1 + $0x8] sm:$0xff]   ;;  %v1214_v11 = vsub.s32 2, %v5350_v4 }
  0xa8   : > { %498 = vst [vmem:[#allocation4] sm:$0x88] %v491_v15  ;;  %v767_v18 = vrot.slane %v765_v17, 4  ;;  %v783_v19 = vsel %vm781_vm6, %v765_v17, %v782_v9  ;;  %v653_v25 = vpop.permute.xlu1 %652  ;;  %vm897_vm6 = vcmask 1044480  }
  0xa9   : > { %784 = vst [vmem:[#allocation4 + $0x20] sm:$0xc] %v783_v19  ;;  %v658_v6 = vrot.slane %v653_v25, 4  ;;  %v899_v47 = vsel %vm897_vm6, 4294967295, %v5276_v46  ;;  %vm1193_vm6 = vcmask 154624  }
  0xaa   : > { %v768_v21 = vsel %vm435_vm9, %v766_v14, %v767_v18  ;;  %v900_v37 = vsel %vm898_vm12, %v899_v47, 0  ;;  %vm1198_vm12 = vcmask 556424   ;;  %1194 = vst.msk [vmem:[#allocation2] sm:$0xff] %vm1193_vm6, %v5275_v38  ;;  %1195 = vst.msk [vmem:[#allocation2 + $0x18] sm:$0xff] %vm1193_vm6, %v5275_v38 }
  0xab   : > { %v770_v24 = vsel %vm769_vm3, %v763_v61, %v768_v21  ;;  %v805_v26 = vpop.permute.xlu0 %804  ;;  %v5175_v27 = vld [vmem:[#allocation4 + $0x8] ss:$12 sps:$4 sm:$0xff]   ;;  %v361_v61 = vld [vmem:[%s7468_s9] sm:$0x7]  ;;  %1199 = vst.msk [vmem:[#allocation2 + $0x10] sm:$0xff] %vm1198_vm12, %v5275_v38  ;;  %1200 = vst.msk [vmem:[#allocation2 + $0x28] sm:$0xff] %vm1198_vm12, %v5275_v38 }
  0xac   : > { %v779_v30 = vsel %vm777_vm1, %v770_v24, %v778_v23  ;;  %v807_v31 = vrot.slane %v805_v26, 4  ;;  %v817_v32 = vsel %vm7545_vm13, %v805_v26, %v816_v20  ;;  %5110 = vmatprep.subr.bf16.mxu1 %v5175_v27  ;;  %v5704_v28 = vrot.slane %v361_v61, %v1206_v59  ;;  %1196 = vst.msk [vmem:[#allocation2 + $0x30] sm:$0xff] %vm1193_vm6, %v5275_v38 }
  0xad   : > { %780 = vst [vmem:[#allocation4 + $0x18] sm:$0xcc] %v779_v30  ;;  %818 = vst [vmem:[#allocation4 + $0x2c] sm:$0x3] %v817_v32  ;;  %5111 = vmatpush3.bf16.msra.mxu1 %v5175_v27  ;;  %v5708_v9 = vrot.slane %v361_v61, %v1210_v62 }
  0xae   : > { %v808_v35 = vsel %vm435_vm9, %v806_v22, %v807_v31  ;;  %1197 = vst.msk [vmem:[#allocation2 + $0x48] sm:$0xff] %vm1193_vm6, %v5275_v38  ;;  %2971 = vst.msk [vmem:[#allocation3] sm:$0xff] %vm1193_vm6, %v5275_v38 }
  0xaf   : > { %v810_v39 = vsel %vm809_vm8, %v803_v10, %v808_v35  ;;  %v655_v40 = vpop.permute.xlu0 %654  ;;  %v5176_v41 = vld [vmem:[#allocation4 + $0x4] ss:$12 sps:$4 sm:$0xff]   ;;  %v5178_v42 = vld [vmem:[#allocation4] ss:$12 sps:$4 sm:$0xff]   ;;  %1201 = vst.msk [vmem:[#allocation2 + $0x40] sm:$0xff] %vm1198_vm12, %v5275_v38  ;;  %1202 = vst.msk [vmem:[#allocation2 + $0x58] sm:$0xff] %vm1198_vm12, %v5275_v38 }
  0xb0   : > { %v814_v16 = vsel %vm7548_vm7, %v810_v39, %v813_v34  ;;  %v659_v43 = vrot.slane %v655_v40, 4  ;;  %686 = vst.msk [vmem:[#allocation4 + $0x20] sm:$0x1] %vm7549_vm14, %v655_v40  ;;  %910 = vmatprep.subr.bf16.mxu0 %v5176_v41  ;;  %vm1050_vm14 = vcmask 244736  }
  0xb1   : > { %815 = vst [vmem:[#allocation4 + $0x24] sm:$0x33] %v814_v16  ;;  %911 = vmatpush1.bf16.msra.mxu0 %v5178_v42  ;;  %2972 = vst.msk [vmem:[#allocation3 + $0x18] sm:$0xff] %vm1193_vm6, %v5275_v38 }
  0xb2   : > { %v663_v44 = vsel %vm435_vm9, %v658_v6, %v659_v43  ;;  %vm7550_vm9 = vcmask 220160   ;;  %2973 = vst.msk [vmem:[#allocation3 + $0x30] sm:$0xff] %vm1193_vm6, %v5275_v38  ;;  %2974 = vst.msk [vmem:[#allocation3 + $0x48] sm:$0xff] %vm1193_vm6, %v5275_v38  ;;  %v5756_v6 = vrot.slane %v361_v61, %v1214_v11 }
  0xb3   : > { %v664_v45 = vsel %vm661_vm4, %v653_v25, %v663_v44  ;;  %vm7551_vm5 = vmmov %vm7550_vm9  ;;  %2975 = vst.msk [vmem:[#allocation3 + $0x10] sm:$0xff] %vm1198_vm12, %v5275_v38 }
  0xb4   : > { %684 = vst [vmem:[#allocation4 + $0x18] sm:$0x11] %v664_v45  ;;  %vm7552_vm1 = vmmov %vm7551_vm5 }
  0xb5   : > { %vm7553_vm13 = vmmov %vm7552_vm1  ;;  %2976 = vst.msk [vmem:[#allocation3 + $0x28] sm:$0xff] %vm1198_vm12, %v5275_v38 }
  0xb6   : > { %vm7554_vm10 = vmmov %vm7552_vm1  ;;  %2977 = vst.msk [vmem:[#allocation3 + $0x40] sm:$0xff] %vm1198_vm12, %v5275_v38 }
  0xb7   : > { %v5179_v48 = vld [vmem:[#allocation4 + $0x20] ss:$12 sps:$4 sm:$0x3f]   ;;  %vm7555_vm11 = vmmov %vm7552_vm1  ;;  %2978 = vst.msk [vmem:[#allocation3 + $0x58] sm:$0xff] %vm1198_vm12, %v5275_v38 }
  0xb8   : > { %v908_v33 = vand.u32 %v5179_v48, %v900_v37  ;;  %vm7556_vm7 = vmmov %vm7552_vm1 }
  0xb9   : > { %v1108_v56 = vpop.permute.xlu1 %1107 }
  0xba   : > { %5112 = vmatprep.subr.bf16.mxu1 %v908_v33 }
  0xbb   : > { %v5181_v49 = vld [vmem:[#allocation4 + $0x1c] ss:$12 sps:$4 sm:$0x3f]   ;;  %5113 = vmatpush3.bf16.msra.mxu1 %v908_v33  ;;  %v5184_v51 = vld [vmem:[#allocation4 + $0x18] ss:$12 sps:$4 sm:$0x3f]  }
  0xbc   : > { %v905_v53 = vand.u32 %v5181_v49, %v900_v37  ;;  %1676 = vmatprep.subr.bf16.mxu1 %v5275_v38  ;;  %v902_v54 = vand.u32 %v5184_v51, %v900_v37 }
  0xbe   : > { %912 = vmatprep.subr.bf16.mxu0 %v905_v53  ;;  %5115 = vmatmul.mubr.msk.bf16.vlgmr.msra.gmra.mrb[0].mxu1 %vm7550_vm9, %v5183_v50  ;;  %vm1315_vm9 = vcmask 400384  }
  0xbf   : > { %913 = vmatpush1.bf16.msra.mxu0 %v902_v54  ;;  %5118 = vmatprep.mubr.msk.bf16.mxu1 %vm7551_vm5, %v5185_v52  ;;  %vm1312_vm5 = vcmask 1047704  }
  0xc0   : > { %v1113_v0 = vpop.permute.xlu0 %1112 }
  0xc2   : > { %4959 = vmatmul.mubr.msk.bf16.vlgmr.msra.gmra.mrb[0].mxu0 %vm7552_vm1, %v5454_v36  ;;  %v5691_v36 = vpop.permute.xlu1 %1117  ;;  %vm1590_vm1 = vcmask 523264  }
  0xc3   : > { %952 = vmatprep.mubr.bf16.mxu0 %v5275_v38 }
  0xc4   : > { %v5748_v24 = vpop.permute.xlu0 %1127 }
  0xc6   : > { %5119 = vmatmul.mubr.msk.bf16.gmra.mrb[4].mxu1 %vm7553_vm13, %v5186_v55  ;;  %v5706_v29 = vpop.permute.xlu1 %1122  ;;  %vm7557_vm13 = vcmask 891904  }
  0xca   : > { %4960 = vmatmul.mubr.msk.bf16.gmra.mrb[4].mxu0 %vm7554_vm10, %v5183_v50  ;;  %v5759_v41 = vpop.permute.xlu1 %1132  ;;  %vm7558_vm10 = vmmov %vm7557_vm13 }
  0xcb   : > { %962 = vmatprep.mubr.bf16.mxu0 %v5275_v38 }
  0xd2   : > { %4961 = vmatmul.mubr.msk.bf16.gmra.mrb[8].mxu0 %vm7555_vm11, %v5185_v52  ;;  %vm7559_vm11 = vmmov %vm7558_vm10 }
  0xd3   : > { %972 = vmatprep.mubr.bf16.mxu0 %v5275_v38 }
  0xda   : > { %4962 = vmatmul.mubr.msk.bf16.gmra.mrb[12].mxu0 %vm7556_vm7, %v5186_v55  ;;  %vm7560_vm7 = vmmov %vm7558_vm10 }
  0xdb   : > { %vm7561_vm12 = vmmov %vm7560_vm7 }
 0x191   : > { %v5116_v57 = vpop.f32.mrb[0].mxu1 }
 0x192   : > { %1057 = vst.msk [vmem:[#allocation7 + $0x40] sm:$0xff] %vm1050_vm14, %v5116_v57  ;;  %v1017_v58 = vpop.f32.mrb[1].mxu1 }
 0x193   : > { %1051 = vst.msk [vmem:[#allocation7 + $0x10] sm:$0xff] %vm1050_vm14, %v1017_v58  ;;  %v5117_v60 = vpop.f32.mrb[2].mxu1 }
 0x194   : > { %1060 = vst.msk [vmem:[#allocation7 + $0x58] sm:$0xff] %vm1050_vm14, %v5117_v60  ;;  %v1020_v63 = vpop.f32.mrb[3].mxu1 }
 0x195   : > { %1054 = vst.msk [vmem:[#allocation7 + $0x28] sm:$0xff] %vm1050_vm14, %v1020_v63  ;;  %v944_v2 = vpop.f32.mrb[0].mxu0 }
 0x196   : > { %v946_v3 = vpop.f32.mrb[1].mxu0  ;;  %v1145_v5 = vadd.f32 %v1108_v56, %v944_v2 }
 0x197   : > { %v948_v7 = vpop.f32.mrb[2].mxu0  ;;  %v1146_v8 = vadd.f32 %v1108_v56, %v946_v3  ;;  %v1143_v3 = vpop.permute.xlu1 %1142 }
 0x198   : > { %v950_v10 = vpop.f32.mrb[3].mxu0  ;;  %v1148_v12 = vadd.f32 %v1113_v0, %v948_v7  ;;  %v1169_v13 = vmax.f32 %v1145_v5, 0.0 }
 0x199   : > { %v5120_v14 = vpop.f32.mrb[4].mxu1  ;;  %v1081_v15 = vld [vmem:[#allocation7 + $0x40] sm:$0xff]  ;;  %v1149_v17 = vadd.f32 %v1113_v0, %v950_v10  ;;  %v1170_v18 = vmax.f32 %v1146_v8, 0.0 }
 0x19a   : > { %1069 = vst.msk [vmem:[#allocation7 + $0xa0] sm:$0xff] %vm1050_vm14, %v5120_v14  ;;  %v1033_v19 = vpop.f32.mrb[5].mxu1  ;;  %v1153_v20 = vadd.f32 %v5691_v36, %v1081_v15  ;;  %v1075_v21 = vld [vmem:[#allocation7 + $0x10] sm:$0xff]  ;;  %v1172_v22 = vmax.f32 %v1148_v12, 0.0  ;;  %v5746_v23 = vmul.f32 %v5704_v28, %v1169_v13 }
 0x19b   : > { %1063 = vst.msk [vmem:[#allocation7 + $0x70] sm:$0xff] %vm1050_vm14, %v1033_v19  ;;  %v5121_v26 = vpop.f32.mrb[6].mxu1  ;;  %v1084_v27 = vld [vmem:[#allocation7 + $0x58] sm:$0xff]  ;;  %v1147_v25 = vadd.f32 %v1108_v56, %v1075_v21  ;;  %v1173_v30 = vmax.f32 %v1149_v17, 0.0  ;;  %v5752_v31 = vmul.f32 %v5708_v9, %v1170_v18  ;;  %v5770_v56 = vpop.permute.xlu0 %1137 }
 0x19c   : > { %1072 = vst.msk [vmem:[#allocation7 + $0xb8] sm:$0xff] %vm1050_vm14, %v5121_v26  ;;  %v1036_v32 = vpop.f32.mrb[7].mxu1  ;;  %v1156_v34 = vadd.f32 %v5706_v29, %v1084_v27  ;;  %v1177_v35 = vmax.f32 %v1153_v20, 0.0  ;;  %v1078_v39 = vld [vmem:[#allocation7 + $0x28] sm:$0xff]  ;;  %v1222_v40 = vmul.f32 %v5704_v28, %v1172_v22 }
 0x19d   : > { %1066 = vst.msk [vmem:[#allocation7 + $0x88] sm:$0xff] %vm1050_vm14, %v1036_v32  ;;  %v954_v42 = vpop.f32.mrb[4].mxu0  ;;  %v1150_v16 = vadd.f32 %v1113_v0, %v1078_v39  ;;  %v1171_v43 = vmax.f32 %v1147_v25, 0.0  ;;  %v1223_v44 = vmul.f32 %v5708_v9, %v1173_v30 }
 0x19e   : > { %v956_v45 = vpop.f32.mrb[5].mxu0  ;;  %v1180_v46 = vmax.f32 %v1156_v34, 0.0  ;;  %v1243_v47 = vpack.c.bf16 %v1222_v40, %v5746_v23  ;;  %v1151_v37 = vadd.f32 %v5691_v36, %v954_v42  ;;  %v1227_v52 = vmul.f32 %v5756_v6, %v1177_v35 }
 0x19f   : > { %v958_v48 = vpop.f32.mrb[6].mxu0  ;;  %v1174_v33 = vmax.f32 %v1150_v16, 0.0  ;;  %v1244_v49 = vpack.c.bf16 %v1223_v44, %v5752_v31  ;;  %v1152_v50 = vadd.f32 %v5691_v36, %v956_v45  ;;  %v1221_v58 = vmul.f32 %v5756_v6, %v1171_v43 }
 0x1a0   : > { %v960_v51 = vpop.f32.mrb[7].mxu0  ;;  %v1230_v53 = vmul.f32 %v5756_v6, %v1180_v46  ;;  %v1154_v54 = vadd.f32 %v5706_v29, %v958_v48  ;;  %v1175_v55 = vmax.f32 %v1151_v37, 0.0 }
 0x1a1   : > { %v1093_v57 = vld [vmem:[#allocation7 + $0xa0] sm:$0xff]  ;;  %v1224_v60 = vmul.f32 %v5756_v6, %v1174_v33  ;;  %v1155_v61 = vadd.f32 %v5706_v29, %v960_v51  ;;  %v1176_v62 = vmax.f32 %v1152_v50, 0.0 }
 0x1a2   : > { %v1165_v36 = vadd.f32 %v5770_v56, %v1093_v57  ;;  %v1248_v63 = vpack.c.bf16 %v1230_v53, %v1227_v52  ;;  %v1087_v0 = vld [vmem:[#allocation7 + $0x70] sm:$0xff]  ;;  %v1178_v2 = vmax.f32 %v1154_v54, 0.0  ;;  %v1225_v29 = vmul.f32 %v5704_v28, %v1175_v55 }
 0x1a3   : > { %v1245_v5 = vpack.c.bf16 %v1224_v60, %v1221_v58  ;;  %v1096_v7 = vld [vmem:[#allocation7 + $0xb8] sm:$0xff]  ;;  %v1159_v8 = vadd.f32 %v5748_v24, %v1087_v0  ;;  %v1179_v10 = vmax.f32 %v1155_v61, 0.0  ;;  %v1226_v19 = vmul.f32 %v5708_v9, %v1176_v62 }
 0x1a4   : > { %v1189_v11 = vmax.f32 %v1165_v36, 0.0  ;;  %1277 = vrot.lane.b32.xlu1 %v1248_v63, %s5277_s12  ;;  %v1168_v12 = vadd.f32 %v1143_v3, %v1096_v7  ;;  %v1090_v13 = vld [vmem:[#allocation7 + $0x88] sm:$0xff]  ;;  %v1228_v14 = vmul.f32 %v5704_v28, %v1178_v2 }
 0x1a5   : > { %v964_v15 = vpop.f32.mrb[8].mxu0  ;;  %1271 = vrot.lane.b32.xlu0 %v1245_v5, %s5277_s12  ;;  %v1162_v17 = vadd.f32 %v5759_v41, %v1090_v13  ;;  %v1183_v18 = vmax.f32 %v1159_v8, 0.0  ;;  %v1229_v20 = vmul.f32 %v5708_v9, %v1179_v10 }
 0x1a6   : > { %v966_v21 = vpop.f32.mrb[9].mxu0  ;;  %v1192_v22 = vmax.f32 %v1168_v12, 0.0  ;;  %v1246_v23 = vpack.c.bf16 %v1228_v14, %v1225_v29  ;;  %v1157_v26 = vadd.f32 %v5748_v24, %v964_v15  ;;  %v1239_v34 = vmul.f32 %v5756_v6, %v1189_v11 }
 0x1a7   : > { %v968_v27 = vpop.f32.mrb[10].mxu0  ;;  %v1186_v25 = vmax.f32 %v1162_v17, 0.0  ;;  %v1247_v30 = vpack.c.bf16 %v1229_v20, %v1226_v19  ;;  %v1158_v31 = vadd.f32 %v5748_v24, %v966_v21  ;;  %v1233_v42 = vmul.f32 %v5756_v6, %v1183_v18 }
 0x1a8   : > { %v970_v32 = vpop.f32.mrb[11].mxu0  ;;  %1269 = vrot.lane.b32.xlu1 %v1244_v49, %s5277_s12  ;;  %v1242_v35 = vmul.f32 %v5756_v6, %v1192_v22  ;;  %v1160_v39 = vadd.f32 %v5759_v41, %v968_v27  ;;  %v1181_v40 = vmax.f32 %v1157_v26, 0.0 }
 0x1a9   : > { %1267 = vrot.lane.b32.xlu0 %v1243_v47, %s5277_s12  ;;  %v1236_v16 = vmul.f32 %v5756_v6, %v1186_v25  ;;  %v1161_v43 = vadd.f32 %v5759_v41, %v970_v32  ;;  %v1182_v44 = vmax.f32 %v1158_v31, 0.0 }
 0x1aa   : > { %v1254_v24 = vpack.c.bf16 %v1242_v35, %v1239_v34  ;;  %v1184_v45 = vmax.f32 %v1160_v39, 0.0  ;;  %v1231_v48 = vmul.f32 %v5704_v28, %v1181_v40 }
 0x1ab   : > { %v1251_v46 = vpack.c.bf16 %v1236_v16, %v1233_v42  ;;  %v1185_v37 = vmax.f32 %v1161_v43, 0.0  ;;  %v1232_v47 = vmul.f32 %v5708_v9, %v1182_v44 }
 0x1ac   : > { %1289 = vrot.lane.b32.xlu1 %v1254_v24, %s5277_s12  ;;  %v1234_v33 = vmul.f32 %v5704_v28, %v1184_v45 }
 0x1ad   : > { %v974_v49 = vpop.f32.mrb[12].mxu0  ;;  %1283 = vrot.lane.b32.xlu0 %v1251_v46, %s5277_s12  ;;  %v1235_v50 = vmul.f32 %v5708_v9, %v1185_v37  ;;  %v5189_v37 = vld [vmem:[%s7462_s3 + $0x4] ss:$8 sps:$4 sm:$0xff]  }
 0x1ae   : > { %v976_v51 = vpop.f32.mrb[13].mxu0  ;;  %v1249_v41 = vpack.c.bf16 %v1234_v33, %v1231_v48  ;;  %v1163_v52 = vadd.f32 %v5770_v56, %v974_v49  ;;  %4979 = vmatprep.mubr.msk.bf16.mxu1 %vm1590_vm1, %v5189_v37  ;;  %4975 = vmatprep.mubr.msk.bf16.mxu0 %vm1590_vm1, %v5189_v37  ;;  %v2878_v37 = vld [vmem:[%s7463_s4 + $0x18] sm:$0xff] }
 0x1af   : > { %v978_v53 = vpop.f32.mrb[14].mxu0  ;;  %v1250_v54 = vpack.c.bf16 %v1235_v50, %v1232_v47  ;;  %v1164_v55 = vadd.f32 %v5770_v56, %v976_v51 }
 0x1b0   : > { %v980_v57 = vpop.f32.mrb[15].mxu0  ;;  %1273 = vrot.lane.b32.xlu1 %v1246_v23, %s5277_s12  ;;  %v1166_v58 = vadd.f32 %v1143_v3, %v978_v53  ;;  %v1187_v60 = vmax.f32 %v1163_v52, 0.0 }
 0x1b1   : > { %1275 = vrot.lane.b32.xlu0 %v1247_v30, %s5277_s12  ;;  %v1167_v61 = vadd.f32 %v1143_v3, %v980_v57  ;;  %v1188_v62 = vmax.f32 %v1164_v55, 0.0 }
 0x1b2   : > { %v1190_v36 = vmax.f32 %v1166_v58, 0.0  ;;  %v1237_v0 = vmul.f32 %v5704_v28, %v1187_v60 }
 0x1b3   : > { %v1191_v63 = vmax.f32 %v1167_v61, 0.0  ;;  %v1238_v56 = vmul.f32 %v5708_v9, %v1188_v62 }
 0x1b4   : > { %1281 = vrot.lane.b32.xlu1 %v1250_v54, %s5277_s12  ;;  %v1240_v2 = vmul.f32 %v5704_v28, %v1190_v36 }
 0x1b5   : > { %1279 = vrot.lane.b32.xlu0 %v1249_v41, %s5277_s12  ;;  %v1241_v5 = vmul.f32 %v5708_v9, %v1191_v63 }
 0x1b6   : > { %v1252_v7 = vpack.c.bf16 %v1240_v2, %v1237_v0 }
 0x1b7   : > { %v1253_v8 = vpack.c.bf16 %v1241_v5, %v1238_v56 }
 0x1b8   : > { %1285 = vrot.lane.b32.xlu1 %v1252_v7, %s5277_s12 }
 0x1b9   : > { %1287 = vrot.lane.b32.xlu0 %v1253_v8, %s5277_s12 }
 0x216   : > { %v1278_v3 = vpop.permute.xlu1 %1277 }
 0x217   : > { %v1272_v10 = vpop.permute.xlu0 %1271 }
 0x21a   : > { %v1270_v11 = vpop.permute.xlu1 %1269 }
 0x21b   : > { %v1293_v12 = vsel %vm1193_vm6, %v1270_v11, %v1272_v10  ;;  %v1268_v13 = vpop.permute.xlu0 %1267 }
 0x21c   : > { %1316 = vst.msk [vmem:[#allocation2 + $0x10] sm:$0xff] %vm1315_vm9, %v1293_v12  ;;  %v5815_v29 = vsel %vm1193_vm6, %v1268_v13, %v1270_v11 }
 0x21d   : > { %1313 = vst.msk [vmem:[#allocation2] sm:$0xff] %vm1312_vm5, %v1268_v13  ;;  %1603 = vmatprep.subr.bf16.mxu0 %v5815_v29 }
 0x21e   : > { %v1290_v14 = vpop.permute.xlu1 %1289 }
 0x21f   : > { %v1284_v15 = vpop.permute.xlu0 %1283 }
 0x222   : > { %v1274_v17 = vpop.permute.xlu1 %1273 }
 0x223   : > { %1317 = vst.msk [vmem:[#allocation2 + $0x18] sm:$0xff] %vm1312_vm5, %v1274_v17  ;;  %v1276_v19 = vpop.permute.xlu0 %1275  ;;  %v5822_v20 = vld [vmem:[#allocation2 + $0x10] sm:$0xff] }
 0x224   : > { %v5819_v18 = vld [vmem:[#allocation2] sm:$0xff]  ;;  %v5825_v21 = vsel %vm1193_vm6, %v1274_v17, %v1276_v19  ;;  %v1295_v22 = vsel %vm1193_vm6, %v1276_v19, %v1278_v3  ;;  %1378 = vrot.lane.b32.xlu1 %v5822_v20, %s5270_s23  ;;  %1340 = vst.msk [vmem:[#allocation5 + $0x10] sm:$0xff] %vm1050_vm14, %v5822_v20 }
 0x225   : > { %1374 = vrot.lane.b32.xlu0 %v5819_v18, %s5270_s23  ;;  %1319 = vst.msk [vmem:[#allocation2 + $0x28] sm:$0xff] %vm1315_vm9, %v1295_v22  ;;  %1604 = vmatpush1.bf16.msra.mxu0 %v5819_v18 }
 0x226   : > { %v1282_v23 = vpop.permute.xlu1 %1281  ;;  %1605 = vmatprep.subr.bf16.mxu0 %v5825_v21 }
 0x227   : > { %v1280_v26 = vpop.permute.xlu0 %1279  ;;  %v1297_v27 = vsel %vm1193_vm6, %v1282_v23, %v1284_v15 }
 0x228   : > { %1458 = vrot.lane.b32.xlu1 %v5822_v20, %s5269_s22  ;;  %1320 = vst.msk [vmem:[#allocation2 + $0x30] sm:$0xff] %vm1312_vm5, %v1280_v26  ;;  %v5844_v25 = vsel %vm1193_vm6, %v1280_v26, %v1282_v23 }
 0x229   : > { %1454 = vrot.lane.b32.xlu0 %v5819_v18, %s5269_s22  ;;  %1322 = vst.msk [vmem:[#allocation2 + $0x40] sm:$0xff] %vm1315_vm9, %v1297_v27 }
 0x22a   : > { %v5847_v30 = vld [vmem:[#allocation2 + $0x18] sm:$0xff]  ;;  %v1286_v31 = vpop.permute.xlu1 %1285 }
 0x22b   : > { %v1520_v32 = vld [vmem:[#allocation5 + $0x10] sm:$0xff]  ;;  %1323 = vst.msk [vmem:[#allocation2 + $0x48] sm:$0xff] %vm1312_vm5, %v1286_v31  ;;  %v1288_v34 = vpop.permute.xlu0 %1287  ;;  %1606 = vmatpush1.bf16.msra.mxu0 %v5847_v30 }
 0x22c   : > { %1677 = vmatpush1.bf16.msra.mxu1 %v1520_v32  ;;  %v5854_v35 = vsel %vm1193_vm6, %v1286_v31, %v1288_v34  ;;  %v1299_v39 = vsel %vm1193_vm6, %v1288_v34, %v1290_v14  ;;  %v5857_v40 = vld [vmem:[#allocation2 + $0x28] sm:$0xff]  ;;  %1793 = vrot.lane.b32.xlu1 %v5822_v20, %s5271_s24 }
 0x22d   : > { %1789 = vrot.lane.b32.xlu0 %v5819_v18, %s5271_s24  ;;  %1325 = vst.msk [vmem:[#allocation2 + $0x58] sm:$0xff] %vm1315_vm9, %v1299_v39  ;;  %1678 = vmatprep.subr.bf16.mxu1 %v5275_v38 }
 0x22e   : > { %1343 = vst.msk [vmem:[#allocation5 + $0x28] sm:$0xff] %vm1050_vm14, %v5857_v40  ;;  %1607 = vmatprep.subr.bf16.mxu0 %v5844_v25 }
 0x22f   : > { %v5866_v42 = vld [vmem:[#allocation2 + $0x30] sm:$0xff] }
 0x230   : > { %v5868_v16 = vld [vmem:[#allocation2 + $0x40] sm:$0xff]  ;;  %1608 = vmatpush1.bf16.msra.mxu0 %v5866_v42  ;;  %1873 = vrot.lane.b32.xlu1 %v5822_v20, %s5267_s20 }
 0x231   : > { %1869 = vrot.lane.b32.xlu0 %v5819_v18, %s5267_s20  ;;  %1346 = vst.msk [vmem:[#allocation5 + $0x40] sm:$0xff] %vm1050_vm14, %v5868_v16  ;;  %1609 = vmatprep.subr.bf16.mxu0 %v5854_v35 }
 0x232   : > { %v5878_v43 = vld [vmem:[#allocation2 + $0x48] sm:$0xff] }
 0x234   : > { %v5882_v24 = vld [vmem:[#allocation2 + $0x58] sm:$0xff]  ;;  %1610 = vmatpush1.bf16.msra.mxu0 %v5878_v43  ;;  %1380 = vrot.lane.b32.xlu1 %v5847_v30, %s5270_s23 }
 0x235   : > { %1376 = vrot.lane.b32.xlu0 %v5815_v29, %s5270_s23  ;;  %v1523_v44 = vld [vmem:[#allocation5 + $0x28] sm:$0xff]  ;;  %1349 = vst.msk [vmem:[#allocation5 + $0x58] sm:$0xff] %vm1050_vm14, %v5882_v24 }
 0x236   : > { %1679 = vmatpush1.bf16.msra.mxu1 %v1523_v44 }
 0x237   : > { %1680 = vmatprep.subr.bf16.mxu1 %v5275_v38 }
 0x238   : > { %v1526_v45 = vld [vmem:[#allocation5 + $0x40] sm:$0xff]  ;;  %1460 = vrot.lane.b32.xlu1 %v5847_v30, %s5269_s22 }
 0x239   : > { %1456 = vrot.lane.b32.xlu0 %v5815_v29, %s5269_s22 }
 0x23a   : > { %1681 = vmatpush1.bf16.msra.mxu1 %v1526_v45  ;;  %v2877_v45 = vld [vmem:[%s7463_s4 + $0x10] sm:$0xff] }
 0x23b   : > { %1682 = vmatprep.subr.bf16.mxu1 %v5275_v38 }
 0x23c   : > { %v1529_v46 = vld [vmem:[#allocation5 + $0x58] sm:$0xff]  ;;  %1795 = vrot.lane.b32.xlu1 %v5847_v30, %s5271_s24 }
 0x23d   : > { %1791 = vrot.lane.b32.xlu0 %v5815_v29, %s5271_s24 }
 0x23e   : > { %1683 = vmatpush1.bf16.msra.mxu1 %v1529_v46 }
 0x23f   : > { %1684 = vmatprep.subr.bf16.mxu1 %v5275_v38 }
 0x240   : > { %1875 = vrot.lane.b32.xlu1 %v5847_v30, %s5267_s20 }
 0x241   : > { %1871 = vrot.lane.b32.xlu0 %v5815_v29, %s5267_s20 }
 0x244   : > { %1382 = vrot.lane.b32.xlu1 %v5825_v21, %s5270_s23 }
 0x245   : > { %1384 = vrot.lane.b32.xlu0 %v5857_v40, %s5270_s23 }
 0x248   : > { %1462 = vrot.lane.b32.xlu1 %v5825_v21, %s5269_s22 }
 0x249   : > { %1464 = vrot.lane.b32.xlu0 %v5857_v40, %s5269_s22 }
 0x24c   : > { %1797 = vrot.lane.b32.xlu1 %v5825_v21, %s5271_s24 }
 0x24d   : > { %1799 = vrot.lane.b32.xlu0 %v5857_v40, %s5271_s24 }
 0x250   : > { %1877 = vrot.lane.b32.xlu1 %v5825_v21, %s5267_s20 }
 0x251   : > { %1879 = vrot.lane.b32.xlu0 %v5857_v40, %s5267_s20 }
 0x254   : > { %1390 = vrot.lane.b32.xlu1 %v5868_v16, %s5270_s23 }
 0x255   : > { %1386 = vrot.lane.b32.xlu0 %v5866_v42, %s5270_s23 }
 0x258   : > { %1470 = vrot.lane.b32.xlu1 %v5868_v16, %s5269_s22 }
 0x259   : > { %1466 = vrot.lane.b32.xlu0 %v5866_v42, %s5269_s22 }
 0x25c   : > { %1805 = vrot.lane.b32.xlu1 %v5868_v16, %s5271_s24 }
 0x25d   : > { %1801 = vrot.lane.b32.xlu0 %v5866_v42, %s5271_s24 }
 0x260   : > { %1392 = vrot.lane.b32.xlu1 %v5878_v43, %s5270_s23 }
 0x261   : > { %1388 = vrot.lane.b32.xlu0 %v5844_v25, %s5270_s23 }
 0x264   : > { %1472 = vrot.lane.b32.xlu1 %v5878_v43, %s5269_s22 }
 0x265   : > { %1468 = vrot.lane.b32.xlu0 %v5844_v25, %s5269_s22 }
 0x268   : > { %1807 = vrot.lane.b32.xlu1 %v5878_v43, %s5271_s24 }
 0x269   : > { %1803 = vrot.lane.b32.xlu0 %v5844_v25, %s5271_s24 }
 0x26c   : > { %1394 = vrot.lane.b32.xlu1 %v5854_v35, %s5270_s23 }
 0x26d   : > { %1883 = vrot.lane.b32.xlu0 %v5844_v25, %s5267_s20 }
 0x270   : > { %1885 = vrot.lane.b32.xlu1 %v5868_v16, %s5267_s20 }
 0x271   : > { %1396 = vrot.lane.b32.xlu0 %v5882_v24, %s5270_s23 }
 0x274   : > { %1887 = vrot.lane.b32.xlu1 %v5878_v43, %s5267_s20 }
 0x275   : > { %1881 = vrot.lane.b32.xlu0 %v5866_v42, %s5267_s20 }
 0x278   : > { %1953 = vrot.lane.b32.xlu1 %v5822_v20, %s5272_s25 }
 0x279   : > { %1951 = vrot.lane.b32.xlu0 %v5815_v29, %s5272_s25 }
 0x27c   : > { %1474 = vrot.lane.b32.xlu1 %v5854_v35, %s5269_s22 }
 0x27d   : > { %1949 = vrot.lane.b32.xlu0 %v5819_v18, %s5272_s25 }
 0x280   : > { %1957 = vrot.lane.b32.xlu1 %v5825_v21, %s5272_s25 }
 0x281   : > { %1476 = vrot.lane.b32.xlu0 %v5882_v24, %s5269_s22 }
 0x284   : > { %1955 = vrot.lane.b32.xlu1 %v5847_v30, %s5272_s25 }
 0x285   : > { %1959 = vrot.lane.b32.xlu0 %v5857_v40, %s5272_s25 }
 0x288   : > { %1965 = vrot.lane.b32.xlu1 %v5868_v16, %s5272_s25 }
 0x289   : > { %1963 = vrot.lane.b32.xlu0 %v5844_v25, %s5272_s25 }
 0x28c   : > { %1809 = vrot.lane.b32.xlu1 %v5854_v35, %s5271_s24 }
 0x28d   : > { %1961 = vrot.lane.b32.xlu0 %v5866_v42, %s5272_s25 }
 0x290   : > { %1967 = vrot.lane.b32.xlu1 %v5878_v43, %s5272_s25 }
 0x291   : > { %1811 = vrot.lane.b32.xlu0 %v5882_v24, %s5271_s24 }
 0x294   : > { %2336 = vrot.lane.b32.xlu1 %v5822_v20, %s5268_s21 }
 0x295   : > { %2334 = vrot.lane.b32.xlu0 %v5815_v29, %s5268_s21 }
 0x296   : > { %v1379_v33 = vpop.permute.xlu1 %1378 }
 0x297   : > { %v1375_v48 = vpop.permute.xlu0 %1374  ;;  %1420 = vst.msk [vmem:[#allocation5 + $0x70] sm:$0xff] %vm1050_vm14, %v1379_v33 }
 0x298   : > { %2340 = vrot.lane.b32.xlu1 %v5825_v21, %s5268_s21 }
 0x299   : > { %2332 = vrot.lane.b32.xlu0 %v5819_v18, %s5268_s21 }
 0x29a   : > { %v6000_v47 = vpop.permute.xlu1 %1458 }
 0x29b   : > { %v5998_v49 = vpop.permute.xlu0 %1454  ;;  %1500 = vst.msk [vmem:[#allocation5 + $0xd0] sm:$0xff] %vm1050_vm14, %v6000_v47 }
 0x29c   : > { %1889 = vrot.lane.b32.xlu1 %v5854_v35, %s5267_s20 }
 0x29d   : > { %2342 = vrot.lane.b32.xlu0 %v5857_v40, %s5268_s21 }
 0x29e   : > { %v1532_v51 = vld [vmem:[#allocation5 + $0x70] sm:$0xff]  ;;  %v6010_v41 = vpop.permute.xlu1 %1793 }
 0x29f   : > { %v6008_v50 = vpop.permute.xlu0 %1789  ;;  %1685 = vmatpush1.bf16.msra.mxu1 %v1532_v51  ;;  %1835 = vst.msk [vmem:[#allocation5 + $0x10] sm:$0xff] %vm1050_vm14, %v6010_v41  ;;  %v2879_v51 = vld [vmem:[%s7463_s4 + $0x20] sm:$0xff] }
 0x2a0   : > { %1686 = vmatprep.subr.bf16.mxu1 %v5275_v38  ;;  %2338 = vrot.lane.b32.xlu1 %v5847_v30, %s5268_s21 }
 0x2a1   : > { %1891 = vrot.lane.b32.xlu0 %v5882_v24, %s5267_s20 }
 0x2a2   : > { %v6021_v53 = vpop.permute.xlu1 %1873 }
 0x2a3   : > { %v6019_v52 = vpop.permute.xlu0 %1869  ;;  %1915 = vst.msk [vmem:[#allocation5 + $0x70] sm:$0xff] %vm1050_vm14, %v6021_v53 }
 0x2a4   : > { %2348 = vrot.lane.b32.xlu1 %v5868_v16, %s5268_s21 }
 0x2a5   : > { %2346 = vrot.lane.b32.xlu0 %v5844_v25, %s5268_s21 }
 0x2a6   : > { %v1381_v58 = vpop.permute.xlu1 %1380 }
 0x2a7   : > { %v1377_v54 = vpop.permute.xlu0 %1376 }
 0x2a8   : > { %v1398_v55 = vsel %vm437_vm15, %v1375_v48, %v1377_v54  ;;  %v1399_v57 = vsel %vm437_vm15, %v1377_v54, %v1379_v33  ;;  %2350 = vrot.lane.b32.xlu1 %v5878_v43, %s5268_s21 }
 0x2a9   : > { %2344 = vrot.lane.b32.xlu0 %v5866_v42, %s5268_s21  ;;  %1611 = vmatprep.subr.bf16.mxu0 %v1399_v57  ;;  %v2880_v57 = vld [vmem:[%s7463_s4 + $0x28] sm:$0xff] }
 0x2aa   : > { %1612 = vmatpush1.bf16.msra.mxu0 %v1398_v55  ;;  %v6037_v61 = vpop.permute.xlu1 %1460 }
 0x2ab   : > { %v6035_v60 = vpop.permute.xlu0 %1456 }
 0x2ac   : > { %1969 = vrot.lane.b32.xlu1 %v5854_v35, %s5272_s25  ;;  %v1478_v33 = vsel %vm490_vm0, %v5998_v49, %v6035_v60  ;;  %v1544_v49 = vld [vmem:[#allocation5 + $0xd0] sm:$0xff] }
 0x2ad   : > { %2414 = vrot.lane.b32.xlu0 %v5815_v29, %s5273_s26 }
 0x2ae   : > { %v6045_v36 = vpop.permute.xlu1 %1795 }
 0x2af   : > { %v6043_v62 = vpop.permute.xlu0 %1791 }
 0x2b0   : > { %2416 = vrot.lane.b32.xlu1 %v5822_v20, %s5273_s26 }
 0x2b1   : > { %1971 = vrot.lane.b32.xlu0 %v5882_v24, %s5272_s25 }
 0x2b2   : > { %v6053_v0 = vpop.permute.xlu1 %1875 }
 0x2b3   : > { %v6051_v63 = vpop.permute.xlu0 %1871 }
 0x2b4   : > { %2420 = vrot.lane.b32.xlu1 %v5825_v21, %s5273_s26 }
 0x2b5   : > { %2412 = vrot.lane.b32.xlu0 %v5819_v18, %s5273_s26 }
 0x2b6   : > { %v1383_v56 = vpop.permute.xlu1 %1382 }
 0x2b7   : > { %v1385_v2 = vpop.permute.xlu0 %1384  ;;  %v1400_v5 = vsel %vm437_vm15, %v1381_v58, %v1383_v56 }
 0x2b8   : > { %1423 = vst.msk [vmem:[#allocation5 + $0x88] sm:$0xff] %vm1050_vm14, %v1385_v2  ;;  %v1401_v7 = vsel %vm437_vm15, %v1383_v56, %v1385_v2  ;;  %2418 = vrot.lane.b32.xlu1 %v5847_v30, %s5273_s26  ;;  %v2881_v56 = vld [vmem:[%s7463_s4 + $0x30] sm:$0xff] }
 0x2b9   : > { %2422 = vrot.lane.b32.xlu0 %v5857_v40, %s5273_s26  ;;  %1613 = vmatprep.subr.bf16.mxu0 %v1401_v7 }
 0x2ba   : > { %1614 = vmatpush1.bf16.msra.mxu0 %v1400_v5  ;;  %v6070_v3 = vpop.permute.xlu1 %1462 }
 0x2bb   : > { %v6066_v8 = vpop.permute.xlu0 %1464 }
 0x2bc   : > { %1503 = vst.msk [vmem:[#allocation5 + $0xe8] sm:$0xff] %vm1050_vm14, %v6066_v8  ;;  %2352 = vrot.lane.b32.xlu1 %v5854_v35, %s5268_s21 }
 0x2bd   : > { %2426 = vrot.lane.b32.xlu0 %v5844_v25, %s5273_s26 }
 0x2be   : > { %v6080_v12 = vpop.permute.xlu1 %1797 }
 0x2bf   : > { %v6076_v10 = vpop.permute.xlu0 %1799  ;;  %v1535_v11 = vld [vmem:[#allocation5 + $0x88] sm:$0xff] }
 0x2c0   : > { %1838 = vst.msk [vmem:[#allocation5 + $0x28] sm:$0xff] %vm1050_vm14, %v6076_v10  ;;  %1687 = vmatpush1.bf16.msra.mxu1 %v1535_v11  ;;  %2428 = vrot.lane.b32.xlu1 %v5868_v16, %s5273_s26 }
 0x2c1   : > { %2354 = vrot.lane.b32.xlu0 %v5882_v24, %s5268_s21  ;;  %1688 = vmatprep.subr.bf16.mxu1 %v5275_v38 }
 0x2c2   : > { %v6091_v14 = vpop.permute.xlu1 %1877 }
 0x2c3   : > { %v6087_v13 = vpop.permute.xlu0 %1879  ;;  %v1547_v11 = vld [vmem:[#allocation5 + $0xe8] sm:$0xff] }
 0x2c4   : > { %1918 = vst.msk [vmem:[#allocation5 + $0x88] sm:$0xff] %vm1050_vm14, %v6087_v13  ;;  %2430 = vrot.lane.b32.xlu1 %v5878_v43, %s5273_s26 }
 0x2c5   : > { %2424 = vrot.lane.b32.xlu0 %v5866_v42, %s5273_s26 }
 0x2c6   : > { %v1391_v17 = vpop.permute.xlu1 %1390 }
 0x2c7   : > { %v1387_v15 = vpop.permute.xlu0 %1386  ;;  %1426 = vst.msk [vmem:[#allocation5 + $0xa0] sm:$0xff] %vm1050_vm14, %v1391_v17 }
 0x2c8   : > { %2496 = vrot.lane.b32.xlu1 %v5822_v20, %s5274_s27 }
 0x2c9   : > { %2494 = vrot.lane.b32.xlu0 %v5815_v29, %s5274_s27 }
 0x2ca   : > { %v6104_v22 = vpop.permute.xlu1 %1470 }
 0x2cb   : > { %v6102_v19 = vpop.permute.xlu0 %1466  ;;  %1506 = vst.msk [vmem:[#allocation5 + $0x100] sm:$0xff] %vm1050_vm14, %v6104_v22 }
 0x2cc   : > { %2432 = vrot.lane.b32.xlu1 %v5854_v35, %s5273_s26 }
 0x2cd   : > { %2492 = vrot.lane.b32.xlu0 %v5819_v18, %s5274_s27 }
 0x2ce   : > { %v6114_v26 = vpop.permute.xlu1 %1805  ;;  %v1538_v29 = vld [vmem:[#allocation5 + $0xa0] sm:$0xff] }
 0x2cf   : > { %v6112_v23 = vpop.permute.xlu0 %1801  ;;  %1841 = vst.msk [vmem:[#allocation5 + $0x40] sm:$0xff] %vm1050_vm14, %v6114_v26  ;;  %1689 = vmatpush1.bf16.msra.mxu1 %v1538_v29  ;;  %v1814_v29 = vsel %vm554_vm2, %v6043_v62, %v6010_v41  ;;  %v1816_v41 = vsel %vm554_vm2, %v6080_v12, %v6076_v10 }
 0x2d0   : > { %2500 = vrot.lane.b32.xlu1 %v5825_v21, %s5274_s27  ;;  %1690 = vmatprep.subr.bf16.mxu1 %v5275_v38 }
 0x2d1   : > { %2434 = vrot.lane.b32.xlu0 %v5882_v24, %s5273_s26 }
 0x2d2   : > { %v1393_v31 = vpop.permute.xlu1 %1392 }
 0x2d3   : > { %v1389_v18 = vpop.permute.xlu0 %1388 }
 0x2d4   : > { %v1402_v20 = vsel %vm437_vm15, %v1387_v15, %v1389_v18  ;;  %v1403_v27 = vsel %vm437_vm15, %v1389_v18, %v1391_v17  ;;  %2498 = vrot.lane.b32.xlu1 %v5847_v30, %s5274_s27  ;;  %v5190_v18 = vld [vmem:[%s7462_s3 + $0x14] ss:$8 sps:$4 sm:$0xff]  }
 0x2d5   : > { %2502 = vrot.lane.b32.xlu0 %v5857_v40, %s5274_s27  ;;  %1615 = vmatprep.subr.bf16.mxu0 %v1403_v27  ;;  %v1550_v27 = vld [vmem:[#allocation5 + $0x100] sm:$0xff] }
 0x2d6   : > { %1616 = vmatpush1.bf16.msra.mxu0 %v1402_v20  ;;  %v6129_v34 = vpop.permute.xlu1 %1472 }
 0x2d7   : > { %v1469_v32 = vpop.permute.xlu0 %1468 }
 0x2d8   : > { %2508 = vrot.lane.b32.xlu1 %v5868_v16, %s5274_s27  ;;  %v1483_v2 = vsel %vm490_vm0, %v1469_v32, %v6104_v22 }
 0x2d9   : > { %2506 = vrot.lane.b32.xlu0 %v5844_v25, %s5274_s27  ;;  %v2875_v25 = vld [vmem:[%s7463_s4] sm:$0xff] }
 0x2da   : > { %v6137_v39 = vpop.permute.xlu1 %1807 }
 0x2db   : > { %v6135_v21 = vpop.permute.xlu0 %1803 }
 0x2dc   : > { %2512 = vrot.lane.b32.xlu1 %v5854_v35, %s5274_s27  ;;  %v1818_v10 = vsel %vm554_vm2, %v6135_v21, %v6114_v26 }
 0x2dd   : > { %2504 = vrot.lane.b32.xlu0 %v5866_v42, %s5274_s27  ;;  %v2876_v42 = vld [vmem:[%s7463_s4 + $0x8] sm:$0xff] }
 0x2de   : > { %v1395_v40 = vpop.permute.xlu1 %1394 }
 0x2df   : > { %v6143_v30 = vpop.permute.xlu0 %1883 }
 0x2e0   : > { %2510 = vrot.lane.b32.xlu1 %v5878_v43, %s5274_s27  ;;  %v1479_v43 = vsel %vm490_vm0, %v6035_v60, %v6000_v47  ;;  %v1481_v47 = vsel %vm490_vm0, %v6070_v3, %v6066_v8  ;;  %v1480_v60 = vsel %vm490_vm0, %v6037_v61, %v6070_v3  ;;  %v2882_v61 = vld [vmem:[%s7463_s4 + $0x38] sm:$0xff]  ;;  %v1482_v8 = vsel %vm490_vm0, %v6102_v19, %v1469_v32  ;;  %v5187_v19 = vld [vmem:[%s7462_s3] ss:$8 sps:$4 sm:$0xff]  }
 0x2e1   : > { %2514 = vrot.lane.b32.xlu0 %v5882_v24, %s5274_s27  ;;  %v1404_v24 = vsel %vm437_vm15, %v1393_v31, %v1395_v40  ;;  %v1813_v32 = vsel %vm554_vm2, %v6008_v50, %v6043_v62  ;;  %v1815_v50 = vsel %vm554_vm2, %v6045_v36, %v6080_v12  ;;  %v5192_v62 = vld [vmem:[%s7462_s3 + $0x10] ss:$8 sps:$4 sm:$0xff]   ;;  %v2016_v12 = vld [vmem:[#allocation5 + $0x10] sm:$0xff] }
 0x2e2   : > { %v6157_v44 = vpop.permute.xlu1 %1885 }
 0x2e3   : > { %v1397_v16 = vpop.permute.xlu0 %1396  ;;  %1921 = vst.msk [vmem:[#allocation5 + $0xa0] sm:$0xff] %vm1050_vm14, %v6157_v44 }
 0x2e4   : > { %v1405_v35 = vsel %vm437_vm15, %v1395_v40, %v1397_v16  ;;  %1429 = vst.msk [vmem:[#allocation5 + $0xb8] sm:$0xff] %vm1050_vm14, %v1397_v16  ;;  %2890 = vperm.xlu1 %5164, %v2876_v42   ;;  %v5193_v16 = vld [vmem:[%s7462_s3 + $0x24] ss:$8 sps:$4 sm:$0xff]  }
 0x2e5   : > { %2885 = vperm.xlu0 %5165, %v2875_v25   ;;  %1617 = vmatprep.subr.bf16.mxu0 %v1405_v35  ;;  %v1817_v35 = vsel %vm554_vm2, %v6112_v23, %v6135_v21  ;;  %v5195_v23 = vld [vmem:[%s7462_s3 + $0x20] ss:$8 sps:$4 sm:$0xff]   ;;  %v1894_v21 = vsel %vm7557_vm13, %v6051_v63, %v6021_v53  ;;  %v1896_v53 = vsel %vm7559_vm11, %v6091_v14, %v6087_v13  ;;  %vm7562_vm13 = vmmov %vm7560_vm7 }
 0x2e6   : > { %1618 = vmatpush1.bf16.msra.mxu0 %v1404_v24  ;;  %v6173_v48 = vpop.permute.xlu1 %1887  ;;  %v2019_v24 = vld [vmem:[#allocation5 + $0x28] sm:$0xff]  ;;  %v1898_v13 = vsel %vm7561_vm12, %v6143_v30, %v6157_v44  ;;  %vm7564_vm11 = vmmov %vm7560_vm7 }
 0x2e7   : > { %v6168_v46 = vpop.permute.xlu0 %1881  ;;  %1619 = vmatprep.subr.bf16.mxu0 %v1479_v43 }
 0x2e8   : > { %2900 = vperm.xlu1 %5164, %v2878_v37  }
 0x2e9   : > { %2895 = vperm.xlu0 %5165, %v2877_v45  }
 0x2ea   : > { %1620 = vmatpush1.bf16.msra.mxu0 %v1478_v33  ;;  %v6189_v58 = vpop.permute.xlu1 %1953  ;;  %v5196_v33 = vld [vmem:[%s7462_s3 + $0x34] ss:$8 sps:$4 sm:$0xff]  }
 0x2eb   : > { %v6184_v54 = vpop.permute.xlu0 %1951  ;;  %v1541_v55 = vld [vmem:[#allocation5 + $0xb8] sm:$0xff]  ;;  %1621 = vmatprep.subr.bf16.mxu0 %v1481_v47  ;;  %1995 = vst.msk [vmem:[#allocation5 + $0xd0] sm:$0xff] %vm1050_vm14, %v6189_v58 }
 0x2ec   : > { %1691 = vmatpush1.bf16.msra.mxu1 %v1541_v55  ;;  %2910 = vperm.xlu1 %5164, %v2880_v57   ;;  %v1893_v55 = vsel %vm7558_vm10, %v6019_v52, %v6051_v63  ;;  %v1895_v52 = vsel %vm7560_vm7, %v6053_v0, %v6091_v14  ;;  %v5198_v63 = vld [vmem:[%s7462_s3 + $0x30] ss:$8 sps:$4 sm:$0xff]   ;;  %v1897_v14 = vsel %vm7562_vm13, %v6168_v46, %v6143_v30  ;;  %vm7563_vm10 = vmmov %vm7560_vm7  ;;  %vm7565_vm7 = vcmask 752640  }
 0x2ed   : > { %2905 = vperm.xlu0 %5165, %v2879_v51   ;;  %1692 = vmatprep.subr.bf16.mxu1 %v5275_v38  ;;  %v2022_v51 = vld [vmem:[#allocation5 + $0x40] sm:$0xff]  ;;  %v1974_v30 = vsel %vm661_vm4, %v6184_v54, %v6189_v58  ;;  %vm7566_vm12 = vmmov %vm7565_vm7 }
 0x2ee   : > { %1622 = vmatpush1.bf16.msra.mxu0 %v1480_v60  ;;  %v1475_v7 = vpop.permute.xlu1 %1474  ;;  %vm7567_vm13 = vmmov %vm7565_vm7 }
 0x2ef   : > { %v6202_v5 = vpop.permute.xlu0 %1949  ;;  %1623 = vmatprep.subr.bf16.mxu0 %v1483_v2  ;;  %v1484_v22 = vsel %vm490_vm0, %v6129_v34, %v1475_v7  ;;  %v5201_v2 = vld [vmem:[%s7462_s3 + $0x44] ss:$8 sps:$4 sm:$0xff]  }
 0x2f0   : > { %1693 = vmatpush1.bf16.msra.mxu1 %v1544_v49  ;;  %2920 = vperm.xlu1 %5164, %v2882_v61   ;;  %v2028_v61 = vld [vmem:[#allocation5 + $0x70] sm:$0xff] }
 0x2f1   : > { %2915 = vperm.xlu0 %5165, %v2881_v56   ;;  %1694 = vmatprep.subr.bf16.mxu1 %v5275_v38 }
 0x2f2   : > { %1624 = vmatpush1.bf16.msra.mxu0 %v1482_v8  ;;  %v6212_v17 = vpop.permute.xlu1 %1957 }
 0x2f3   : > { %v1477_v3 = vpop.permute.xlu0 %1476 }
 0x2f4   : > { %v1485_v15 = vsel %vm490_vm0, %v1475_v7, %v1477_v3  ;;  %1509 = vst.msk [vmem:[#allocation5 + $0x118] sm:$0xff] %vm1050_vm14, %v1477_v3  ;;  %1695 = vmatpush1.bf16.msra.mxu1 %v1547_v11  ;;  %v2031_v7 = vld [vmem:[#allocation5 + $0x88] sm:$0xff] }
 0x2f5   : > { %1696 = vmatprep.subr.bf16.mxu1 %v5275_v38  ;;  %1625 = vmatprep.subr.bf16.mxu0 %v1485_v15  ;;  %v2034_v15 = vld [vmem:[#allocation5 + $0xa0] sm:$0xff] }
 0x2f6   : > { %1626 = vmatpush1.bf16.msra.mxu0 %v1484_v22  ;;  %v6230_v31 = vpop.permute.xlu1 %1955 }
 0x2f7   : > { %v6226_v20 = vpop.permute.xlu0 %1959  ;;  %2098 = vmatprep.subr.bf16.mxu0 %v1814_v29 }
 0x2f8   : > { %1998 = vst.msk [vmem:[#allocation5 + $0xe8] sm:$0xff] %vm1050_vm14, %v6226_v20  ;;  %1697 = vmatpush1.bf16.msra.mxu1 %v1550_v27  ;;  %v1976_v58 = vsel %vm661_vm4, %v6212_v17, %v6226_v20  ;;  %v1975_v27 = vsel %vm661_vm4, %v6230_v31, %v6212_v17  ;;  %v2040_v20 = vld [vmem:[#allocation5 + $0xd0] sm:$0xff] }
 0x2f9   : > { %1698 = vmatprep.subr.bf16.mxu1 %v5275_v38  ;;  %1636 = vmatmul.mubr.bf16.vlgmr.msra.gmra.mrb[16].mxu0 %v5187_v19 }
 0x2fa   : > { %2099 = vmatpush1.bf16.msra.mxu0 %v1813_v32  ;;  %4976 = vmatprep.mubr.msk.bf16.mxu0 %vm1590_vm1, %v5190_v18  ;;  %v6242_v25 = vpop.permute.xlu1 %1965 }
 0x2fb   : > { %v6240_v34 = vpop.permute.xlu0 %1963  ;;  %v1553_v40 = vld [vmem:[#allocation5 + $0x118] sm:$0xff]  ;;  %2100 = vmatprep.subr.bf16.mxu0 %v1816_v41  ;;  %2001 = vst.msk [vmem:[#allocation5 + $0x100] sm:$0xff] %vm1050_vm14, %v6242_v25 }
 0x2fc   : > { %1699 = vmatpush1.bf16.msra.mxu1 %v1553_v40 }
 0x2fd   : > { %2171 = vmatprep.subr.bf16.mxu1 %v5275_v38 }
 0x2fe   : > { %2101 = vmatpush1.bf16.msra.mxu0 %v1815_v50  ;;  %v1810_v42 = vpop.permute.xlu1 %1809 }
 0x2ff   : > { %1709 = vmatmul.mubr.bf16.vlgmr.msra.gmra.mrb[8].mxu1 %v5187_v19  ;;  %v6259_v36 = vpop.permute.xlu0 %1961  ;;  %2102 = vmatprep.subr.bf16.mxu0 %v1818_v10  ;;  %v1819_v37 = vsel %vm554_vm2, %v6137_v39, %v1810_v42  ;;  %v2043_v31 = vld [vmem:[#allocation5 + $0xe8] sm:$0xff] }
 0x300   : > { %2172 = vmatpush1.bf16.msra.mxu1 %v2016_v12  ;;  %4980 = vmatprep.mubr.msk.bf16.mxu1 %vm1590_vm1, %v5190_v18  ;;  %v1977_v41 = vsel %vm661_vm4, %v6259_v36, %v6240_v34  ;;  %v5202_v10 = vld [vmem:[%s7462_s3 + $0x54] ss:$8 sps:$4 sm:$0xff]  }
 0x301   : > { %2173 = vmatprep.subr.bf16.mxu1 %v5275_v38  ;;  %1646 = vmatmul.mubr.bf16.gmra.mrb[20].mxu0 %v5192_v62 }
 0x302   : > { %2103 = vmatpush1.bf16.msra.mxu0 %v1817_v35  ;;  %4977 = vmatprep.mubr.msk.bf16.mxu0 %vm1590_vm1, %v5193_v16  ;;  %v6269_v45 = vpop.permute.xlu1 %1967  ;;  %v2046_v36 = vld [vmem:[#allocation5 + $0x100] sm:$0xff] }
 0x303   : > { %v1812_v26 = vpop.permute.xlu0 %1811 }
 0x304   : > { %v1820_v43 = vsel %vm554_vm2, %v1810_v42, %v1812_v26  ;;  %1844 = vst.msk [vmem:[#allocation5 + $0x58] sm:$0xff] %vm1050_vm14, %v1812_v26  ;;  %2174 = vmatpush1.bf16.msra.mxu1 %v2019_v24 }
 0x305   : > { %2175 = vmatprep.subr.bf16.mxu1 %v5275_v38  ;;  %2104 = vmatprep.subr.bf16.mxu0 %v1820_v43 }
 0x306   : > { %2105 = vmatpush1.bf16.msra.mxu0 %v1819_v37  ;;  %v6285_v39 = vpop.permute.xlu1 %2336  ;;  %v5204_v37 = vld [vmem:[%s7462_s3 + $0x50] ss:$8 sps:$4 sm:$0xff]  }
 0x307   : > { %v6283_v47 = vpop.permute.xlu0 %2334  ;;  %2106 = vmatprep.subr.bf16.mxu0 %v1894_v21  ;;  %1717 = vmatmul.mubr.bf16.gmra.mrb[12].mxu1 %v5192_v62  ;;  %2378 = vst.msk [vmem:[#allocation5 + $0x10] sm:$0xff] %vm1050_vm14, %v6285_v39  ;;  %v5205_v21 = vld [vmem:[%s7462_s3 + $0x64] ss:$8 sps:$4 sm:$0xff]  }
 0x308   : > { %2176 = vmatpush1.bf16.msra.mxu1 %v2022_v51  ;;  %4981 = vmatprep.mubr.msk.bf16.mxu1 %vm1590_vm1, %v5193_v16  ;;  %v2357_v62 = vsel %vm7565_vm7, %v6283_v47, %v6285_v39 }
 0x309   : > { %2177 = vmatprep.subr.bf16.mxu1 %v5275_v38  ;;  %1656 = vmatmul.mubr.bf16.gmra.mrb[24].mxu0 %v5195_v23 }
 0x30a   : > { %2107 = vmatpush1.bf16.msra.mxu0 %v1893_v55  ;;  %4978 = vmatprep.mubr.msk.bf16.mxu0 %vm1590_vm1, %v5196_v33  ;;  %v6300_v60 = vpop.permute.xlu1 %2340 }
 0x30b   : > { %v6298_v57 = vpop.permute.xlu0 %2332  ;;  %v2025_v49 = vld [vmem:[#allocation5 + $0x58] sm:$0xff]  ;;  %2108 = vmatprep.subr.bf16.mxu0 %v1896_v53 }
 0x30c   : > { %2178 = vmatpush1.bf16.msra.mxu1 %v2025_v49  ;;  %v2356_v42 = vsel %vm7566_vm12, %v6298_v57, %v6283_v47  ;;  %vm7570_vm12 = vmmov %vm7565_vm7 }
 0x30d   : > { %2179 = vmatprep.subr.bf16.mxu1 %v5275_v38 }
 0x30e   : > { %2109 = vmatpush1.bf16.msra.mxu0 %v1895_v52  ;;  %v1890_v0 = vpop.permute.xlu1 %1889  ;;  %v2559_v47 = vld [vmem:[#allocation5 + $0x10] sm:$0xff] }
 0x30f   : > { %v6315_v56 = vpop.permute.xlu0 %2342  ;;  %2110 = vmatprep.subr.bf16.mxu0 %v1898_v13  ;;  %1725 = vmatmul.mubr.bf16.gmra.mrb[16].mxu1 %v5195_v23  ;;  %v1899_v11 = vsel %vm7564_vm11, %v6173_v48, %v1890_v0  ;;  %v1973_v48 = vsel %vm661_vm4, %v6202_v5, %v6184_v54  ;;  %v1978_v54 = vsel %vm661_vm4, %v6240_v34, %v6242_v25  ;;  %v5199_v34 = vld [vmem:[%s7462_s3 + $0x40] ss:$8 sps:$4 sm:$0xff]   ;;  %vm7569_vm11 = vmmov %vm7565_vm7  ;;  %v5208_v13 = vld [vmem:[%s7462_s3 + $0x74] ss:$8 sps:$4 sm:$0xff]  }
 0x310   : > { %2381 = vst.msk [vmem:[#allocation5 + $0x28] sm:$0xff] %vm1050_vm14, %v6315_v56  ;;  %2180 = vmatpush1.bf16.msra.mxu1 %v2028_v61  ;;  %4982 = vmatprep.mubr.msk.bf16.mxu1 %vm1590_vm1, %v5196_v33  ;;  %v2359_v35 = vsel %vm7567_vm13, %v6300_v60, %v6315_v56  ;;  %vm7571_vm13 = vmmov %vm7565_vm7  ;;  %v5207_v52 = vld [vmem:[%s7462_s3 + $0x60] ss:$8 sps:$4 sm:$0xff]  }
 0x311   : > { %2181 = vmatprep.subr.bf16.mxu1 %v5275_v38  ;;  %1666 = vmatmul.mubr.bf16.gmra.mrb[28].mxu0 %v5198_v63 }
 0x312   : > { %2111 = vmatpush1.bf16.msra.mxu0 %v1897_v14  ;;  %4999 = vmatprep.mubr.msk.bf16.mxu0 %vm1590_vm1, %v5201_v2  ;;  %v6327_v3 = vpop.permute.xlu1 %2338 }
 0x313   : > { %v1892_v44 = vpop.permute.xlu0 %1891 }
 0x314   : > { %v1900_v8 = vsel %vm7563_vm10, %v1890_v0, %v1892_v44  ;;  %1924 = vst.msk [vmem:[#allocation5 + $0xb8] sm:$0xff] %vm1050_vm14, %v1892_v44  ;;  %2182 = vmatpush1.bf16.msra.mxu1 %v2031_v7  ;;  %vm7568_vm10 = vmmov %vm7565_vm7 }
 0x315   : > { %2183 = vmatprep.subr.bf16.mxu1 %v5275_v38  ;;  %2112 = vmatprep.subr.bf16.mxu0 %v1900_v8 }
 0x316   : > { %2113 = vmatpush1.bf16.msra.mxu0 %v1899_v11  ;;  %v2349_v22 = vpop.permute.xlu1 %2348  ;;  %v5210_v11 = vld [vmem:[%s7462_s3 + $0x70] ss:$8 sps:$4 sm:$0xff]  }
 0x317   : > { %v6335_v46 = vpop.permute.xlu0 %2346  ;;  %2114 = vmatprep.subr.bf16.mxu0 %v1974_v30  ;;  %1733 = vmatmul.mubr.bf16.gmra.mrb[20].mxu1 %v5198_v63  ;;  %2384 = vst.msk [vmem:[#allocation5 + $0x40] sm:$0xff] %vm1050_vm14, %v2349_v22  ;;  %v2562_v53 = vld [vmem:[#allocation5 + $0x28] sm:$0xff] }
 0x318   : > { %2184 = vmatpush1.bf16.msra.mxu1 %v2034_v15  ;;  %5003 = vmatprep.mubr.msk.bf16.mxu1 %vm1590_vm1, %v5201_v2  ;;  %v2361_v23 = vsel %vm7569_vm11, %v6335_v46, %v2349_v22 }
 0x319   : > { %2185 = vmatprep.subr.bf16.mxu1 %v5275_v38 }
 0x31a   : > { %2115 = vmatpush1.bf16.msra.mxu0 %v1973_v48  ;;  %v6346_v18 = vpop.permute.xlu1 %2350 }
 0x31b   : > { %v2345_v19 = vpop.permute.xlu0 %2344  ;;  %v2037_v29 = vld [vmem:[#allocation5 + $0xb8] sm:$0xff]  ;;  %2116 = vmatprep.subr.bf16.mxu0 %v1976_v58 }
 0x31c   : > { %2186 = vmatpush1.bf16.msra.mxu1 %v2037_v29  ;;  %v2360_v39 = vsel %vm7565_vm7, %v2345_v19, %v6335_v46  ;;  %v5213_v46 = vld [vmem:[%s7462_s3 + $0x84] ss:$8 sps:$4 sm:$0xff]  }
 0x31d   : > { %2187 = vmatprep.subr.bf16.mxu1 %v5275_v38 }
 0x31e   : > { %2117 = vmatpush1.bf16.msra.mxu0 %v1975_v27  ;;  %v1970_v32 = vpop.permute.xlu1 %1969  ;;  %v2565_v56 = vld [vmem:[#allocation5 + $0x40] sm:$0xff] }
 0x31f   : > { %v6355_v5 = vpop.permute.xlu0 %2414  ;;  %2118 = vmatprep.subr.bf16.mxu0 %v1978_v54  ;;  %v1979_v50 = vsel %vm661_vm4, %v6269_v45, %v1970_v32  ;;  %v2358_v45 = vsel %vm7568_vm10, %v6327_v3, %v6300_v60 }
 0x320   : > { %2188 = vmatpush1.bf16.msra.mxu1 %v2040_v20 }
 0x321   : > { %2189 = vmatprep.subr.bf16.mxu1 %v5275_v38 }
 0x322   : > { %2119 = vmatpush1.bf16.msra.mxu0 %v1977_v41  ;;  %v2417_v25 = vpop.permute.xlu1 %2416 }
 0x323   : > { %v1972_v17 = vpop.permute.xlu0 %1971  ;;  %2458 = vst.msk [vmem:[#allocation5 + $0x70] sm:$0xff] %vm1050_vm14, %v2417_v25  ;;  %v2437_v63 = vsel %vm769_vm3, %v6355_v5, %v2417_v25 }
 0x324   : > { %v1980_v40 = vsel %vm661_vm4, %v1970_v32, %v1972_v17  ;;  %2004 = vst.msk [vmem:[#allocation5 + $0x118] sm:$0xff] %vm1050_vm14, %v1972_v17  ;;  %2190 = vmatpush1.bf16.msra.mxu1 %v2043_v31 }
 0x325   : > { %2191 = vmatprep.subr.bf16.mxu1 %v5275_v38  ;;  %2120 = vmatprep.subr.bf16.mxu0 %v1980_v40 }
 0x326   : > { %2121 = vmatpush1.bf16.msra.mxu0 %v1979_v50  ;;  %v6376_v12 = vpop.permute.xlu1 %2420 }
 0x327   : > { %v2413_v16 = vpop.permute.xlu0 %2412  ;;  %2641 = vmatprep.subr.bf16.mxu0 %v2357_v62 }
 0x328   : > { %2192 = vmatpush1.bf16.msra.mxu1 %v2046_v36  ;;  %v2436_v0 = vsel %vm769_vm3, %v2413_v16, %v6355_v5 }
 0x329   : > { %2193 = vmatprep.subr.bf16.mxu1 %v5275_v38  ;;  %2131 = vmatmul.mubr.bf16.vlgmr.msra.gmra.mrb[32].mxu0 %v5199_v34 }
 0x32a   : > { %2642 = vmatpush1.bf16.msra.mxu0 %v2356_v42  ;;  %5000 = vmatprep.mubr.msk.bf16.mxu0 %vm1590_vm1, %v5202_v10  ;;  %v2419_v43 = vpop.permute.xlu1 %2418  ;;  %v2571_v22 = vld [vmem:[#allocation5 + $0x70] sm:$0xff] }
 0x32b   : > { %v2423_v26 = vpop.permute.xlu0 %2422  ;;  %v2049_v24 = vld [vmem:[#allocation5 + $0x118] sm:$0xff]  ;;  %2643 = vmatprep.subr.bf16.mxu0 %v2359_v35  ;;  %v2438_v3 = vsel %vm769_vm3, %v2419_v43, %v6376_v12 }
 0x32c   : > { %2461 = vst.msk [vmem:[#allocation5 + $0x88] sm:$0xff] %vm1050_vm14, %v2423_v26  ;;  %2194 = vmatpush1.bf16.msra.mxu1 %v2049_v24  ;;  %v2439_v14 = vsel %vm769_vm3, %v6376_v12, %v2423_v26 }
 0x32d   : > { %2714 = vmatprep.subr.bf16.mxu1 %v5275_v38 }
 0x32e   : > { %2644 = vmatpush1.bf16.msra.mxu0 %v2358_v45  ;;  %v2353_v51 = vpop.permute.xlu1 %2352  ;;  %v5211_v45 = vld [vmem:[%s7462_s3 + $0x80] ss:$8 sps:$4 sm:$0xff]  }
 0x32f   : > { %2204 = vmatmul.mubr.bf16.vlgmr.msra.gmra.mrb[24].mxu1 %v5199_v34  ;;  %v2427_v33 = vpop.permute.xlu0 %2426  ;;  %2645 = vmatprep.subr.bf16.mxu0 %v2361_v23  ;;  %v2362_v60 = vsel %vm7571_vm13, %v6346_v18, %v2353_v51 }
 0x330   : > { %2715 = vmatpush1.bf16.msra.mxu1 %v2559_v47  ;;  %5004 = vmatprep.mubr.msk.bf16.mxu1 %vm1590_vm1, %v5202_v10  ;;  %v5217_v47 = vld [vmem:[%s7462_s3 + $0xa4] ss:$8 sps:$4 sm:$0xff]  }
 0x331   : > { %2716 = vmatprep.subr.bf16.mxu1 %v5275_v38  ;;  %2141 = vmatmul.mubr.bf16.gmra.mrb[36].mxu0 %v5204_v37 }
 0x332   : > { %2646 = vmatpush1.bf16.msra.mxu0 %v2360_v39  ;;  %5001 = vmatprep.mubr.msk.bf16.mxu0 %vm1590_vm1, %v5205_v21  ;;  %v2429_v49 = vpop.permute.xlu1 %2428  ;;  %v5220_v39 = vld [vmem:[%s7462_s3 + $0xb4] ss:$8 sps:$4 sm:$0xff]  }
 0x333   : > { %v2355_v55 = vpop.permute.xlu0 %2354  ;;  %2464 = vst.msk [vmem:[#allocation5 + $0xa0] sm:$0xff] %vm1050_vm14, %v2429_v49  ;;  %v2441_v30 = vsel %vm769_vm3, %v2427_v33, %v2429_v49  ;;  %v2574_v29 = vld [vmem:[#allocation5 + $0x88] sm:$0xff] }
 0x334   : > { %v2363_v57 = vsel %vm7570_vm12, %v2353_v51, %v2355_v55  ;;  %2387 = vst.msk [vmem:[#allocation5 + $0x58] sm:$0xff] %vm1050_vm14, %v2355_v55  ;;  %2717 = vmatpush1.bf16.msra.mxu1 %v2562_v53  ;;  %v5219_v51 = vld [vmem:[%s7462_s3 + $0xa0] ss:$8 sps:$4 sm:$0xff]   ;;  %v5222_v55 = vld [vmem:[%s7462_s3 + $0xb0] ss:$8 sps:$4 sm:$0xff]  }
 0x335   : > { %2718 = vmatprep.subr.bf16.mxu1 %v5275_v38  ;;  %2647 = vmatprep.subr.bf16.mxu0 %v2363_v57 }
 0x336   : > { %2648 = vmatpush1.bf16.msra.mxu0 %v2362_v60  ;;  %v2431_v61 = vpop.permute.xlu1 %2430 }
 0x337   : > { %2212 = vmatmul.mubr.bf16.gmra.mrb[28].mxu1 %v5204_v37  ;;  %v2425_v2 = vpop.permute.xlu0 %2424  ;;  %2649 = vmatprep.subr.bf16.mxu0 %v2437_v63  ;;  %v5214_v37 = vld [vmem:[%s7462_s3 + $0x94] ss:$8 sps:$4 sm:$0xff]  }
 0x338   : > { %2719 = vmatpush1.bf16.msra.mxu1 %v2565_v56  ;;  %5005 = vmatprep.mubr.msk.bf16.mxu1 %vm1590_vm1, %v5205_v21  ;;  %v2440_v58 = vsel %vm769_vm3, %v2425_v2, %v2427_v33  ;;  %v5216_v33 = vld [vmem:[%s7462_s3 + $0x90] ss:$8 sps:$4 sm:$0xff]  }
 0x339   : > { %2720 = vmatprep.subr.bf16.mxu1 %v5275_v38  ;;  %2151 = vmatmul.mubr.bf16.gmra.mrb[40].mxu0 %v5207_v52 }
 0x33a   : > { %2650 = vmatpush1.bf16.msra.mxu0 %v2436_v0  ;;  %5002 = vmatprep.mubr.msk.bf16.mxu0 %vm1590_vm1, %v5208_v13  ;;  %v2497_v8 = vpop.permute.xlu1 %2496  ;;  %v2577_v32 = vld [vmem:[#allocation5 + $0xa0] sm:$0xff] }
 0x33b   : > { %v2495_v44 = vpop.permute.xlu0 %2494  ;;  %v2568_v7 = vld [vmem:[#allocation5 + $0x58] sm:$0xff]  ;;  %2651 = vmatprep.subr.bf16.mxu0 %v2439_v14  ;;  %2538 = vst.msk [vmem:[#allocation5 + $0xd0] sm:$0xff] %vm1050_vm14, %v2497_v8 }
 0x33c   : > { %2721 = vmatpush1.bf16.msra.mxu1 %v2568_v7  ;;  %v2517_v5 = vsel %vm809_vm8, %v2495_v44, %v2497_v8 }
 0x33d   : > { %2722 = vmatprep.subr.bf16.mxu1 %v5275_v38 }
 0x33e   : > { %2652 = vmatpush1.bf16.msra.mxu0 %v2438_v3  ;;  %v2433_v48 = vpop.permute.xlu1 %2432 }
 0x33f   : > { %2220 = vmatmul.mubr.bf16.gmra.mrb[32].mxu1 %v5207_v52  ;;  %v2493_v15 = vpop.permute.xlu0 %2492  ;;  %2653 = vmatprep.subr.bf16.mxu0 %v2441_v30  ;;  %v2442_v54 = vsel %vm769_vm3, %v2431_v61, %v2433_v48 }
 0x340   : > { %2723 = vmatpush1.bf16.msra.mxu1 %v2571_v22  ;;  %5006 = vmatprep.mubr.msk.bf16.mxu1 %vm1590_vm1, %v5208_v13  ;;  %v2516_v17 = vsel %vm809_vm8, %v2493_v15, %v2495_v44 }
 0x341   : > { %2724 = vmatprep.subr.bf16.mxu1 %v5275_v38  ;;  %2161 = vmatmul.mubr.bf16.gmra.mrb[44].mxu0 %v5210_v11 }
 0x342   : > { %2654 = vmatpush1.bf16.msra.mxu0 %v2440_v58  ;;  %5023 = vmatprep.mubr.msk.bf16.mxu0 %vm1590_vm1, %v5213_v46  ;;  %v2501_v27 = vpop.permute.xlu1 %2500  ;;  %v2583_v16 = vld [vmem:[#allocation5 + $0xd0] sm:$0xff] }
 0x343   : > { %v2435_v19 = vpop.permute.xlu0 %2434 }
 0x344   : > { %v2443_v18 = vsel %vm769_vm3, %v2433_v48, %v2435_v19  ;;  %2467 = vst.msk [vmem:[#allocation5 + $0xb8] sm:$0xff] %vm1050_vm14, %v2435_v19  ;;  %2725 = vmatpush1.bf16.msra.mxu1 %v2574_v29 }
 0x345   : > { %2726 = vmatprep.subr.bf16.mxu1 %v5275_v38  ;;  %2655 = vmatprep.subr.bf16.mxu0 %v2443_v18 }
 0x346   : > { %2656 = vmatpush1.bf16.msra.mxu0 %v2442_v54  ;;  %v2499_v41 = vpop.permute.xlu1 %2498 }
 0x347   : > { %2228 = vmatmul.mubr.bf16.gmra.mrb[36].mxu1 %v5210_v11  ;;  %v2503_v20 = vpop.permute.xlu0 %2502  ;;  %2657 = vmatprep.subr.bf16.mxu0 %v2517_v5  ;;  %v2518_v34 = vsel %vm809_vm8, %v2499_v41, %v2501_v27 }
 0x348   : > { %2541 = vst.msk [vmem:[#allocation5 + $0xe8] sm:$0xff] %vm1050_vm14, %v2503_v20  ;;  %2727 = vmatpush1.bf16.msra.mxu1 %v2577_v32  ;;  %5027 = vmatprep.mubr.msk.bf16.mxu1 %vm1590_vm1, %v5213_v46  ;;  %v2519_v31 = vsel %vm809_vm8, %v2501_v27, %v2503_v20 }
 0x349   : > { %2728 = vmatprep.subr.bf16.mxu1 %v5275_v38 }
 0x34a   : > { %2658 = vmatpush1.bf16.msra.mxu0 %v2516_v17  ;;  %v2509_v50 = vpop.permute.xlu1 %2508 }
 0x34b   : > { %v2507_v40 = vpop.permute.xlu0 %2506  ;;  %v2580_v25 = vld [vmem:[#allocation5 + $0xb8] sm:$0xff]  ;;  %2659 = vmatprep.subr.bf16.mxu0 %v2519_v31  ;;  %2544 = vst.msk [vmem:[#allocation5 + $0x100] sm:$0xff] %vm1050_vm14, %v2509_v50 }
 0x34c   : > { %2729 = vmatpush1.bf16.msra.mxu1 %v2580_v25  ;;  %v2521_v62 = vsel %vm809_vm8, %v2507_v40, %v2509_v50 }
 0x34d   : > { %2730 = vmatprep.subr.bf16.mxu1 %v5275_v38 }
 0x34e   : > { %2660 = vmatpush1.bf16.msra.mxu0 %v2518_v34  ;;  %v2513_v12 = vpop.permute.xlu1 %2512 }
 0x34f   : > { %v2505_v10 = vpop.permute.xlu0 %2504  ;;  %2661 = vmatprep.subr.bf16.mxu0 %v2521_v62  ;;  %v2586_v35 = vld [vmem:[#allocation5 + $0xe8] sm:$0xff] }
 0x350   : > { %v2520_v36 = vsel %vm809_vm8, %v2505_v10, %v2507_v40  ;;  %2731 = vmatpush1.bf16.msra.mxu1 %v2583_v16 }
 0x351   : > { %2732 = vmatprep.subr.bf16.mxu1 %v5275_v38 }
 0x352   : > { %2662 = vmatpush1.bf16.msra.mxu0 %v2520_v36  ;;  %v2511_v24 = vpop.permute.xlu1 %2510  ;;  %v2589_v23 = vld [vmem:[#allocation5 + $0x100] sm:$0xff] }
 0x353   : > { %v2515_v42 = vpop.permute.xlu0 %2514  ;;  %v2522_v43 = vsel %vm809_vm8, %v2511_v24, %v2513_v12 }
 0x354   : > { %v2523_v26 = vsel %vm809_vm8, %v2513_v12, %v2515_v42  ;;  %2547 = vst.msk [vmem:[#allocation5 + $0x118] sm:$0xff] %vm1050_vm14, %v2515_v42  ;;  %2733 = vmatpush1.bf16.msra.mxu1 %v2586_v35 }
 0x355   : > { %2734 = vmatprep.subr.bf16.mxu1 %v5275_v38  ;;  %2663 = vmatprep.subr.bf16.mxu0 %v2523_v26 }
 0x356   : > { %2664 = vmatpush1.bf16.msra.mxu0 %v2522_v43 }
 0x358   : > { %2735 = vmatpush1.bf16.msra.mxu1 %v2589_v23 }
 0x359   : > { %2736 = vmatprep.subr.bf16.mxu1 %v5275_v38  ;;  %2674 = vmatmul.mubr.bf16.vlgmr.msra.gmra.mrb[48].mxu0 %v5211_v45 }
 0x35a   : > { %5024 = vmatprep.mubr.msk.bf16.mxu0 %vm1590_vm1, %v5214_v37 }
 0x35b   : > { %v2592_v21 = vld [vmem:[#allocation5 + $0x118] sm:$0xff] }
 0x35c   : > { %2737 = vmatpush1.bf16.msra.mxu1 %v2592_v21 }
 0x35d   : > { %3432 = vmatprep.subr.bf16.mxu1 %v5275_v38 }
 0x35f   : > { %2747 = vmatmul.mubr.bf16.vlgmr.msra.gmra.mrb[40].mxu1 %v5211_v45 }
 0x360   : > { %5028 = vmatprep.mubr.msk.bf16.mxu1 %vm1590_vm1, %v5214_v37 }
 0x361   : > { %2684 = vmatmul.mubr.bf16.gmra.mrb[52].mxu0 %v5216_v33 }
 0x362   : > { %5025 = vmatprep.mubr.msk.bf16.mxu0 %vm1590_vm1, %v5217_v47 }
 0x367   : > { %2755 = vmatmul.mubr.bf16.gmra.mrb[44].mxu1 %v5216_v33 }
 0x368   : > { %5029 = vmatprep.mubr.msk.bf16.mxu1 %vm1590_vm1, %v5217_v47 }
 0x369   : > { %2694 = vmatmul.mubr.bf16.gmra.mrb[56].mxu0 %v5219_v51 }
 0x36a   : > { %5026 = vmatprep.mubr.msk.bf16.mxu0 %vm1590_vm1, %v5220_v39 }
 0x36f   : > { %2763 = vmatmul.mubr.bf16.gmra.mrb[48].mxu1 %v5219_v51 }
 0x370   : > { %5030 = vmatprep.mubr.msk.bf16.mxu1 %vm1590_vm1, %v5220_v39 }
 0x371   : > { %2704 = vmatmul.mubr.bf16.gmra.mrb[60].mxu0 %v5222_v55 }
 0x377   : > { %2771 = vmatmul.mubr.bf16.gmra.mrb[52].mxu1 %v5222_v55 }
 0x3cc   : > { %v1637_v53 = vpop.f32.mrb[16].mxu0 }
 0x3cd   : > { %v1639_v57 = vpop.f32.mrb[17].mxu0 }
 0x3ce   : > { %v1641_v49 = vpop.f32.mrb[18].mxu0 }
 0x3cf   : > { %v1643_v60 = vpop.f32.mrb[19].mxu0 }
 0x3d2   : > { %v1710_v52 = vpop.f32.mrb[8].mxu1 }
 0x3d3   : > { %1743 = vst.msk [vmem:[#allocation7 + $0x10] sm:$0xff] %vm1050_vm14, %v1710_v52  ;;  %v1712_v63 = vpop.f32.mrb[9].mxu1 }
 0x3d4   : > { %v1713_v13 = vpop.f32.mrb[10].mxu1  ;;  %v1647_v2 = vpop.f32.mrb[20].mxu0 }
 0x3d5   : > { %1746 = vst.msk [vmem:[#allocation7 + $0x28] sm:$0xff] %vm1050_vm14, %v1713_v13  ;;  %v1715_v56 = vpop.f32.mrb[11].mxu1  ;;  %v1649_v61 = vpop.f32.mrb[21].mxu0 }
 0x3d6   : > { %v1651_v0 = vpop.f32.mrb[22].mxu0 }
 0x3d7   : > { %v1653_v14 = vpop.f32.mrb[23].mxu0 }
 0x3da   : > { %v1718_v44 = vpop.f32.mrb[12].mxu1  ;;  %v2238_v36 = vld [vmem:[#allocation7 + $0x10] sm:$0xff] }
 0x3db   : > { %1749 = vst.msk [vmem:[#allocation7 + $0x40] sm:$0xff] %vm1050_vm14, %v1718_v44  ;;  %v1720_v7 = vpop.f32.mrb[13].mxu1 }
 0x3dc   : > { %v1721_v8 = vpop.f32.mrb[14].mxu1  ;;  %v1657_v3 = vpop.f32.mrb[24].mxu0  ;;  %v2241_v26 = vld [vmem:[#allocation7 + $0x28] sm:$0xff] }
 0x3dd   : > { %1752 = vst.msk [vmem:[#allocation7 + $0x58] sm:$0xff] %vm1050_vm14, %v1721_v8  ;;  %v1723_v11 = vpop.f32.mrb[15].mxu1  ;;  %v1659_v30 = vpop.f32.mrb[25].mxu0 }
 0x3de   : > { %v1661_v46 = vpop.f32.mrb[26].mxu0 }
 0x3df   : > { %v1663_v15 = vpop.f32.mrb[27].mxu0 }
 0x3e2   : > { %v1726_v22 = vpop.f32.mrb[16].mxu1 }
 0x3e3   : > { %1755 = vst.msk [vmem:[#allocation7 + $0x70] sm:$0xff] %vm1050_vm14, %v1726_v22  ;;  %v1728_v48 = vpop.f32.mrb[17].mxu1 }
 0x3e4   : > { %v1729_v58 = vpop.f32.mrb[18].mxu1  ;;  %v6494_v19 = vpop.f32.mrb[28].mxu0  ;;  %v2247_v52 = vld [vmem:[#allocation7 + $0x58] sm:$0xff] }
 0x3e5   : > { %1758 = vst.msk [vmem:[#allocation7 + $0x88] sm:$0xff] %vm1050_vm14, %v1729_v58  ;;  %v1731_v29 = vpop.f32.mrb[19].mxu1  ;;  %v6497_v18 = vpop.f32.mrb[29].mxu0 }
 0x3e6   : > { %v6499_v27 = vpop.f32.mrb[30].mxu0 }
 0x3e7   : > { %v6501_v54 = vpop.f32.mrb[31].mxu0 }
 0x3ea   : > { %v1734_v5 = vpop.f32.mrb[20].mxu1  ;;  %v2250_v22 = vld [vmem:[#allocation7 + $0x70] sm:$0xff] }
 0x3eb   : > { %1761 = vst.msk [vmem:[#allocation7 + $0xa0] sm:$0xff] %vm1050_vm14, %v1734_v5  ;;  %v1736_v20 = vpop.f32.mrb[21].mxu1 }
 0x3ec   : > { %v1737_v32 = vpop.f32.mrb[22].mxu1  ;;  %v2253_v5 = vld [vmem:[#allocation7 + $0x88] sm:$0xff] }
 0x3ed   : > { %1764 = vst.msk [vmem:[#allocation7 + $0xb8] sm:$0xff] %vm1050_vm14, %v1737_v32  ;;  %v1739_v41 = vpop.f32.mrb[23].mxu1 }
 0x3fc   : > { %v2132_v17 = vpop.f32.mrb[32].mxu0 }
 0x3fd   : > { %v6505_v31 = vadd.f32 %v2132_v17, %v1637_v53  ;;  %v2134_v40 = vpop.f32.mrb[33].mxu0  ;;  %v2244_v53 = vld [vmem:[#allocation7 + $0x40] sm:$0xff] }
 0x3fe   : > { %v6507_v25 = vadd.f32 %v2134_v40, %v1639_v57  ;;  %v2136_v50 = vpop.f32.mrb[34].mxu0 }
 0x3ff   : > { %v6509_v34 = vadd.f32 %v2136_v50, %v1641_v49  ;;  %v2138_v62 = vpop.f32.mrb[35].mxu0 }
 0x400   : > { %v6511_v10 = vadd.f32 %v2138_v62, %v1643_v60 }
 0x402   : > { %v2205_v16 = vpop.f32.mrb[24].mxu1 }
 0x403   : > { %v2262_v12 = vadd.f32 %v2238_v36, %v2205_v16  ;;  %v2207_v42 = vpop.f32.mrb[25].mxu1  ;;  %v2256_v16 = vld [vmem:[#allocation7 + $0xa0] sm:$0xff] }
 0x404   : > { %v2208_v35 = vpop.f32.mrb[26].mxu1  ;;  %v2142_v24 = vpop.f32.mrb[36].mxu0  ;;  %v2259_v42 = vld [vmem:[#allocation7 + $0xb8] sm:$0xff] }
 0x405   : > { %2286 = vst.msk [vmem:[#allocation7 + $0x10] sm:$0xff] %vm1050_vm14, %v2262_v12  ;;  %v2265_v43 = vadd.f32 %v2241_v26, %v2208_v35  ;;  %v2210_v45 = vpop.f32.mrb[27].mxu1  ;;  %v6514_v37 = vadd.f32 %v2142_v24, %v1647_v2  ;;  %v2144_v23 = vpop.f32.mrb[37].mxu0 }
 0x406   : > { %v6516_v21 = vadd.f32 %v2144_v23, %v1649_v61  ;;  %v2146_v33 = vpop.f32.mrb[38].mxu0 }
 0x407   : > { %2289 = vst.msk [vmem:[#allocation7 + $0x28] sm:$0xff] %vm1050_vm14, %v2265_v43  ;;  %v6519_v47 = vadd.f32 %v2146_v33, %v1651_v0  ;;  %v2148_v51 = vpop.f32.mrb[39].mxu0  ;;  %v6550_v43 = vpop.permute.xlu0 %2885 }
 0x408   : > { %v6521_v39 = vadd.f32 %v2148_v51, %v1653_v14 }
 0x40a   : > { %v2213_v55 = vpop.f32.mrb[28].mxu1 }
 0x40b   : > { %v2268_v57 = vadd.f32 %v2244_v53, %v2213_v55  ;;  %v2215_v49 = vpop.f32.mrb[29].mxu1  ;;  %v6555_v55 = vpop.permute.xlu1 %2890 }
 0x40c   : > { %v2216_v60 = vpop.f32.mrb[30].mxu1  ;;  %v2152_v63 = vpop.f32.mrb[40].mxu0 }
 0x40d   : > { %2292 = vst.msk [vmem:[#allocation7 + $0x40] sm:$0xff] %vm1050_vm14, %v2268_v57  ;;  %v2271_v13 = vadd.f32 %v2247_v52, %v2216_v60  ;;  %v2218_v2 = vpop.f32.mrb[31].mxu1  ;;  %v6524_v56 = vadd.f32 %v2152_v63, %v1657_v3  ;;  %v2154_v61 = vpop.f32.mrb[41].mxu0  ;;  %v2781_v52 = vld [vmem:[#allocation7 + $0x10] sm:$0xff] }
 0x40e   : > { %v6526_v44 = vadd.f32 %v2154_v61, %v1659_v30  ;;  %v2156_v0 = vpop.f32.mrb[42].mxu0 }
 0x40f   : > { %2295 = vst.msk [vmem:[#allocation7 + $0x58] sm:$0xff] %vm1050_vm14, %v2271_v13  ;;  %v6529_v14 = vadd.f32 %v2156_v0, %v1661_v46  ;;  %v2158_v7 = vpop.f32.mrb[43].mxu0  ;;  %v2784_v0 = vld [vmem:[#allocation7 + $0x28] sm:$0xff] }
 0x410   : > { %v6531_v8 = vadd.f32 %v2158_v7, %v1663_v15 }
 0x412   : > { %v2221_v11 = vpop.f32.mrb[32].mxu1 }
 0x413   : > { %v2274_v48 = vadd.f32 %v2250_v22, %v2221_v11  ;;  %v2223_v58 = vpop.f32.mrb[33].mxu1 }
 0x414   : > { %v2224_v29 = vpop.f32.mrb[34].mxu1  ;;  %v2162_v20 = vpop.f32.mrb[44].mxu0 }
 0x415   : > { %2298 = vst.msk [vmem:[#allocation7 + $0x70] sm:$0xff] %vm1050_vm14, %v2274_v48  ;;  %v2277_v3 = vadd.f32 %v2253_v5, %v2224_v29  ;;  %v2226_v30 = vpop.f32.mrb[35].mxu1  ;;  %v6535_v32 = vadd.f32 %v2162_v20, %v6494_v19  ;;  %v2164_v41 = vpop.f32.mrb[45].mxu0 }
 0x416   : > { %v6538_v46 = vadd.f32 %v2164_v41, %v6497_v18  ;;  %v2166_v15 = vpop.f32.mrb[46].mxu0  ;;  %v6569_v20 = vpop.permute.xlu0 %2895 }
 0x417   : > { %2301 = vst.msk [vmem:[#allocation7 + $0x88] sm:$0xff] %vm1050_vm14, %v2277_v3  ;;  %v6542_v17 = vadd.f32 %v2166_v15, %v6499_v27  ;;  %v2168_v40 = vpop.f32.mrb[47].mxu0 }
 0x418   : > { %v6545_v50 = vadd.f32 %v2168_v40, %v6501_v54 }
 0x41a   : > { %v2229_v62 = vpop.f32.mrb[36].mxu1 }
 0x41b   : > { %v2280_v36 = vadd.f32 %v2256_v16, %v2229_v62  ;;  %v2231_v12 = vpop.f32.mrb[37].mxu1 }
 0x41c   : > { %v2232_v19 = vpop.f32.mrb[38].mxu1 }
 0x41d   : > { %2304 = vst.msk [vmem:[#allocation7 + $0xa0] sm:$0xff] %vm1050_vm14, %v2280_v36  ;;  %v2283_v18 = vadd.f32 %v2259_v42, %v2232_v19  ;;  %v2234_v35 = vpop.f32.mrb[39].mxu1  ;;  %v6579_v36 = vpop.permute.xlu1 %2900 }
 0x41f   : > { %2307 = vst.msk [vmem:[#allocation7 + $0xb8] sm:$0xff] %vm1050_vm14, %v2283_v18 }
 0x42c   : > { %v2675_v26 = vpop.f32.mrb[48].mxu0 }
 0x42d   : > { %v2803_v27 = vadd.f32 %v2675_v26, %v6505_v31  ;;  %v2677_v24 = vpop.f32.mrb[49].mxu0  ;;  %v2787_v26 = vld [vmem:[#allocation7 + $0x40] sm:$0xff] }
 0x42e   : > { %v2804_v54 = vadd.f32 %v2677_v24, %v6507_v25  ;;  %v2679_v45 = vpop.f32.mrb[50].mxu0 }
 0x42f   : > { %v2806_v23 = vadd.f32 %v2679_v45, %v6509_v34  ;;  %v2681_v33 = vpop.f32.mrb[51].mxu0  ;;  %v2923_v51 = vadd.f32 %v6550_v43, %v2803_v27 }
 0x430   : > { %v2807_v53 = vadd.f32 %v2681_v33, %v6511_v10  ;;  %v2924_v57 = vadd.f32 %v6550_v43, %v2804_v54  ;;  %v2790_v33 = vld [vmem:[#allocation7 + $0x58] sm:$0xff] }
 0x431   : > { %v2926_v49 = vadd.f32 %v6555_v55, %v2806_v23  ;;  %v2947_v31 = vmax.f32 %v2923_v51, 0.0 }
 0x432   : > { %v2748_v60 = vpop.f32.mrb[40].mxu1  ;;  %v2927_v63 = vadd.f32 %v6555_v55, %v2807_v53  ;;  %v2948_v25 = vmax.f32 %v2924_v57, 0.0 }
 0x433   : > { %v2805_v13 = vadd.f32 %v2781_v52, %v2748_v60  ;;  %v2750_v2 = vpop.f32.mrb[41].mxu1  ;;  %v2950_v34 = vmax.f32 %v2926_v49, 0.0  ;;  %v6564_v29 = vmul.f32 %v2947_v31, %v5704_v28 }
 0x434   : > { %v2751_v61 = vpop.f32.mrb[42].mxu1  ;;  %v2685_v7 = vpop.f32.mrb[52].mxu0  ;;  %v2951_v11 = vmax.f32 %v2927_v63, 0.0  ;;  %v2980_v41 = vmul.f32 %v2948_v25, %v5708_v9 }
 0x435   : > { %2829 = vst.msk [vmem:[#allocation7 + $0x10] sm:$0xff] %vm1050_vm14, %v2805_v13  ;;  %v2808_v10 = vadd.f32 %v2784_v0, %v2751_v61  ;;  %v2753_v22 = vpop.f32.mrb[43].mxu1  ;;  %v2809_v48 = vadd.f32 %v2685_v7, %v6514_v37  ;;  %v2687_v58 = vpop.f32.mrb[53].mxu0  ;;  %v6567_v5 = vmul.f32 %v2950_v34, %v5704_v28 }
 0x436   : > { %v2810_v3 = vadd.f32 %v2687_v58, %v6516_v21  ;;  %v2689_v30 = vpop.f32.mrb[54].mxu0  ;;  %v2983_v15 = vmul.f32 %v2951_v11, %v5708_v9  ;;  %v6602_v7 = vpop.permute.xlu0 %2905 }
 0x437   : > { %2832 = vst.msk [vmem:[#allocation7 + $0x28] sm:$0xff] %vm1050_vm14, %v2808_v10  ;;  %v2812_v37 = vadd.f32 %v2689_v30, %v6519_v47  ;;  %v2691_v40 = vpop.f32.mrb[55].mxu0  ;;  %v3003_v62 = vpack.c.bf16 %v6567_v5, %v6564_v29  ;;  %v2929_v16 = vadd.f32 %v6569_v20, %v2809_v48  ;;  %v6609_v22 = vpop.permute.xlu1 %2910 }
 0x438   : > { %v2813_v12 = vadd.f32 %v2691_v40, %v6521_v39  ;;  %v3004_v21 = vpack.c.bf16 %v2983_v15, %v2980_v41  ;;  %v2930_v19 = vadd.f32 %v6569_v20, %v2810_v3 }
 0x439   : > { %v2932_v42 = vadd.f32 %v6579_v36, %v2812_v37  ;;  %v2953_v18 = vmax.f32 %v2929_v16, 0.0 }
 0x43a   : > { %v2756_v35 = vpop.f32.mrb[44].mxu1  ;;  %3029 = vrot.lane.b32.xlu1 %v3004_v21, %s5277_s12  ;;  %v2933_v47 = vadd.f32 %v6579_v36, %v2813_v12  ;;  %v2954_v27 = vmax.f32 %v2930_v19, 0.0 }
 0x43b   : > { %v2811_v24 = vadd.f32 %v2787_v26, %v2756_v35  ;;  %v2758_v54 = vpop.f32.mrb[45].mxu1  ;;  %v2956_v45 = vmax.f32 %v2932_v42, 0.0  ;;  %v6587_v57 = vmul.f32 %v2953_v18, %v5704_v28  ;;  %v2796_v35 = vld [vmem:[#allocation7 + $0x88] sm:$0xff] }
 0x43c   : > { %v2759_v23 = vpop.f32.mrb[46].mxu1  ;;  %v2695_v51 = vpop.f32.mrb[56].mxu0  ;;  %v2853_v39 = vld [vmem:[#allocation7 + $0x10] sm:$0xff]  ;;  %v2957_v53 = vmax.f32 %v2933_v47, 0.0  ;;  %v6597_v61 = vmul.f32 %v2954_v27, %v5708_v9 }
 0x43d   : > { %2835 = vst.msk [vmem:[#allocation7 + $0x40] sm:$0xff] %vm1050_vm14, %v2811_v24  ;;  %v2814_v49 = vadd.f32 %v2790_v33, %v2759_v23  ;;  %v2761_v31 = vpop.f32.mrb[47].mxu1  ;;  %v2815_v60 = vadd.f32 %v2695_v51, %v6524_v56  ;;  %v2697_v52 = vpop.f32.mrb[57].mxu0  ;;  %v2925_v63 = vadd.f32 %v6550_v43, %v2853_v39  ;;  %v6593_v25 = vmul.f32 %v2956_v45, %v5704_v28 }
 0x43e   : > { %v2816_v13 = vadd.f32 %v2697_v52, %v6526_v44  ;;  %v2699_v2 = vpop.f32.mrb[58].mxu0  ;;  %v2856_v34 = vld [vmem:[#allocation7 + $0x28] sm:$0xff]  ;;  %v6600_v0 = vmul.f32 %v2957_v53, %v5708_v9  ;;  %v2916_v53 = vpop.permute.xlu0 %2915 }
 0x43f   : > { %2838 = vst.msk [vmem:[#allocation7 + $0x58] sm:$0xff] %vm1050_vm14, %v2814_v49  ;;  %v2818_v56 = vadd.f32 %v2699_v2, %v6529_v14  ;;  %v2701_v43 = vpop.f32.mrb[59].mxu0  ;;  %v2928_v11 = vadd.f32 %v6555_v55, %v2856_v34  ;;  %v2949_v10 = vmax.f32 %v2925_v63, 0.0  ;;  %v3006_v44 = vpack.c.bf16 %v6593_v25, %v6587_v57  ;;  %v2793_v55 = vld [vmem:[#allocation7 + $0x70] sm:$0xff] }
 0x440   : > { %v2819_v48 = vadd.f32 %v2701_v43, %v6531_v8  ;;  %v3007_v58 = vpack.c.bf16 %v6600_v0, %v6597_v61  ;;  %v2936_v3 = vadd.f32 %v6602_v7, %v2816_v13  ;;  %v2935_v30 = vadd.f32 %v6602_v7, %v2815_v60 }
 0x441   : > { %v2952_v41 = vmax.f32 %v2928_v11, 0.0  ;;  %v2938_v14 = vadd.f32 %v6609_v22, %v2818_v56  ;;  %v2981_v8 = vmul.f32 %v2949_v10, %v5756_v6 }
 0x442   : > { %v2764_v15 = vpop.f32.mrb[48].mxu1  ;;  %v2939_v37 = vadd.f32 %v6609_v22, %v2819_v48  ;;  %v2960_v40 = vmax.f32 %v2936_v3, 0.0  ;;  %v2959_v16 = vmax.f32 %v2935_v30, 0.0 }
 0x443   : > { %v2817_v12 = vadd.f32 %v2793_v55, %v2764_v15  ;;  %v2766_v21 = vpop.f32.mrb[49].mxu1  ;;  %v2984_v19 = vmul.f32 %v2952_v41, %v5756_v6  ;;  %v2962_v42 = vmax.f32 %v2938_v14, 0.0  ;;  %v2799_v15 = vld [vmem:[#allocation7 + $0xa0] sm:$0xff] }
 0x444   : > { %v2767_v18 = vpop.f32.mrb[50].mxu1  ;;  %v2705_v26 = vpop.f32.mrb[60].mxu0  ;;  %v2859_v47 = vld [vmem:[#allocation7 + $0x40] sm:$0xff]  ;;  %v2963_v27 = vmax.f32 %v2939_v37, 0.0  ;;  %v6621_v24 = vmul.f32 %v2960_v40, %v5708_v9  ;;  %v2991_v63 = vmul.f32 %v2959_v16, %v5704_v28  ;;  %v2802_v21 = vld [vmem:[#allocation7 + $0xb8] sm:$0xff] }
 0x445   : > { %2841 = vst.msk [vmem:[#allocation7 + $0x70] sm:$0xff] %vm1050_vm14, %v2817_v12  ;;  %v2820_v54 = vadd.f32 %v2796_v35, %v2767_v18  ;;  %v3005_v45 = vpack.c.bf16 %v2984_v19, %v2981_v8  ;;  %v2769_v23 = vpop.f32.mrb[51].mxu1  ;;  %v2821_v33 = vadd.f32 %v2705_v26, %v6535_v32  ;;  %v2707_v51 = vpop.f32.mrb[61].mxu0  ;;  %v2931_v39 = vadd.f32 %v6569_v20, %v2859_v47 }
 0x446   : > { %v2822_v49 = vadd.f32 %v2707_v51, %v6538_v46  ;;  %v2709_v31 = vpop.f32.mrb[62].mxu0  ;;  %v2862_v60 = vld [vmem:[#allocation7 + $0x58] sm:$0xff]  ;;  %v2995_v52 = vmul.f32 %v2963_v27, %v5708_v9  ;;  %v2994_v13 = vmul.f32 %v2962_v42, %v5704_v28  ;;  %v2921_v46 = vpop.permute.xlu1 %2920 }
 0x447   : > { %2844 = vst.msk [vmem:[#allocation7 + $0x88] sm:$0xff] %vm1050_vm14, %v2820_v54  ;;  %3031 = vrot.lane.b32.xlu0 %v3005_v45, %s5277_s12  ;;  %v2824_v32 = vadd.f32 %v2709_v31, %v6542_v17  ;;  %v2711_v2 = vpop.f32.mrb[63].mxu0  ;;  %v2934_v20 = vadd.f32 %v6579_v36, %v2862_v60  ;;  %v2955_v34 = vmax.f32 %v2931_v39, 0.0  ;;  %v2941_v56 = vadd.f32 %v2916_v53, %v2821_v33 }
 0x448   : > { %v2825_v43 = vadd.f32 %v2711_v2, %v6545_v50  ;;  %v3010_v11 = vpack.c.bf16 %v2995_v52, %v6621_v24  ;;  %v3009_v10 = vpack.c.bf16 %v2994_v13, %v2991_v63  ;;  %v2942_v48 = vadd.f32 %v2916_v53, %v2822_v49 }
 0x449   : > { %v2958_v3 = vmax.f32 %v2934_v20, 0.0  ;;  %v2944_v30 = vadd.f32 %v2921_v46, %v2824_v32  ;;  %v2965_v41 = vmax.f32 %v2941_v56, 0.0  ;;  %v2987_v50 = vmul.f32 %v2955_v34, %v5756_v6 }
 0x44a   : > { %v2772_v14 = vpop.f32.mrb[52].mxu1  ;;  %v2945_v55 = vadd.f32 %v2921_v46, %v2825_v43  ;;  %v2966_v37 = vmax.f32 %v2942_v48, 0.0 }
 0x44b   : > { %v2823_v17 = vadd.f32 %v2799_v15, %v2772_v14  ;;  %v2774_v40 = vpop.f32.mrb[53].mxu1  ;;  %3027 = vrot.lane.b32.xlu0 %v3003_v62, %s5277_s12  ;;  %v2990_v36 = vmul.f32 %v2958_v3, %v5756_v6  ;;  %v2968_v16 = vmax.f32 %v2944_v30, 0.0  ;;  %v2997_v42 = vmul.f32 %v2965_v41, %v5704_v28 }
 0x44c   : > { %v2775_v12 = vpop.f32.mrb[54].mxu1  ;;  %v2865_v8 = vld [vmem:[#allocation7 + $0x70] sm:$0xff]  ;;  %v2969_v19 = vmax.f32 %v2945_v55, 0.0  ;;  %v2998_v47 = vmul.f32 %v2966_v37, %v5708_v9 }
 0x44d   : > { %2847 = vst.msk [vmem:[#allocation7 + $0xa0] sm:$0xff] %vm1050_vm14, %v2823_v17  ;;  %v2826_v18 = vadd.f32 %v2802_v21, %v2775_v12  ;;  %v3008_v35 = vpack.c.bf16 %v2990_v36, %v2987_v50  ;;  %v2937_v26 = vadd.f32 %v6602_v7, %v2865_v8  ;;  %v3000_v29 = vmul.f32 %v2968_v16, %v5704_v28  ;;  %v2777_v5 = vpop.f32.mrb[55].mxu1  ;;  %v5225_v8 = vld [vmem:[%s7464_s5 + $0x4] ss:$8 sps:$4 sm:$0xff]  }
 0x44e   : > { %v2868_v62 = vld [vmem:[#allocation7 + $0x88] sm:$0xff]  ;;  %v3001_v27 = vmul.f32 %v2969_v19, %v5708_v9  ;;  %5043 = vmatprep.mubr.msk.bf16.mxu1 %vm1590_vm1, %v5225_v8  ;;  %5039 = vmatprep.mubr.msk.bf16.mxu0 %vm1590_vm1, %v5225_v8 }
 0x44f   : > { %2850 = vst.msk [vmem:[#allocation7 + $0xb8] sm:$0xff] %vm1050_vm14, %v2826_v18  ;;  %3037 = vrot.lane.b32.xlu1 %v3008_v35, %s5277_s12  ;;  %3035 = vrot.lane.b32.xlu0 %v3007_v58, %s5277_s12  ;;  %v2940_v24 = vadd.f32 %v6609_v22, %v2868_v62  ;;  %v2961_v7 = vmax.f32 %v2937_v26, 0.0  ;;  %v3012_v54 = vpack.c.bf16 %v3000_v29, %v2997_v42 }
 0x450   : > { %v3013_v28 = vpack.c.bf16 %v3001_v27, %v2998_v47 }
 0x451   : > { %v2964_v45 = vmax.f32 %v2940_v24, 0.0  ;;  %v2993_v9 = vmul.f32 %v2961_v7, %v5756_v6 }
 0x453   : > { %3033 = vrot.lane.b32.xlu1 %v3006_v44, %s5277_s12  ;;  %v2996_v23 = vmul.f32 %v2964_v45, %v5756_v6 }
 0x454   : > { %v2871_v33 = vld [vmem:[#allocation7 + $0xa0] sm:$0xff] }
 0x455   : > { %v3011_v51 = vpack.c.bf16 %v2996_v23, %v2993_v9  ;;  %v2943_v39 = vadd.f32 %v2916_v53, %v2871_v33 }
 0x456   : > { %v2874_v61 = vld [vmem:[#allocation7 + $0xb8] sm:$0xff] }
 0x457   : > { %3043 = vrot.lane.b32.xlu0 %v3011_v51, %s5277_s12  ;;  %3041 = vrot.lane.b32.xlu1 %v3010_v11, %s5277_s12  ;;  %v2946_v0 = vadd.f32 %v2921_v46, %v2874_v61  ;;  %v2967_v22 = vmax.f32 %v2943_v39, 0.0 }
 0x459   : > { %v2970_v58 = vmax.f32 %v2946_v0, 0.0  ;;  %v2999_v57 = vmul.f32 %v2967_v22, %v5756_v6 }
 0x45b   : > { %3039 = vrot.lane.b32.xlu0 %v3009_v10, %s5277_s12  ;;  %v3002_v25 = vmul.f32 %v2970_v58, %v5756_v6 }
 0x45d   : > { %v3014_v44 = vpack.c.bf16 %v3002_v25, %v2999_v57 }
 0x45f   : > { %3049 = vrot.lane.b32.xlu1 %v3014_v44, %s5277_s12  ;;  %3047 = vrot.lane.b32.xlu0 %v3013_v28, %s5277_s12 }
 0x463   : > { %3045 = vrot.lane.b32.xlu1 %v3012_v54, %s5277_s12 }
 0x4ac   : > { %v3030_v49 = vpop.permute.xlu1 %3029 }
 0x4b9   : > { %v3032_v53 = vpop.permute.xlu0 %3031 }
 0x4ba   : > { %v3052_v31 = vsel %vm1193_vm6, %v3030_v49, %v3032_v53 }
 0x4bb   : > { %3073 = vst.msk [vmem:[#allocation3 + $0x10] sm:$0xff] %vm1315_vm9, %v3052_v31 }
 0x4bd   : > { %v3028_v60 = vpop.permute.xlu0 %3027 }
 0x4be   : > { %v6672_v52 = vsel %vm1193_vm6, %v3028_v60, %v3030_v49  ;;  %3071 = vst.msk [vmem:[#allocation3] sm:$0xff] %vm1312_vm5, %v3028_v60 }
 0x4bf   : > { %3359 = vmatprep.subr.bf16.mxu0 %v6672_v52 }
 0x4c1   : > { %v3038_v6 = vpop.permute.xlu1 %3037  ;;  %v3036_v63 = vpop.permute.xlu0 %3035 }
 0x4c2   : > { %v6676_v13 = vld [vmem:[#allocation3 + $0x10] sm:$0xff]  ;;  %v3054_v32 = vsel %vm1193_vm6, %v3036_v63, %v3038_v6 }
 0x4c3   : > { %3097 = vst.msk [vmem:[#allocation5 + $0x10] sm:$0xff] %vm1050_vm14, %v6676_v13  ;;  %3135 = vrot.lane.b32.xlu1 %v6676_v13, %s5270_s23 }
 0x4c4   : > { %3076 = vst.msk [vmem:[#allocation3 + $0x28] sm:$0xff] %vm1315_vm9, %v3054_v32 }
 0x4c5   : > { %v6684_v2 = vld [vmem:[#allocation3] sm:$0xff]  ;;  %v3034_v20 = vpop.permute.xlu1 %3033 }
 0x4c6   : > { %v6687_v34 = vsel %vm1193_vm6, %v3034_v20, %v3036_v63  ;;  %3074 = vst.msk [vmem:[#allocation3 + $0x18] sm:$0xff] %vm1312_vm5, %v3034_v20  ;;  %3131 = vrot.lane.b32.xlu0 %v6684_v2, %s5270_s23  ;;  %3360 = vmatpush1.bf16.msra.mxu0 %v6684_v2 }
 0x4c7   : > { %3215 = vrot.lane.b32.xlu1 %v6676_v13, %s5269_s22  ;;  %3361 = vmatprep.subr.bf16.mxu0 %v6687_v34 }
 0x4c9   : > { %v3044_v56 = vpop.permute.xlu0 %3043  ;;  %v3042_v46 = vpop.permute.xlu1 %3041 }
 0x4ca   : > { %3211 = vrot.lane.b32.xlu0 %v6684_v2, %s5269_s22  ;;  %v3056_v11 = vsel %vm1193_vm6, %v3042_v46, %v3044_v56  ;;  %v3277_v10 = vld [vmem:[#allocation5 + $0x10] sm:$0xff] }
 0x4cb   : > { %v6696_v43 = vld [vmem:[#allocation3 + $0x28] sm:$0xff]  ;;  %3079 = vst.msk [vmem:[#allocation3 + $0x40] sm:$0xff] %vm1315_vm9, %v3056_v11  ;;  %3549 = vrot.lane.b32.xlu1 %v6676_v13, %s5271_s24  ;;  %3433 = vmatpush1.bf16.msra.mxu1 %v3277_v10 }
 0x4cc   : > { %3100 = vst.msk [vmem:[#allocation5 + $0x28] sm:$0xff] %vm1050_vm14, %v6696_v43  ;;  %3434 = vmatprep.subr.bf16.mxu1 %v5275_v38 }
 0x4cd   : > { %v6707_v48 = vld [vmem:[#allocation3 + $0x18] sm:$0xff]  ;;  %v3040_v3 = vpop.permute.xlu0 %3039 }
 0x4ce   : > { %v6710_v30 = vsel %vm1193_vm6, %v3040_v3, %v3042_v46  ;;  %3077 = vst.msk [vmem:[#allocation3 + $0x30] sm:$0xff] %vm1312_vm5, %v3040_v3  ;;  %3545 = vrot.lane.b32.xlu0 %v6684_v2, %s5271_s24  ;;  %3362 = vmatpush1.bf16.msra.mxu0 %v6707_v48 }
 0x4cf   : > { %3629 = vrot.lane.b32.xlu1 %v6676_v13, %s5267_s20  ;;  %3363 = vmatprep.subr.bf16.mxu0 %v6710_v30 }
 0x4d1   : > { %v3050_v41 = vpop.permute.xlu1 %3049  ;;  %v3048_v14 = vpop.permute.xlu0 %3047 }
 0x4d2   : > { %v6719_v15 = vld [vmem:[#allocation3 + $0x40] sm:$0xff]  ;;  %3625 = vrot.lane.b32.xlu0 %v6684_v2, %s5267_s20  ;;  %v3058_v55 = vsel %vm1193_vm6, %v3048_v14, %v3050_v41 }
 0x4d3   : > { %v3280_v37 = vld [vmem:[#allocation5 + $0x28] sm:$0xff]  ;;  %3103 = vst.msk [vmem:[#allocation5 + $0x40] sm:$0xff] %vm1050_vm14, %v6719_v15  ;;  %3137 = vrot.lane.b32.xlu1 %v6707_v48, %s5270_s23 }
 0x4d4   : > { %3082 = vst.msk [vmem:[#allocation3 + $0x58] sm:$0xff] %vm1315_vm9, %v3058_v55  ;;  %3435 = vmatpush1.bf16.msra.mxu1 %v3280_v37 }
 0x4d5   : > { %3436 = vmatprep.subr.bf16.mxu1 %v5275_v38  ;;  %v6730_v17 = vld [vmem:[#allocation3 + $0x30] sm:$0xff]  ;;  %v3046_v40 = vpop.permute.xlu1 %3045 }
 0x4d6   : > { %v6733_v50 = vsel %vm1193_vm6, %v3046_v40, %v3048_v14  ;;  %3080 = vst.msk [vmem:[#allocation3 + $0x48] sm:$0xff] %vm1312_vm5, %v3046_v40  ;;  %3133 = vrot.lane.b32.xlu0 %v6672_v52, %s5270_s23  ;;  %3364 = vmatpush1.bf16.msra.mxu0 %v6730_v17  ;;  %vm7572_vm6 = vcmask 891904  }
 0x4d7   : > { %3217 = vrot.lane.b32.xlu1 %v6707_v48, %s5269_s22  ;;  %3365 = vmatprep.subr.bf16.mxu0 %v6733_v50  ;;  %vm7573_vm9 = vmmov %vm7572_vm6 }
 0x4d8   : > { %vm7574_vm5 = vmmov %vm7572_vm6 }
 0x4d9   : > { %vm7578_vm10 = vmmov %vm7574_vm5 }
 0x4da   : > { %3213 = vrot.lane.b32.xlu0 %v6672_v52, %s5269_s22  ;;  %v3283_v16 = vld [vmem:[#allocation5 + $0x40] sm:$0xff]  ;;  %vm7581_vm12 = vmmov %vm7574_vm5 }
 0x4db   : > { %v6742_v36 = vld [vmem:[#allocation3 + $0x58] sm:$0xff]  ;;  %3551 = vrot.lane.b32.xlu1 %v6707_v48, %s5271_s24  ;;  %3437 = vmatpush1.bf16.msra.mxu1 %v3283_v16  ;;  %vm7582_vm13 = vmmov %vm7574_vm5 }
 0x4dc   : > { %3106 = vst.msk [vmem:[#allocation5 + $0x58] sm:$0xff] %vm1050_vm14, %v6742_v36  ;;  %3438 = vmatprep.subr.bf16.mxu1 %v5275_v38 }
 0x4dd   : > { %v6751_v12 = vld [vmem:[#allocation3 + $0x48] sm:$0xff] }
 0x4de   : > { %3547 = vrot.lane.b32.xlu0 %v6672_v52, %s5271_s24  ;;  %3366 = vmatpush1.bf16.msra.mxu0 %v6751_v12 }
 0x4df   : > { %3631 = vrot.lane.b32.xlu1 %v6707_v48, %s5267_s20 }
 0x4e2   : > { %3627 = vrot.lane.b32.xlu0 %v6672_v52, %s5267_s20 }
 0x4e3   : > { %v3286_v21 = vld [vmem:[#allocation5 + $0x58] sm:$0xff]  ;;  %3139 = vrot.lane.b32.xlu1 %v6687_v34, %s5270_s23 }
 0x4e4   : > { %3439 = vmatpush1.bf16.msra.mxu1 %v3286_v21 }
 0x4e5   : > { %3440 = vmatprep.subr.bf16.mxu1 %v5275_v38 }
 0x4e6   : > { %3141 = vrot.lane.b32.xlu0 %v6696_v43, %s5270_s23 }
 0x4e7   : > { %3219 = vrot.lane.b32.xlu1 %v6687_v34, %s5269_s22 }
 0x4ea   : > { %3221 = vrot.lane.b32.xlu0 %v6696_v43, %s5269_s22 }
 0x4eb   : > { %3553 = vrot.lane.b32.xlu1 %v6687_v34, %s5271_s24 }
 0x4ee   : > { %3555 = vrot.lane.b32.xlu0 %v6696_v43, %s5271_s24 }
 0x4ef   : > { %3633 = vrot.lane.b32.xlu1 %v6687_v34, %s5267_s20 }
 0x4f2   : > { %3635 = vrot.lane.b32.xlu0 %v6696_v43, %s5267_s20 }
 0x4f3   : > { %3147 = vrot.lane.b32.xlu1 %v6719_v15, %s5270_s23 }
 0x4f6   : > { %3143 = vrot.lane.b32.xlu0 %v6730_v17, %s5270_s23 }
 0x4f7   : > { %3227 = vrot.lane.b32.xlu1 %v6719_v15, %s5269_s22 }
 0x4fa   : > { %3223 = vrot.lane.b32.xlu0 %v6730_v17, %s5269_s22 }
 0x4fb   : > { %3561 = vrot.lane.b32.xlu1 %v6719_v15, %s5271_s24 }
 0x4fe   : > { %3557 = vrot.lane.b32.xlu0 %v6730_v17, %s5271_s24 }
 0x4ff   : > { %3149 = vrot.lane.b32.xlu1 %v6751_v12, %s5270_s23 }
 0x502   : > { %3145 = vrot.lane.b32.xlu0 %v6710_v30, %s5270_s23 }
 0x503   : > { %3229 = vrot.lane.b32.xlu1 %v6751_v12, %s5269_s22 }
 0x506   : > { %3225 = vrot.lane.b32.xlu0 %v6710_v30, %s5269_s22 }
 0x507   : > { %3563 = vrot.lane.b32.xlu1 %v6751_v12, %s5271_s24 }
 0x50a   : > { %3559 = vrot.lane.b32.xlu0 %v6710_v30, %s5271_s24 }
 0x50b   : > { %3151 = vrot.lane.b32.xlu1 %v6733_v50, %s5270_s23 }
 0x50e   : > { %3639 = vrot.lane.b32.xlu0 %v6710_v30, %s5267_s20 }
 0x50f   : > { %3641 = vrot.lane.b32.xlu1 %v6719_v15, %s5267_s20 }
 0x512   : > { %3153 = vrot.lane.b32.xlu0 %v6742_v36, %s5270_s23 }
 0x513   : > { %3643 = vrot.lane.b32.xlu1 %v6751_v12, %s5267_s20 }
 0x516   : > { %3637 = vrot.lane.b32.xlu0 %v6730_v17, %s5267_s20 }
 0x517   : > { %3709 = vrot.lane.b32.xlu1 %v6676_v13, %s5272_s25 }
 0x51a   : > { %3707 = vrot.lane.b32.xlu0 %v6672_v52, %s5272_s25 }
 0x51b   : > { %3231 = vrot.lane.b32.xlu1 %v6733_v50, %s5269_s22 }
 0x51e   : > { %3705 = vrot.lane.b32.xlu0 %v6684_v2, %s5272_s25 }
 0x51f   : > { %3713 = vrot.lane.b32.xlu1 %v6687_v34, %s5272_s25 }
 0x522   : > { %3233 = vrot.lane.b32.xlu0 %v6742_v36, %s5269_s22 }
 0x523   : > { %3711 = vrot.lane.b32.xlu1 %v6707_v48, %s5272_s25 }
 0x526   : > { %3715 = vrot.lane.b32.xlu0 %v6696_v43, %s5272_s25 }
 0x527   : > { %3721 = vrot.lane.b32.xlu1 %v6719_v15, %s5272_s25 }
 0x52a   : > { %3719 = vrot.lane.b32.xlu0 %v6710_v30, %s5272_s25 }
 0x52b   : > { %3565 = vrot.lane.b32.xlu1 %v6733_v50, %s5271_s24 }
 0x52e   : > { %3717 = vrot.lane.b32.xlu0 %v6730_v17, %s5272_s25 }
 0x52f   : > { %3723 = vrot.lane.b32.xlu1 %v6751_v12, %s5272_s25 }
 0x532   : > { %3567 = vrot.lane.b32.xlu0 %v6742_v36, %s5271_s24 }
 0x533   : > { %4092 = vrot.lane.b32.xlu1 %v6676_v13, %s5268_s21 }
 0x535   : > { %v3136_v19 = vpop.permute.xlu1 %3135 }
 0x536   : > { %4090 = vrot.lane.b32.xlu0 %v6672_v52, %s5268_s21  ;;  %3177 = vst.msk [vmem:[#allocation5 + $0x70] sm:$0xff] %vm1050_vm14, %v3136_v19 }
 0x537   : > { %4096 = vrot.lane.b32.xlu1 %v6687_v34, %s5268_s21 }
 0x538   : > { %v3132_v42 = vpop.permute.xlu0 %3131 }
 0x539   : > { %v6853_v18 = vpop.permute.xlu1 %3215 }
 0x53a   : > { %4088 = vrot.lane.b32.xlu0 %v6684_v2, %s5268_s21  ;;  %3257 = vst.msk [vmem:[#allocation5 + $0xd0] sm:$0xff] %vm1050_vm14, %v6853_v18 }
 0x53b   : > { %3645 = vrot.lane.b32.xlu1 %v6733_v50, %s5267_s20 }
 0x53c   : > { %v6861_v35 = vpop.permute.xlu0 %3211 }
 0x53d   : > { %v6863_v26 = vpop.permute.xlu1 %3549  ;;  %v3289_v29 = vld [vmem:[#allocation5 + $0x70] sm:$0xff] }
 0x53e   : > { %4098 = vrot.lane.b32.xlu0 %v6696_v43, %s5268_s21  ;;  %3591 = vst.msk [vmem:[#allocation5 + $0x10] sm:$0xff] %vm1050_vm14, %v6863_v26  ;;  %3441 = vmatpush1.bf16.msra.mxu1 %v3289_v29  ;;  %v4636_v29 = vld [vmem:[%s7465_s6 + $0x28] sm:$0xff] }
 0x53f   : > { %4094 = vrot.lane.b32.xlu1 %v6707_v48, %s5268_s21  ;;  %3442 = vmatprep.subr.bf16.mxu1 %v5275_v38 }
 0x540   : > { %v6872_v5 = vpop.permute.xlu0 %3545 }
 0x541   : > { %v3630_v62 = vpop.permute.xlu1 %3629 }
 0x542   : > { %3647 = vrot.lane.b32.xlu0 %v6742_v36, %s5267_s20  ;;  %3671 = vst.msk [vmem:[#allocation5 + $0x70] sm:$0xff] %vm1050_vm14, %v3630_v62 }
 0x543   : > { %4104 = vrot.lane.b32.xlu1 %v6719_v15, %s5268_s21 }
 0x544   : > { %v6879_v47 = vpop.permute.xlu0 %3625 }
 0x545   : > { %v3138_v27 = vpop.permute.xlu1 %3137 }
 0x546   : > { %4102 = vrot.lane.b32.xlu0 %v6710_v30, %s5268_s21 }
 0x547   : > { %4106 = vrot.lane.b32.xlu1 %v6751_v12, %s5268_s21 }
 0x548   : > { %v3134_v24 = vpop.permute.xlu0 %3133 }
 0x549   : > { %v3155_v7 = vsel %vm437_vm15, %v3132_v42, %v3134_v24  ;;  %v3156_v54 = vsel %vm437_vm15, %v3134_v24, %v3136_v19  ;;  %v6887_v28 = vpop.permute.xlu1 %3217  ;;  %v4633_v19 = vld [vmem:[%s7465_s6 + $0x10] sm:$0xff] }
 0x54a   : > { %4100 = vrot.lane.b32.xlu0 %v6730_v17, %s5268_s21  ;;  %3367 = vmatprep.subr.bf16.mxu0 %v3156_v54 }
 0x54b   : > { %3725 = vrot.lane.b32.xlu1 %v6733_v50, %s5272_s25  ;;  %3368 = vmatpush1.bf16.msra.mxu0 %v3155_v7  ;;  %v4635_v7 = vld [vmem:[%s7465_s6 + $0x20] sm:$0xff] }
 0x54c   : > { %v6893_v45 = vpop.permute.xlu0 %3213 }
 0x54d   : > { %v3552_v9 = vpop.permute.xlu1 %3551  ;;  %v3236_v8 = vsel %vm490_vm0, %v6893_v45, %v6853_v18  ;;  %v3235_v18 = vsel %vm490_vm0, %v6861_v35, %v6893_v45  ;;  %v4638_v35 = vld [vmem:[%s7465_s6 + $0x38] sm:$0xff] }
 0x54e   : > { %4170 = vrot.lane.b32.xlu0 %v6672_v52, %s5273_s26 }
 0x54f   : > { %4172 = vrot.lane.b32.xlu1 %v6676_v13, %s5273_s26 }
 0x550   : > { %v6899_v23 = vpop.permute.xlu0 %3547 }
 0x551   : > { %v3632_v33 = vpop.permute.xlu1 %3631 }
 0x552   : > { %3727 = vrot.lane.b32.xlu0 %v6742_v36, %s5272_s25 }
 0x553   : > { %4176 = vrot.lane.b32.xlu1 %v6687_v34, %s5273_s26 }
 0x554   : > { %v6905_v51 = vpop.permute.xlu0 %3627 }
 0x555   : > { %v6909_v39 = vsel %vm7572_vm6, %v6905_v51, %v3630_v62  ;;  %v3140_v61 = vpop.permute.xlu1 %3139  ;;  %v3301_v62 = vld [vmem:[#allocation5 + $0xd0] sm:$0xff]  ;;  %vm7583_vm6 = vmmov %vm7574_vm5 }
 0x556   : > { %4168 = vrot.lane.b32.xlu0 %v6684_v2, %s5273_s26  ;;  %v3157_v57 = vsel %vm437_vm15, %v3138_v27, %v3140_v61 }
 0x557   : > { %4174 = vrot.lane.b32.xlu1 %v6707_v48, %s5273_s26 }
 0x558   : > { %v3142_v0 = vpop.permute.xlu0 %3141 }
 0x559   : > { %v3158_v22 = vsel %vm437_vm15, %v3140_v61, %v3142_v0  ;;  %3180 = vst.msk [vmem:[#allocation5 + $0x88] sm:$0xff] %vm1050_vm14, %v3142_v0  ;;  %v6917_v58 = vpop.permute.xlu1 %3219  ;;  %v4637_v0 = vld [vmem:[%s7465_s6 + $0x30] sm:$0xff] }
 0x55a   : > { %4178 = vrot.lane.b32.xlu0 %v6696_v43, %s5273_s26  ;;  %3369 = vmatprep.subr.bf16.mxu0 %v3158_v22 }
 0x55b   : > { %4108 = vrot.lane.b32.xlu1 %v6733_v50, %s5268_s21  ;;  %3370 = vmatpush1.bf16.msra.mxu0 %v3157_v57 }
 0x55c   : > { %v6924_v25 = vpop.permute.xlu0 %3221 }
 0x55d   : > { %3260 = vst.msk [vmem:[#allocation5 + $0xe8] sm:$0xff] %vm1050_vm14, %v6924_v25  ;;  %v6928_v44 = vpop.permute.xlu1 %3553  ;;  %v3238_v24 = vsel %vm490_vm0, %v6917_v58, %v6924_v25 }
 0x55e   : > { %4182 = vrot.lane.b32.xlu0 %v6710_v30, %s5273_s26  ;;  %v6934_v53 = vsel %vm554_vm2, %v3552_v9, %v6928_v44 }
 0x55f   : > { %4184 = vrot.lane.b32.xlu1 %v6719_v15, %s5273_s26 }
 0x560   : > { %v6938_v49 = vpop.permute.xlu0 %3555  ;;  %v3292_v31 = vld [vmem:[#allocation5 + $0x88] sm:$0xff] }
 0x561   : > { %3594 = vst.msk [vmem:[#allocation5 + $0x28] sm:$0xff] %vm1050_vm14, %v6938_v49  ;;  %3443 = vmatpush1.bf16.msra.mxu1 %v3292_v31  ;;  %v3634_v60 = vpop.permute.xlu1 %3633 }
 0x562   : > { %4110 = vrot.lane.b32.xlu0 %v6742_v36, %s5268_s21  ;;  %v6945_v6 = vsel %vm7573_vm9, %v3632_v33, %v3634_v60  ;;  %3444 = vmatprep.subr.bf16.mxu1 %v5275_v38  ;;  %v3237_v33 = vsel %vm490_vm0, %v6887_v28, %v6917_v58  ;;  %v4764_v58 = vld [vmem:[#allocation8] sm:$0x1] }
 0x563   : > { %4186 = vrot.lane.b32.xlu1 %v6751_v12, %s5273_s26 }
 0x564   : > { %v3636_v63 = vpop.permute.xlu0 %3635  ;;  %v3304_v31 = vld [vmem:[#allocation5 + $0xe8] sm:$0xff] }
 0x565   : > { %v6951_v32 = vsel %vm7574_vm5, %v3634_v60, %v3636_v63  ;;  %3674 = vst.msk [vmem:[#allocation5 + $0x88] sm:$0xff] %vm1050_vm14, %v3636_v63  ;;  %v3148_v20 = vpop.permute.xlu1 %3147 }
 0x566   : > { %4180 = vrot.lane.b32.xlu0 %v6730_v17, %s5273_s26  ;;  %3183 = vst.msk [vmem:[#allocation5 + $0xa0] sm:$0xff] %vm1050_vm14, %v3148_v20 }
 0x567   : > { %4252 = vrot.lane.b32.xlu1 %v6676_v13, %s5274_s27 }
 0x568   : > { %v3144_v56 = vpop.permute.xlu0 %3143 }
 0x569   : > { %v6959_v46 = vpop.permute.xlu1 %3227 }
 0x56a   : > { %4250 = vrot.lane.b32.xlu0 %v6672_v52, %s5274_s27  ;;  %3263 = vst.msk [vmem:[#allocation5 + $0x100] sm:$0xff] %vm1050_vm14, %v6959_v46 }
 0x56b   : > { %4188 = vrot.lane.b32.xlu1 %v6733_v50, %s5273_s26 }
 0x56c   : > { %v6967_v11 = vpop.permute.xlu0 %3223 }
 0x56d   : > { %v6969_v10 = vpop.permute.xlu1 %3561  ;;  %v3295_v3 = vld [vmem:[#allocation5 + $0xa0] sm:$0xff] }
 0x56e   : > { %4248 = vrot.lane.b32.xlu0 %v6684_v2, %s5274_s27  ;;  %3597 = vst.msk [vmem:[#allocation5 + $0x40] sm:$0xff] %vm1050_vm14, %v6969_v10  ;;  %3445 = vmatpush1.bf16.msra.mxu1 %v3295_v3 }
 0x56f   : > { %4256 = vrot.lane.b32.xlu1 %v6687_v34, %s5274_s27  ;;  %3446 = vmatprep.subr.bf16.mxu1 %v5275_v38 }
 0x570   : > { %v6978_v52 = vpop.permute.xlu0 %3557 }
 0x571   : > { %v3150_v13 = vpop.permute.xlu1 %3149  ;;  %v3307_v3 = vld [vmem:[#allocation5 + $0x100] sm:$0xff] }
 0x572   : > { %4190 = vrot.lane.b32.xlu0 %v6742_v36, %s5273_s26 }
 0x573   : > { %4254 = vrot.lane.b32.xlu1 %v6707_v48, %s5274_s27 }
 0x574   : > { %v3146_v41 = vpop.permute.xlu0 %3145 }
 0x575   : > { %v3159_v2 = vsel %vm437_vm15, %v3144_v56, %v3146_v41  ;;  %v3160_v14 = vsel %vm437_vm15, %v3146_v41, %v3148_v20  ;;  %v6986_v55 = vpop.permute.xlu1 %3229  ;;  %v5223_v56 = vld [vmem:[%s7464_s5] ss:$8 sps:$4 sm:$0xff]  }
 0x576   : > { %4258 = vrot.lane.b32.xlu0 %v6696_v43, %s5274_s27  ;;  %3371 = vmatprep.subr.bf16.mxu0 %v3160_v14 }
 0x577   : > { %4264 = vrot.lane.b32.xlu1 %v6719_v15, %s5274_s27  ;;  %3372 = vmatpush1.bf16.msra.mxu0 %v3159_v2  ;;  %v4632_v15 = vld [vmem:[%s7465_s6 + $0x8] sm:$0xff]  ;;  %v3572_v2 = vsel %vm554_vm2, %v6928_v44, %v6938_v49 }
 0x578   : > { %v3226_v34 = vpop.permute.xlu0 %3225 }
 0x579   : > { %v6992_v37 = vpop.permute.xlu1 %3563  ;;  %v3240_v61 = vsel %vm490_vm0, %v3226_v34, %v6959_v46  ;;  %v3239_v28 = vsel %vm490_vm0, %v6967_v11, %v3226_v34  ;;  %v3570_v46 = vsel %vm554_vm2, %v6899_v23, %v6863_v26  ;;  %v3569_v26 = vsel %vm554_vm2, %v6872_v5, %v6899_v23  ;;  %v3269_v34 = vld [vmem:[%s7464_s5 + $0x10] sm:$0xff] }
 0x57a   : > { %4262 = vrot.lane.b32.xlu0 %v6710_v30, %s5274_s27  ;;  %v4631_v30 = vld [vmem:[%s7465_s6] sm:$0xff] }
 0x57b   : > { %4268 = vrot.lane.b32.xlu1 %v6733_v50, %s5274_s27  ;;  %v4634_v50 = vld [vmem:[%s7465_s6 + $0x18] sm:$0xff] }
 0x57c   : > { %v6998_v48 = vpop.permute.xlu0 %3559 }
 0x57d   : > { %v3152_v40 = vpop.permute.xlu1 %3151  ;;  %v3574_v44 = vsel %vm554_vm2, %v6998_v48, %v6969_v10  ;;  %v3573_v10 = vsel %vm554_vm2, %v6978_v52, %v6998_v48  ;;  %v5230_v48 = vld [vmem:[%s7464_s5 + $0x20] ss:$8 sps:$4 sm:$0xff]  }
 0x57e   : > { %4260 = vrot.lane.b32.xlu0 %v6730_v17, %s5274_s27 }
 0x57f   : > { %4266 = vrot.lane.b32.xlu1 %v6751_v12, %s5274_s27 }
 0x580   : > { %v7004_v43 = vpop.permute.xlu0 %3639 }
 0x581   : > { %v7009_v16 = vpop.permute.xlu1 %3641 }
 0x582   : > { %4270 = vrot.lane.b32.xlu0 %v6742_v36, %s5274_s27  ;;  %3677 = vst.msk [vmem:[#allocation5 + $0xa0] sm:$0xff] %vm1050_vm14, %v7009_v16  ;;  %v3161_v36 = vsel %vm437_vm15, %v3150_v13, %v3152_v40  ;;  %v5226_v13 = vld [vmem:[%s7464_s5 + $0x14] ss:$8 sps:$4 sm:$0xff]  }
 0x583   : > { %4646 = vperm.xlu1 %5164, %v4632_v15   ;;  %v3772_v15 = vld [vmem:[#allocation5 + $0x10] sm:$0xff] }
 0x584   : > { %v3154_v17 = vpop.permute.xlu0 %3153 }
 0x585   : > { %v3162_v12 = vsel %vm437_vm15, %v3152_v40, %v3154_v17  ;;  %3186 = vst.msk [vmem:[#allocation5 + $0xb8] sm:$0xff] %vm1050_vm14, %v3154_v17  ;;  %v7023_v21 = vpop.permute.xlu1 %3643  ;;  %v3270_v40 = vld [vmem:[%s7464_s5 + $0x18] sm:$0xff]  ;;  %vm7576_vm15 = vmmov %vm7574_vm5 }
 0x586   : > { %4641 = vperm.xlu0 %5165, %v4631_v30   ;;  %3373 = vmatprep.subr.bf16.mxu0 %v3162_v12  ;;  %v5033_v23 = vcombine.low %v3269_v34, %v3270_v40  ;;  %v5228_v30 = vld [vmem:[%s7464_s5 + $0x24] ss:$8 sps:$4 sm:$0xff]   ;;  %v3775_v12 = vld [vmem:[#allocation5 + $0x28] sm:$0xff] }
 0x587   : > { %4656 = vperm.xlu1 %5164, %v4634_v50   ;;  %3374 = vmatpush1.bf16.msra.mxu0 %v3161_v36 }
 0x588   : > { %v7032_v42 = vpop.permute.xlu0 %3637  ;;  %3375 = vmatprep.subr.bf16.mxu0 %v3236_v8 }
 0x589   : > { %v7037_v27 = vpop.permute.xlu1 %3709 }
 0x58a   : > { %4651 = vperm.xlu0 %5165, %v4633_v19   ;;  %3751 = vst.msk [vmem:[#allocation5 + $0xd0] sm:$0xff] %vm1050_vm14, %v7037_v27  ;;  %v3778_v19 = vld [vmem:[#allocation5 + $0x40] sm:$0xff] }
 0x58b   : > { %4666 = vperm.xlu1 %5164, %v4636_v29   ;;  %3376 = vmatpush1.bf16.msra.mxu0 %v3235_v18  ;;  %v5231_v29 = vld [vmem:[%s7464_s5 + $0x34] ss:$8 sps:$4 sm:$0xff]  }
 0x58c   : > { %v7050_v54 = vpop.permute.xlu0 %3707  ;;  %v3298_v9 = vld [vmem:[#allocation5 + $0xb8] sm:$0xff]  ;;  %3377 = vmatprep.subr.bf16.mxu0 %v3238_v24 }
 0x58d   : > { %3447 = vmatpush1.bf16.msra.mxu1 %v3298_v9  ;;  %v3232_v45 = vpop.permute.xlu1 %3231 }
 0x58e   : > { %4661 = vperm.xlu0 %5165, %v4635_v7   ;;  %3448 = vmatprep.subr.bf16.mxu1 %v5275_v38  ;;  %v3241_v20 = vsel %vm490_vm0, %v6986_v55, %v3232_v45 }
 0x58f   : > { %4676 = vperm.xlu1 %5164, %v4638_v35   ;;  %3378 = vmatpush1.bf16.msra.mxu0 %v3237_v33  ;;  %v5236_v33 = vld [vmem:[%s7464_s5 + $0x44] ss:$8 sps:$4 sm:$0xff]  }
 0x590   : > { %v7064_v22 = vpop.permute.xlu0 %3705  ;;  %3379 = vmatprep.subr.bf16.mxu0 %v3240_v61 }
 0x591   : > { %3449 = vmatpush1.bf16.msra.mxu1 %v3301_v62  ;;  %v7066_v57 = vpop.permute.xlu1 %3713 }
 0x592   : > { %4671 = vperm.xlu0 %5165, %v4637_v0   ;;  %3450 = vmatprep.subr.bf16.mxu1 %v5275_v38 }
 0x593   : > { %3380 = vmatpush1.bf16.msra.mxu0 %v3239_v28  ;;  %v3787_v28 = vld [vmem:[#allocation5 + $0x88] sm:$0xff] }
 0x594   : > { %v3234_v25 = vpop.permute.xlu0 %3233 }
 0x595   : > { %v3242_v60 = vsel %vm490_vm0, %v3232_v45, %v3234_v25  ;;  %3266 = vst.msk [vmem:[#allocation5 + $0x118] sm:$0xff] %vm1050_vm14, %v3234_v25  ;;  %3451 = vmatpush1.bf16.msra.mxu1 %v3304_v31  ;;  %v7073_v63 = vpop.permute.xlu1 %3711  ;;  %vm7575_vm0 = vmmov %vm7565_vm7  ;;  %v3784_v45 = vld [vmem:[#allocation5 + $0x70] sm:$0xff] }
 0x596   : > { %4767 = vperm.xlu0 %5165, %v4764_v58   ;;  %3452 = vmatprep.subr.bf16.mxu1 %v5275_v38  ;;  %vm7579_vm11 = vmmov %vm7575_vm0 }
 0x597   : > { %3381 = vmatprep.subr.bf16.mxu0 %v3242_v60  ;;  %vm7580_vm7 = vmmov %vm7575_vm0  ;;  %v3790_v60 = vld [vmem:[#allocation5 + $0xa0] sm:$0xff] }
 0x598   : > { %v7084_v11 = vpop.permute.xlu0 %3715  ;;  %3382 = vmatpush1.bf16.msra.mxu0 %v3241_v20  ;;  %vm7584_vm9 = vmmov %vm7575_vm0 }
 0x599   : > { %3754 = vst.msk [vmem:[#allocation5 + $0xe8] sm:$0xff] %vm1050_vm14, %v7084_v11  ;;  %3453 = vmatpush1.bf16.msra.mxu1 %v3307_v3  ;;  %v7091_v41 = vpop.permute.xlu1 %3721  ;;  %3854 = vmatprep.subr.bf16.mxu0 %v3570_v46  ;;  %vm7585_vm5 = vmmov %vm7575_vm0 }
 0x59a   : > { %3757 = vst.msk [vmem:[#allocation5 + $0x100] sm:$0xff] %vm1050_vm14, %v7091_v41  ;;  %3454 = vmatprep.subr.bf16.mxu1 %v5275_v38 }
 0x59b   : > { %3392 = vmatmul.mubr.bf16.vlgmr.msra.gmra.mrb[64].mxu0 %v5223_v56 }
 0x59c   : > { %v7102_v14 = vpop.permute.xlu0 %3719  ;;  %v3310_v55 = vld [vmem:[#allocation5 + $0x118] sm:$0xff]  ;;  %3855 = vmatpush1.bf16.msra.mxu0 %v3569_v26  ;;  %5040 = vmatprep.mubr.msk.bf16.mxu0 %vm1590_vm1, %v5226_v13 }
 0x59d   : > { %3455 = vmatpush1.bf16.msra.mxu1 %v3310_v55  ;;  %v3566_v5 = vpop.permute.xlu1 %3565  ;;  %3856 = vmatprep.subr.bf16.mxu0 %v3572_v2  ;;  %v3731_v2 = vsel %vm661_vm4, %v7073_v63, %v7066_v57 }
 0x59e   : > { %3927 = vmatprep.subr.bf16.mxu1 %v5275_v38  ;;  %v3575_v52 = vsel %vm554_vm2, %v6992_v37, %v3566_v5  ;;  %v3649_v37 = vsel %vm7576_vm15, %v6879_v47, %v6905_v51  ;;  %v3654_v47 = vsel %vm7578_vm10, %v7004_v43, %v7009_v16 }
 0x5a0   : > { %v7115_v49 = vpop.permute.xlu0 %3717  ;;  %3465 = vmatmul.mubr.bf16.vlgmr.msra.gmra.mrb[56].mxu1 %v5223_v56  ;;  %3857 = vmatpush1.bf16.msra.mxu0 %v6934_v53  ;;  %v3799_v40 = vld [vmem:[#allocation5 + $0xe8] sm:$0xff] }
 0x5a1   : > { %3928 = vmatpush1.bf16.msra.mxu1 %v3772_v15  ;;  %v7121_v17 = vpop.permute.xlu1 %3723  ;;  %3858 = vmatprep.subr.bf16.mxu0 %v3574_v44  ;;  %v5234_v44 = vld [vmem:[%s7464_s5 + $0x40] ss:$8 sps:$4 sm:$0xff]   ;;  %v5237_v15 = vld [vmem:[%s7464_s5 + $0x54] ss:$8 sps:$4 sm:$0xff]  }
 0x5a2   : > { %3929 = vmatprep.subr.bf16.mxu1 %v5275_v38  ;;  %5044 = vmatprep.mubr.msk.bf16.mxu1 %vm1590_vm1, %v5226_v13 }
 0x5a3   : > { %3402 = vmatmul.mubr.bf16.gmra.mrb[68].mxu0 %v5033_v23 }
 0x5a4   : > { %v3568_v50 = vpop.permute.xlu0 %3567  ;;  %3859 = vmatpush1.bf16.msra.mxu0 %v3573_v10  ;;  %5041 = vmatprep.mubr.msk.bf16.mxu0 %vm1590_vm1, %v5228_v30 }
 0x5a5   : > { %v3576_v53 = vsel %vm554_vm2, %v3566_v5, %v3568_v50  ;;  %3600 = vst.msk [vmem:[#allocation5 + $0x58] sm:$0xff] %vm1050_vm14, %v3568_v50  ;;  %3930 = vmatpush1.bf16.msra.mxu1 %v3775_v12  ;;  %v4093_v36 = vpop.permute.xlu1 %4092  ;;  %vm7577_vm2 = vmmov %vm7575_vm0 }
 0x5a6   : > { %4134 = vst.msk [vmem:[#allocation5 + $0x10] sm:$0xff] %vm1050_vm14, %v4093_v36  ;;  %3931 = vmatprep.subr.bf16.mxu1 %v5275_v38  ;;  %3860 = vmatprep.subr.bf16.mxu0 %v3576_v53 }
 0x5a8   : > { %v4091_v8 = vpop.permute.xlu0 %4090  ;;  %3861 = vmatpush1.bf16.msra.mxu0 %v3575_v52  ;;  %3473 = vmatmul.mubr.bf16.gmra.mrb[60].mxu1 %v5033_v23 }
 0x5a9   : > { %v7142_v62 = vsel %vm7575_vm0, %v4091_v8, %v4093_v36  ;;  %3932 = vmatpush1.bf16.msra.mxu1 %v3778_v19  ;;  %v4097_v18 = vpop.permute.xlu1 %4096  ;;  %3862 = vmatprep.subr.bf16.mxu0 %v6909_v39  ;;  %v5233_v39 = vld [vmem:[%s7464_s5 + $0x30] ss:$8 sps:$4 sm:$0xff]  }
 0x5aa   : > { %3933 = vmatprep.subr.bf16.mxu1 %v5275_v38  ;;  %5045 = vmatprep.mubr.msk.bf16.mxu1 %vm1590_vm1, %v5228_v30 }
 0x5ab   : > { %3412 = vmatmul.mubr.bf16.gmra.mrb[72].mxu0 %v5230_v48 }
 0x5ac   : > { %v4089_v24 = vpop.permute.xlu0 %4088  ;;  %v3781_v7 = vld [vmem:[#allocation5 + $0x58] sm:$0xff]  ;;  %3863 = vmatpush1.bf16.msra.mxu0 %v3649_v37  ;;  %5042 = vmatprep.mubr.msk.bf16.mxu0 %vm1590_vm1, %v5231_v29 }
 0x5ad   : > { %v7152_v9 = vsel %vm7577_vm2, %v4089_v24, %v4091_v8  ;;  %3934 = vmatpush1.bf16.msra.mxu1 %v3781_v7  ;;  %v3646_v35 = vpop.permute.xlu1 %3645  ;;  %3864 = vmatprep.subr.bf16.mxu0 %v6951_v32  ;;  %v4315_v19 = vld [vmem:[#allocation5 + $0x10] sm:$0xff] }
 0x5ae   : > { %3935 = vmatprep.subr.bf16.mxu1 %v5275_v38 }
 0x5b0   : > { %v4099_v51 = vpop.permute.xlu0 %4098  ;;  %3865 = vmatpush1.bf16.msra.mxu0 %v6945_v6  ;;  %3481 = vmatmul.mubr.bf16.gmra.mrb[64].mxu1 %v5230_v48  ;;  %v3653_v6 = vsel %vm7581_vm12, %v7032_v42, %v7004_v43  ;;  %v3655_v43 = vsel %vm7583_vm6, %v7023_v21, %v3646_v35  ;;  %v3730_v42 = vsel %vm661_vm4, %v7050_v54, %v7037_v27  ;;  %v5239_v48 = vld [vmem:[%s7464_s5 + $0x50] ss:$8 sps:$4 sm:$0xff]  }
 0x5b1   : > { %v7167_v32 = vsel %vm7579_vm11, %v4097_v18, %v4099_v51  ;;  %4137 = vst.msk [vmem:[#allocation5 + $0x28] sm:$0xff] %vm1050_vm14, %v4099_v51  ;;  %3936 = vmatpush1.bf16.msra.mxu1 %v3784_v45  ;;  %v4095_v61 = vpop.permute.xlu1 %4094  ;;  %3866 = vmatprep.subr.bf16.mxu0 %v3654_v47  ;;  %v3729_v21 = vsel %vm661_vm4, %v7064_v22, %v7050_v54  ;;  %v5243_v51 = vld [vmem:[%s7464_s5 + $0x74] ss:$8 sps:$4 sm:$0xff]  }
 0x5b2   : > { %v7171_v0 = vsel %vm7580_vm7, %v4095_v61, %v4097_v18  ;;  %3937 = vmatprep.subr.bf16.mxu1 %v5275_v38  ;;  %5046 = vmatprep.mubr.msk.bf16.mxu1 %vm1590_vm1, %v5231_v29  ;;  %v3732_v27 = vsel %vm661_vm4, %v7066_v57, %v7084_v11  ;;  %v3734_v54 = vsel %vm661_vm4, %v7102_v14, %v7091_v41  ;;  %v3796_v11 = vld [vmem:[#allocation5 + $0xd0] sm:$0xff] }
 0x5b3   : > { %3422 = vmatmul.mubr.bf16.gmra.mrb[76].mxu0 %v5233_v39  ;;  %v3733_v57 = vsel %vm661_vm4, %v7115_v49, %v7102_v14  ;;  %v3802_v49 = vld [vmem:[#allocation5 + $0x100] sm:$0xff]  ;;  %v5240_v29 = vld [vmem:[%s7464_s5 + $0x64] ss:$8 sps:$4 sm:$0xff]  }
 0x5b4   : > { %v3648_v16 = vpop.permute.xlu0 %3647  ;;  %3867 = vmatpush1.bf16.msra.mxu0 %v3653_v6  ;;  %5063 = vmatprep.mubr.msk.bf16.mxu0 %vm1590_vm1, %v5236_v33 }
 0x5b5   : > { %v3656_v58 = vsel %vm7582_vm13, %v3646_v35, %v3648_v16  ;;  %3680 = vst.msk [vmem:[#allocation5 + $0xb8] sm:$0xff] %vm1050_vm14, %v3648_v16  ;;  %3938 = vmatpush1.bf16.msra.mxu1 %v3787_v28  ;;  %v4105_v25 = vpop.permute.xlu1 %4104  ;;  %v5242_v35 = vld [vmem:[%s7464_s5 + $0x60] ss:$8 sps:$4 sm:$0xff]   ;;  %v5245_v28 = vld [vmem:[%s7464_s5 + $0x70] ss:$8 sps:$4 sm:$0xff]  }
 0x5b6   : > { %4140 = vst.msk [vmem:[#allocation5 + $0x40] sm:$0xff] %vm1050_vm14, %v4105_v25  ;;  %3939 = vmatprep.subr.bf16.mxu1 %v5275_v38  ;;  %3868 = vmatprep.subr.bf16.mxu0 %v3656_v58 }
 0x5b8   : > { %v4103_v31 = vpop.permute.xlu0 %4102  ;;  %3869 = vmatpush1.bf16.msra.mxu0 %v3655_v43  ;;  %3489 = vmatmul.mubr.bf16.gmra.mrb[68].mxu1 %v5233_v39  ;;  %v4318_v24 = vld [vmem:[#allocation5 + $0x28] sm:$0xff]  ;;  %v5248_v43 = vld [vmem:[%s7464_s5 + $0x84] ss:$8 sps:$4 sm:$0xff]  }
 0x5b9   : > { %v7189_v20 = vsel %vm7584_vm9, %v4103_v31, %v4105_v25  ;;  %3940 = vmatpush1.bf16.msra.mxu1 %v3790_v60  ;;  %v4107_v56 = vpop.permute.xlu1 %4106  ;;  %3870 = vmatprep.subr.bf16.mxu0 %v3730_v42 }
 0x5ba   : > { %3941 = vmatprep.subr.bf16.mxu1 %v5275_v38  ;;  %5067 = vmatprep.mubr.msk.bf16.mxu1 %vm1590_vm1, %v5236_v33 }
 0x5bc   : > { %v4101_v46 = vpop.permute.xlu0 %4100  ;;  %v3793_v3 = vld [vmem:[#allocation5 + $0xb8] sm:$0xff]  ;;  %3871 = vmatpush1.bf16.msra.mxu0 %v3729_v21 }
 0x5bd   : > { %v7200_v13 = vsel %vm7585_vm5, %v4101_v46, %v4103_v31  ;;  %3942 = vmatpush1.bf16.msra.mxu1 %v3793_v3  ;;  %v3726_v26 = vpop.permute.xlu1 %3725  ;;  %3872 = vmatprep.subr.bf16.mxu0 %v3732_v27  ;;  %v4321_v47 = vld [vmem:[#allocation5 + $0x40] sm:$0xff] }
 0x5be   : > { %3943 = vmatprep.subr.bf16.mxu1 %v5275_v38  ;;  %v3735_v23 = vsel %vm661_vm4, %v7121_v17, %v3726_v26 }
 0x5c0   : > { %v4171_v22 = vpop.permute.xlu0 %4170  ;;  %3873 = vmatpush1.bf16.msra.mxu0 %v3731_v2 }
 0x5c1   : > { %3944 = vmatpush1.bf16.msra.mxu1 %v3796_v11  ;;  %v4173_v55 = vpop.permute.xlu1 %4172  ;;  %3874 = vmatprep.subr.bf16.mxu0 %v3734_v54 }
 0x5c2   : > { %v7210_v34 = vsel %vm769_vm3, %v4171_v22, %v4173_v55  ;;  %4214 = vst.msk [vmem:[#allocation5 + $0x70] sm:$0xff] %vm1050_vm14, %v4173_v55  ;;  %3945 = vmatprep.subr.bf16.mxu1 %v5275_v38 }
 0x5c4   : > { %v3728_v63 = vpop.permute.xlu0 %3727  ;;  %3875 = vmatpush1.bf16.msra.mxu0 %v3733_v57 }
 0x5c5   : > { %v3736_v41 = vsel %vm661_vm4, %v3726_v26, %v3728_v63  ;;  %3760 = vst.msk [vmem:[#allocation5 + $0x118] sm:$0xff] %vm1050_vm14, %v3728_v63  ;;  %3946 = vmatpush1.bf16.msra.mxu1 %v3799_v40  ;;  %v4177_v5 = vpop.permute.xlu1 %4176  ;;  %vm7586_vm4 = vmmov %vm7575_vm0 }
 0x5c6   : > { %3947 = vmatprep.subr.bf16.mxu1 %v5275_v38  ;;  %3876 = vmatprep.subr.bf16.mxu0 %v3736_v41 }
 0x5c8   : > { %v4169_v14 = vpop.permute.xlu0 %4168  ;;  %3877 = vmatpush1.bf16.msra.mxu0 %v3735_v23 }
 0x5c9   : > { %v4192_v30 = vsel %vm769_vm3, %v4169_v14, %v4171_v22  ;;  %3948 = vmatpush1.bf16.msra.mxu1 %v3802_v49  ;;  %v4175_v10 = vpop.permute.xlu1 %4174  ;;  %4397 = vmatprep.subr.bf16.mxu0 %v7142_v62  ;;  %v4327_v25 = vld [vmem:[#allocation5 + $0x70] sm:$0xff]  ;;  %v5249_v49 = vld [vmem:[%s7464_s5 + $0x94] ss:$8 sps:$4 sm:$0xff]  }
 0x5ca   : > { %v7231_v50 = vsel %vm769_vm3, %v4175_v10, %v4177_v5  ;;  %3949 = vmatprep.subr.bf16.mxu1 %v5275_v38  ;;  %v5252_v10 = vld [vmem:[%s7464_s5 + $0xa4] ss:$8 sps:$4 sm:$0xff]  }
 0x5cb   : > { %3887 = vmatmul.mubr.bf16.vlgmr.msra.gmra.mrb[80].mxu0 %v5234_v44 }
 0x5cc   : > { %v4179_v17 = vpop.permute.xlu0 %4178  ;;  %v3805_v12 = vld [vmem:[#allocation5 + $0x118] sm:$0xff]  ;;  %4398 = vmatpush1.bf16.msra.mxu0 %v7152_v9  ;;  %5064 = vmatprep.mubr.msk.bf16.mxu0 %vm1590_vm1, %v5237_v15 }
 0x5cd   : > { %v4195_v53 = vsel %vm769_vm3, %v4177_v5, %v4179_v17  ;;  %4217 = vst.msk [vmem:[#allocation5 + $0x88] sm:$0xff] %vm1050_vm14, %v4179_v17  ;;  %3950 = vmatpush1.bf16.msra.mxu1 %v3805_v12  ;;  %v4109_v36 = vpop.permute.xlu1 %4108  ;;  %4399 = vmatprep.subr.bf16.mxu0 %v7167_v32  ;;  %v5255_v17 = vld [vmem:[%s7464_s5 + $0xb4] ss:$8 sps:$4 sm:$0xff]   ;;  %v5257_v12 = vld [vmem:[%s7464_s5 + $0xb0] ss:$8 sps:$4 sm:$0xff]  }
 0x5ce   : > { %v4118_v52 = vsel %vm7586_vm4, %v4107_v56, %v4109_v36  ;;  %4470 = vmatprep.subr.bf16.mxu1 %v5275_v38 }
 0x5d0   : > { %3960 = vmatmul.mubr.bf16.vlgmr.msra.gmra.mrb[72].mxu1 %v5234_v44  ;;  %v4183_v8 = vpop.permute.xlu0 %4182  ;;  %4400 = vmatpush1.bf16.msra.mxu0 %v7171_v0  ;;  %v5246_v44 = vld [vmem:[%s7464_s5 + $0x80] ss:$8 sps:$4 sm:$0xff]  }
 0x5d1   : > { %4471 = vmatpush1.bf16.msra.mxu1 %v4315_v19  ;;  %v4185_v62 = vpop.permute.xlu1 %4184  ;;  %5068 = vmatprep.mubr.msk.bf16.mxu1 %vm1590_vm1, %v5237_v15 }
 0x5d2   : > { %v4197_v18 = vsel %vm769_vm3, %v4183_v8, %v4185_v62  ;;  %4220 = vst.msk [vmem:[#allocation5 + $0xa0] sm:$0xff] %vm1050_vm14, %v4185_v62  ;;  %4472 = vmatprep.subr.bf16.mxu1 %v5275_v38  ;;  %4401 = vmatprep.subr.bf16.mxu0 %v7189_v20 }
 0x5d3   : > { %3897 = vmatmul.mubr.bf16.gmra.mrb[84].mxu0 %v5239_v48 }
 0x5d4   : > { %v4111_v37 = vpop.permute.xlu0 %4110  ;;  %4402 = vmatpush1.bf16.msra.mxu0 %v7200_v13  ;;  %5065 = vmatprep.mubr.msk.bf16.mxu0 %vm1590_vm1, %v5240_v29  ;;  %v4330_v20 = vld [vmem:[#allocation5 + $0x88] sm:$0xff] }
 0x5d5   : > { %v4119_v7 = vsel %vm7575_vm0, %v4109_v36, %v4111_v37  ;;  %4143 = vst.msk [vmem:[#allocation5 + $0x58] sm:$0xff] %vm1050_vm14, %v4111_v37  ;;  %4473 = vmatpush1.bf16.msra.mxu1 %v4318_v24  ;;  %v4187_v9 = vpop.permute.xlu1 %4186 }
 0x5d6   : > { %4474 = vmatprep.subr.bf16.mxu1 %v5275_v38  ;;  %4403 = vmatprep.subr.bf16.mxu0 %v4119_v7 }
 0x5d8   : > { %3968 = vmatmul.mubr.bf16.gmra.mrb[76].mxu1 %v5239_v48  ;;  %v4181_v39 = vpop.permute.xlu0 %4180  ;;  %4404 = vmatpush1.bf16.msra.mxu0 %v4118_v52  ;;  %v5278_v52 = vmov 0.0  }
 0x5d9   : > { %v4196_v45 = vsel %vm769_vm3, %v4181_v39, %v4183_v8  ;;  %4475 = vmatpush1.bf16.msra.mxu1 %v4321_v47  ;;  %v4253_v33 = vpop.permute.xlu1 %4252  ;;  %5069 = vmatprep.mubr.msk.bf16.mxu1 %vm1590_vm1, %v5240_v29  ;;  %v4333_v3 = vld [vmem:[#allocation5 + $0xa0] sm:$0xff] }
 0x5da   : > { %4294 = vst.msk [vmem:[#allocation5 + $0xd0] sm:$0xff] %vm1050_vm14, %v4253_v33  ;;  %4476 = vmatprep.subr.bf16.mxu1 %v5275_v38  ;;  %4405 = vmatprep.subr.bf16.mxu0 %v7210_v34 }
 0x5db   : > { %3907 = vmatmul.mubr.bf16.gmra.mrb[88].mxu0 %v5242_v35 }
 0x5dc   : > { %v4251_v32 = vpop.permute.xlu0 %4250  ;;  %v4324_v61 = vld [vmem:[#allocation5 + $0x58] sm:$0xff]  ;;  %4406 = vmatpush1.bf16.msra.mxu0 %v4192_v30  ;;  %5066 = vmatprep.mubr.msk.bf16.mxu0 %vm1590_vm1, %v5243_v51  ;;  %v5251_v30 = vld [vmem:[%s7464_s5 + $0x90] ss:$8 sps:$4 sm:$0xff]  }
 0x5dd   : > { %v4273_v0 = vsel %vm809_vm8, %v4251_v32, %v4253_v33  ;;  %4477 = vmatpush1.bf16.msra.mxu1 %v4324_v61  ;;  %v4189_v6 = vpop.permute.xlu1 %4188  ;;  %4407 = vmatprep.subr.bf16.mxu0 %v4195_v53 }
 0x5de   : > { %v4198_v16 = vsel %vm769_vm3, %v4187_v9, %v4189_v6  ;;  %4478 = vmatprep.subr.bf16.mxu1 %v5275_v38 }
 0x5e0   : > { %3976 = vmatmul.mubr.bf16.gmra.mrb[80].mxu1 %v5242_v35  ;;  %v4249_v58 = vpop.permute.xlu0 %4248  ;;  %4408 = vmatpush1.bf16.msra.mxu0 %v7231_v50  ;;  %v5254_v50 = vld [vmem:[%s7464_s5 + $0xa0] ss:$8 sps:$4 sm:$0xff]  }
 0x5e1   : > { %v4272_v42 = vsel %vm809_vm8, %v4249_v58, %v4251_v32  ;;  %4479 = vmatpush1.bf16.msra.mxu1 %v4327_v25  ;;  %v4257_v31 = vpop.permute.xlu1 %4256  ;;  %5070 = vmatprep.mubr.msk.bf16.mxu1 %vm1590_vm1, %v5243_v51  ;;  %v4339_v34 = vld [vmem:[#allocation5 + $0xd0] sm:$0xff] }
 0x5e2   : > { %4480 = vmatprep.subr.bf16.mxu1 %v5275_v38  ;;  %4409 = vmatprep.subr.bf16.mxu0 %v4197_v18 }
 0x5e3   : > { %3917 = vmatmul.mubr.bf16.gmra.mrb[92].mxu0 %v5245_v28 }
 0x5e4   : > { %v4191_v60 = vpop.permute.xlu0 %4190  ;;  %4410 = vmatpush1.bf16.msra.mxu0 %v4196_v45  ;;  %5087 = vmatprep.mubr.msk.bf16.mxu0 %vm1590_vm1, %v5248_v43 }
 0x5e5   : > { %v4199_v56 = vsel %vm769_vm3, %v4189_v6, %v4191_v60  ;;  %4223 = vst.msk [vmem:[#allocation5 + $0xb8] sm:$0xff] %vm1050_vm14, %v4191_v60  ;;  %4481 = vmatpush1.bf16.msra.mxu1 %v4330_v20  ;;  %v4255_v21 = vpop.permute.xlu1 %4254  ;;  %vm5279_vm3 = vmmov 0  }
 0x5e6   : > { %v4274_v27 = vsel %vm809_vm8, %v4255_v21, %v4257_v31  ;;  %4482 = vmatprep.subr.bf16.mxu1 %v5275_v38  ;;  %4411 = vmatprep.subr.bf16.mxu0 %v4199_v56 }
 0x5e8   : > { %3984 = vmatmul.mubr.bf16.gmra.mrb[84].mxu1 %v5245_v28  ;;  %v4259_v46 = vpop.permute.xlu0 %4258  ;;  %4412 = vmatpush1.bf16.msra.mxu0 %v4198_v16 }
 0x5e9   : > { %v4275_v13 = vsel %vm809_vm8, %v4257_v31, %v4259_v46  ;;  %4297 = vst.msk [vmem:[#allocation5 + $0xe8] sm:$0xff] %vm1050_vm14, %v4259_v46  ;;  %4483 = vmatpush1.bf16.msra.mxu1 %v4333_v3  ;;  %v4265_v26 = vpop.permute.xlu1 %4264  ;;  %4413 = vmatprep.subr.bf16.mxu0 %v4273_v0 }
 0x5ea   : > { %4300 = vst.msk [vmem:[#allocation5 + $0x100] sm:$0xff] %vm1050_vm14, %v4265_v26  ;;  %4484 = vmatprep.subr.bf16.mxu1 %v5275_v38  ;;  %5091 = vmatprep.mubr.msk.bf16.mxu1 %vm1590_vm1, %v5248_v43 }
 0x5ec   : > { %v4263_v2 = vpop.permute.xlu0 %4262  ;;  %v4336_v54 = vld [vmem:[#allocation5 + $0xb8] sm:$0xff]  ;;  %4414 = vmatpush1.bf16.msra.mxu0 %v4272_v42 }
 0x5ed   : > { %v4277_v22 = vsel %vm809_vm8, %v4263_v2, %v4265_v26  ;;  %4485 = vmatpush1.bf16.msra.mxu1 %v4336_v54  ;;  %v4269_v11 = vpop.permute.xlu1 %4268  ;;  %4415 = vmatprep.subr.bf16.mxu0 %v4275_v13 }
 0x5ee   : > { %4486 = vmatprep.subr.bf16.mxu1 %v5275_v38 }
 0x5f0   : > { %v4261_v55 = vpop.permute.xlu0 %4260  ;;  %4416 = vmatpush1.bf16.msra.mxu0 %v4274_v27  ;;  %v4342_v5 = vld [vmem:[#allocation5 + $0xe8] sm:$0xff] }
 0x5f1   : > { %v4276_v57 = vsel %vm809_vm8, %v4261_v55, %v4263_v2  ;;  %4487 = vmatpush1.bf16.msra.mxu1 %v4339_v34  ;;  %v4267_v63 = vpop.permute.xlu1 %4266  ;;  %4417 = vmatprep.subr.bf16.mxu0 %v4277_v22  ;;  %v4345_v14 = vld [vmem:[#allocation5 + $0x100] sm:$0xff] }
 0x5f2   : > { %v4278_v40 = vsel %vm809_vm8, %v4267_v63, %v4269_v11  ;;  %4488 = vmatprep.subr.bf16.mxu1 %v5275_v38 }
 0x5f4   : > { %v4271_v41 = vpop.permute.xlu0 %4270  ;;  %4418 = vmatpush1.bf16.msra.mxu0 %v4276_v57 }
 0x5f5   : > { %v4279_v23 = vsel %vm809_vm8, %v4269_v11, %v4271_v41  ;;  %4303 = vst.msk [vmem:[#allocation5 + $0x118] sm:$0xff] %vm1050_vm14, %v4271_v41  ;;  %4489 = vmatpush1.bf16.msra.mxu1 %v4342_v5  ;;  %vm4887_vm8 = vcmp.lt.s32.totalorder %v368_v1, 286 }
 0x5f6   : > { %4490 = vmatprep.subr.bf16.mxu1 %v5275_v38  ;;  %4419 = vmatprep.subr.bf16.mxu0 %v4279_v23 }
 0x5f8   : > { %4420 = vmatpush1.bf16.msra.mxu0 %v4278_v40 }
 0x5f9   : > { %4491 = vmatpush1.bf16.msra.mxu1 %v4345_v14 }
 0x5fa   : > { %4492 = vmatprep.subr.bf16.mxu1 %v5275_v38 }
 0x5fb   : > { %4430 = vmatmul.mubr.bf16.vlgmr.msra.gmra.mrb[96].mxu0 %v5246_v44 }
 0x5fc   : > { %v4348_v15 = vld [vmem:[#allocation5 + $0x118] sm:$0xff]  ;;  %5088 = vmatprep.mubr.msk.bf16.mxu0 %vm1590_vm1, %v5249_v49 }
 0x5fd   : > { %4493 = vmatpush1.bf16.msra.mxu1 %v4348_v15 }
 0x5fe   : > { %5122 = vmatprep.subr.bf16.mxu1 %v5278_v52 }
 0x600   : > { %4503 = vmatmul.mubr.bf16.vlgmr.msra.gmra.mrb[88].mxu1 %v5246_v44 }
 0x601   : > { %5092 = vmatprep.mubr.msk.bf16.mxu1 %vm1590_vm1, %v5249_v49 }
 0x603   : > { %4440 = vmatmul.mubr.bf16.gmra.mrb[100].mxu0 %v5251_v30 }
 0x604   : > { %5089 = vmatprep.mubr.msk.bf16.mxu0 %vm1590_vm1, %v5252_v10 }
 0x608   : > { %4511 = vmatmul.mubr.bf16.gmra.mrb[92].mxu1 %v5251_v30 }
 0x609   : > { %5093 = vmatprep.mubr.msk.bf16.mxu1 %vm1590_vm1, %v5252_v10 }
 0x60b   : > { %4450 = vmatmul.mubr.bf16.gmra.mrb[104].mxu0 %v5254_v50 }
 0x60c   : > { %5090 = vmatprep.mubr.msk.bf16.mxu0 %vm1590_vm1, %v5255_v17 }
 0x610   : > { %4519 = vmatmul.mubr.bf16.gmra.mrb[96].mxu1 %v5254_v50 }
 0x611   : > { %5094 = vmatprep.mubr.msk.bf16.mxu1 %vm1590_vm1, %v5255_v17 }
 0x613   : > { %4460 = vmatmul.mubr.bf16.gmra.mrb[108].mxu0 %v5257_v12 }
 0x614   : > { %4809 = vmatprep.mubr.bf16.mxu0 %v5275_v38 }
 0x618   : > { %4527 = vmatmul.mubr.bf16.gmra.mrb[100].mxu1 %v5257_v12 }
 0x619   : > { %5130 = vmatprep.mubr.msk.bf16.mxu1 %vm5279_vm3, %v5278_v52 }
 0x66e   : > { %v3393_v53 = vpop.f32.mrb[64].mxu0 }
 0x66f   : > { %v3395_v36 = vpop.f32.mrb[65].mxu0 }
 0x670   : > { %v3397_v48 = vpop.f32.mrb[66].mxu0 }
 0x671   : > { %v3399_v8 = vpop.f32.mrb[67].mxu0 }
 0x673   : > { %v3466_v19 = vpop.f32.mrb[56].mxu1 }
 0x674   : > { %3499 = vst.msk [vmem:[#allocation7 + $0x10] sm:$0xff] %vm1050_vm14, %v3466_v19  ;;  %v3468_v29 = vpop.f32.mrb[57].mxu1 }
 0x675   : > { %v3469_v62 = vpop.f32.mrb[58].mxu1 }
 0x676   : > { %3502 = vst.msk [vmem:[#allocation7 + $0x28] sm:$0xff] %vm1050_vm14, %v3469_v62  ;;  %v3471_v18 = vpop.f32.mrb[59].mxu1  ;;  %v3403_v37 = vpop.f32.mrb[68].mxu0 }
 0x677   : > { %v3405_v24 = vpop.f32.mrb[69].mxu0 }
 0x678   : > { %v3407_v7 = vpop.f32.mrb[70].mxu0 }
 0x679   : > { %v3409_v38 = vpop.f32.mrb[71].mxu0 }
 0x67b   : > { %v3474_v9 = vpop.f32.mrb[60].mxu1  ;;  %v3994_v22 = vld [vmem:[#allocation7 + $0x10] sm:$0xff] }
 0x67c   : > { %3505 = vst.msk [vmem:[#allocation7 + $0x40] sm:$0xff] %vm1050_vm14, %v3474_v9  ;;  %v3476_v35 = vpop.f32.mrb[61].mxu1 }
 0x67d   : > { %v3477_v39 = vpop.f32.mrb[62].mxu1  ;;  %v3997_v57 = vld [vmem:[#allocation7 + $0x28] sm:$0xff] }
 0x67e   : > { %3508 = vst.msk [vmem:[#allocation7 + $0x58] sm:$0xff] %vm1050_vm14, %v3477_v39  ;;  %v3413_v47 = vpop.f32.mrb[72].mxu0  ;;  %v3479_v51 = vpop.f32.mrb[63].mxu1 }
 0x67f   : > { %v3415_v45 = vpop.f32.mrb[73].mxu0 }
 0x680   : > { %v3417_v33 = vpop.f32.mrb[74].mxu0 }
 0x681   : > { %v3419_v32 = vpop.f32.mrb[75].mxu0 }
 0x683   : > { %v3482_v61 = vpop.f32.mrb[64].mxu1  ;;  %v4000_v50 = vld [vmem:[#allocation7 + $0x40] sm:$0xff] }
 0x684   : > { %3511 = vst.msk [vmem:[#allocation7 + $0x70] sm:$0xff] %vm1050_vm14, %v3482_v61  ;;  %v3484_v0 = vpop.f32.mrb[65].mxu1 }
 0x685   : > { %v3485_v6 = vpop.f32.mrb[66].mxu1 }
 0x686   : > { %3514 = vst.msk [vmem:[#allocation7 + $0x88] sm:$0xff] %vm1050_vm14, %v3485_v6  ;;  %v7337_v16 = vpop.f32.mrb[76].mxu0  ;;  %v3487_v28 = vpop.f32.mrb[67].mxu1 }
 0x687   : > { %v7339_v58 = vpop.f32.mrb[77].mxu0 }
 0x688   : > { %v7342_v25 = vpop.f32.mrb[78].mxu0 }
 0x689   : > { %v7344_v43 = vpop.f32.mrb[79].mxu0 }
 0x68b   : > { %v3490_v42 = vpop.f32.mrb[68].mxu1  ;;  %v4006_v35 = vld [vmem:[#allocation7 + $0x70] sm:$0xff] }
 0x68c   : > { %3517 = vst.msk [vmem:[#allocation7 + $0xa0] sm:$0xff] %vm1050_vm14, %v3490_v42  ;;  %v3492_v31 = vpop.f32.mrb[69].mxu1 }
 0x68d   : > { %v3493_v60 = vpop.f32.mrb[70].mxu1  ;;  %v4009_v0 = vld [vmem:[#allocation7 + $0x88] sm:$0xff] }
 0x68e   : > { %3520 = vst.msk [vmem:[#allocation7 + $0xb8] sm:$0xff] %vm1050_vm14, %v3493_v60  ;;  %v3495_v20 = vpop.f32.mrb[71].mxu1 }
 0x69e   : > { %v3888_v56 = vpop.f32.mrb[80].mxu0 }
 0x69f   : > { %v7348_v21 = vadd.f32 %v3888_v56, %v3393_v53  ;;  %v3890_v27 = vpop.f32.mrb[81].mxu0 }
 0x6a0   : > { %v7350_v46 = vadd.f32 %v3890_v27, %v3395_v36  ;;  %v3892_v3 = vpop.f32.mrb[82].mxu0  ;;  %v4003_v36 = vld [vmem:[#allocation7 + $0x58] sm:$0xff]  ;;  %v4012_v27 = vld [vmem:[#allocation7 + $0xa0] sm:$0xff] }
 0x6a1   : > { %v7352_v13 = vadd.f32 %v3892_v3, %v3397_v48  ;;  %v3894_v26 = vpop.f32.mrb[83].mxu0 }
 0x6a2   : > { %v7354_v2 = vadd.f32 %v3894_v26, %v3399_v8 }
 0x6a3   : > { %v3961_v54 = vpop.f32.mrb[72].mxu1 }
 0x6a4   : > { %v4018_v11 = vadd.f32 %v3994_v22, %v3961_v54  ;;  %v3963_v55 = vpop.f32.mrb[73].mxu1  ;;  %v4015_v54 = vld [vmem:[#allocation7 + $0xb8] sm:$0xff] }
 0x6a5   : > { %v3964_v34 = vpop.f32.mrb[74].mxu1 }
 0x6a6   : > { %4042 = vst.msk [vmem:[#allocation7 + $0x10] sm:$0xff] %vm1050_vm14, %v4018_v11  ;;  %v4021_v63 = vadd.f32 %v3997_v57, %v3964_v34  ;;  %v3966_v40 = vpop.f32.mrb[75].mxu1  ;;  %v3898_v41 = vpop.f32.mrb[84].mxu0 }
 0x6a7   : > { %v7357_v5 = vadd.f32 %v3898_v41, %v3403_v37  ;;  %v3900_v23 = vpop.f32.mrb[85].mxu0  ;;  %v4642_v34 = vpop.permute.xlu0 %4641 }
 0x6a8   : > { %4045 = vst.msk [vmem:[#allocation7 + $0x28] sm:$0xff] %vm1050_vm14, %v4021_v63  ;;  %v7360_v44 = vadd.f32 %v3900_v23, %v3405_v24  ;;  %v3902_v14 = vpop.f32.mrb[86].mxu0  ;;  %v4647_v23 = vpop.permute.xlu1 %4646 }
 0x6a9   : > { %v7362_v49 = vadd.f32 %v3902_v14, %v3407_v7  ;;  %v3904_v15 = vpop.f32.mrb[87].mxu0 }
 0x6aa   : > { %v7364_v30 = vadd.f32 %v3904_v15, %v3409_v38 }
 0x6ab   : > { %v3969_v10 = vpop.f32.mrb[76].mxu1 }
 0x6ac   : > { %v4024_v17 = vadd.f32 %v4000_v50, %v3969_v10  ;;  %v3971_v12 = vpop.f32.mrb[77].mxu1 }
 0x6ad   : > { %v3972_v53 = vpop.f32.mrb[78].mxu1  ;;  %v4537_v50 = vld [vmem:[#allocation7 + $0x10] sm:$0xff] }
 0x6ae   : > { %4048 = vst.msk [vmem:[#allocation7 + $0x40] sm:$0xff] %vm1050_vm14, %v4024_v17  ;;  %v4027_v48 = vadd.f32 %v4003_v36, %v3972_v53  ;;  %v3974_v8 = vpop.f32.mrb[79].mxu1  ;;  %v3908_v19 = vpop.f32.mrb[88].mxu0 }
 0x6af   : > { %v7367_v29 = vadd.f32 %v3908_v19, %v3413_v47  ;;  %v3910_v62 = vpop.f32.mrb[89].mxu0  ;;  %v4540_v8 = vld [vmem:[#allocation7 + $0x28] sm:$0xff] }
 0x6b0   : > { %4051 = vst.msk [vmem:[#allocation7 + $0x58] sm:$0xff] %vm1050_vm14, %v4027_v48  ;;  %v7370_v18 = vadd.f32 %v3910_v62, %v3415_v45  ;;  %v3912_v37 = vpop.f32.mrb[90].mxu0 }
 0x6b1   : > { %v7372_v24 = vadd.f32 %v3912_v37, %v3417_v33  ;;  %v3914_v7 = vpop.f32.mrb[91].mxu0 }
 0x6b2   : > { %v7374_v38 = vadd.f32 %v3914_v7, %v3419_v32 }
 0x6b3   : > { %v3977_v9 = vpop.f32.mrb[80].mxu1 }
 0x6b4   : > { %v4030_v39 = vadd.f32 %v4006_v35, %v3977_v9  ;;  %v3979_v51 = vpop.f32.mrb[81].mxu1 }
 0x6b5   : > { %v3980_v61 = vpop.f32.mrb[82].mxu1 }
 0x6b6   : > { %4054 = vst.msk [vmem:[#allocation7 + $0x70] sm:$0xff] %vm1050_vm14, %v4030_v39  ;;  %v4033_v47 = vadd.f32 %v4009_v0, %v3980_v61  ;;  %v3982_v6 = vpop.f32.mrb[83].mxu1  ;;  %v3918_v28 = vpop.f32.mrb[92].mxu0 }
 0x6b7   : > { %v7378_v45 = vadd.f32 %v3918_v28, %v7337_v16  ;;  %v3920_v42 = vpop.f32.mrb[93].mxu0  ;;  %v7398_v39 = vpop.permute.xlu0 %4651 }
 0x6b8   : > { %4057 = vst.msk [vmem:[#allocation7 + $0x88] sm:$0xff] %vm1050_vm14, %v4033_v47  ;;  %v7382_v33 = vadd.f32 %v3920_v42, %v7339_v58  ;;  %v3922_v32 = vpop.f32.mrb[94].mxu0  ;;  %v7404_v42 = vpop.permute.xlu1 %4656 }
 0x6b9   : > { %v7385_v31 = vadd.f32 %v3922_v32, %v7342_v25  ;;  %v3924_v60 = vpop.f32.mrb[95].mxu0 }
 0x6ba   : > { %v7388_v20 = vadd.f32 %v3924_v60, %v7344_v43 }
 0x6bb   : > { %v3985_v56 = vpop.f32.mrb[84].mxu1 }
 0x6bc   : > { %v4036_v3 = vadd.f32 %v4012_v27, %v3985_v56  ;;  %v3987_v26 = vpop.f32.mrb[85].mxu1  ;;  %v4543_v56 = vld [vmem:[#allocation7 + $0x40] sm:$0xff] }
 0x6bd   : > { %v3988_v16 = vpop.f32.mrb[86].mxu1 }
 0x6be   : > { %4060 = vst.msk [vmem:[#allocation7 + $0xa0] sm:$0xff] %vm1050_vm14, %v4036_v3  ;;  %v4039_v22 = vadd.f32 %v4015_v54, %v3988_v16  ;;  %v3990_v11 = vpop.f32.mrb[87].mxu1 }
 0x6c0   : > { %4063 = vst.msk [vmem:[#allocation7 + $0xb8] sm:$0xff] %vm1050_vm14, %v4039_v22  ;;  %v4546_v22 = vld [vmem:[#allocation7 + $0x58] sm:$0xff] }
 0x6ce   : > { %v4431_v58 = vpop.f32.mrb[96].mxu0 }
 0x6cf   : > { %v4559_v25 = vadd.f32 %v4431_v58, %v7348_v21  ;;  %v4433_v55 = vpop.f32.mrb[97].mxu0 }
 0x6d0   : > { %v4560_v43 = vadd.f32 %v4433_v55, %v7350_v46  ;;  %v4435_v57 = vpop.f32.mrb[98].mxu0 }
 0x6d1   : > { %v4679_v63 = vadd.f32 %v4642_v34, %v4559_v25  ;;  %v4562_v40 = vadd.f32 %v4435_v57, %v7352_v13  ;;  %v4437_v41 = vpop.f32.mrb[99].mxu0 }
 0x6d2   : > { %v4563_v14 = vadd.f32 %v4437_v41, %v7354_v2  ;;  %v4680_v15 = vadd.f32 %v4642_v34, %v4560_v43 }
 0x6d3   : > { %v4504_v10 = vpop.f32.mrb[88].mxu1  ;;  %v4682_v17 = vadd.f32 %v4647_v23, %v4562_v40  ;;  %v4703_v21 = vmax.f32 %v4679_v63, 0.0 }
 0x6d4   : > { %v4561_v12 = vadd.f32 %v4537_v50, %v4504_v10  ;;  %v4506_v53 = vpop.f32.mrb[89].mxu1  ;;  %v4683_v36 = vadd.f32 %v4647_v23, %v4563_v14  ;;  %v4704_v37 = vmax.f32 %v4680_v15, 0.0  ;;  %v7412_v15 = vpop.permute.xlu0 %4661 }
 0x6d5   : > { %v4507_v48 = vpop.f32.mrb[90].mxu1  ;;  %v4706_v19 = vmax.f32 %v4682_v17, 0.0 }
 0x6d6   : > { %4585 = vst.msk [vmem:[#allocation7 + $0x10] sm:$0xff] %vm1050_vm14, %v4561_v12  ;;  %v4564_v46 = vadd.f32 %v4540_v8, %v4507_v48  ;;  %v4509_v62 = vpop.f32.mrb[91].mxu1  ;;  %v4441_v13 = vpop.f32.mrb[100].mxu0  ;;  %v4707_v7 = vmax.f32 %v4683_v36, 0.0 }
 0x6d7   : > { %v4565_v2 = vadd.f32 %v4441_v13, %v7357_v5  ;;  %v4443_v9 = vpop.f32.mrb[101].mxu0  ;;  %v4727_v35 = vpack.c.bf16 %v4706_v19, %v4703_v21  ;;  %v7418_v21 = vpop.permute.xlu1 %4666 }
 0x6d8   : > { %4588 = vst.msk [vmem:[#allocation7 + $0x28] sm:$0xff] %vm1050_vm14, %v4564_v46  ;;  %v4566_v51 = vadd.f32 %v4443_v9, %v7360_v44  ;;  %v4445_v61 = vpop.f32.mrb[102].mxu0  ;;  %v4728_v0 = vpack.c.bf16 %v4707_v7, %v4704_v37  ;;  %v4549_v46 = vld [vmem:[#allocation7 + $0x70] sm:$0xff] }
 0x6d9   : > { %v4685_v47 = vadd.f32 %v7398_v39, %v4565_v2  ;;  %v4568_v6 = vadd.f32 %v4445_v61, %v7362_v49  ;;  %v4447_v28 = vpop.f32.mrb[103].mxu0 }
 0x6da   : > { %v4569_v32 = vadd.f32 %v4447_v28, %v7364_v30  ;;  %4777 = vmatprep.subr.bf16.mxu0 %v4728_v0  ;;  %v4686_v5 = vadd.f32 %v7398_v39, %v4566_v51 }
 0x6db   : > { %v4512_v60 = vpop.f32.mrb[92].mxu1  ;;  %v4688_v27 = vadd.f32 %v7404_v42, %v4568_v6  ;;  %4778 = vmatpush1.bf16.msra.mxu0 %v4727_v35  ;;  %v4709_v54 = vmax.f32 %v4685_v47, 0.0  ;;  %v4552_v35 = vld [vmem:[#allocation7 + $0x88] sm:$0xff] }
 0x6dc   : > { %v4567_v44 = vadd.f32 %v4543_v56, %v4512_v60  ;;  %v4514_v3 = vpop.f32.mrb[93].mxu1  ;;  %v4689_v26 = vadd.f32 %v7404_v42, %v4569_v32  ;;  %v4710_v43 = vmax.f32 %v4686_v5, 0.0 }
 0x6dd   : > { %v4609_v16 = vld [vmem:[#allocation7 + $0x10] sm:$0xff]  ;;  %v4515_v49 = vpop.f32.mrb[94].mxu1  ;;  %v4712_v11 = vmax.f32 %v4688_v27, 0.0  ;;  %v4672_v27 = vpop.permute.xlu0 %4671 }
 0x6de   : > { %v4681_v58 = vadd.f32 %v4642_v34, %v4609_v16  ;;  %4591 = vst.msk [vmem:[#allocation7 + $0x40] sm:$0xff] %vm1050_vm14, %v4567_v44  ;;  %v4570_v30 = vadd.f32 %v4546_v22, %v4515_v49  ;;  %v4517_v25 = vpop.f32.mrb[95].mxu1  ;;  %v4451_v55 = vpop.f32.mrb[104].mxu0  ;;  %v4713_v57 = vmax.f32 %v4689_v26, 0.0 }
 0x6df   : > { %v4612_v63 = vld [vmem:[#allocation7 + $0x28] sm:$0xff]  ;;  %v4571_v40 = vadd.f32 %v4451_v55, %v7367_v29  ;;  %v4453_v41 = vpop.f32.mrb[105].mxu0  ;;  %v4730_v14 = vpack.c.bf16 %v4712_v11, %v4709_v54  ;;  %v4677_v22 = vpop.permute.xlu1 %4676  ;;  %v4555_v55 = vld [vmem:[#allocation7 + $0xa0] sm:$0xff] }
 0x6e0   : > { %v4684_v10 = vadd.f32 %v4647_v23, %v4612_v63  ;;  %4594 = vst.msk [vmem:[#allocation7 + $0x58] sm:$0xff] %vm1050_vm14, %v4570_v30  ;;  %v4572_v50 = vadd.f32 %v4453_v41, %v7370_v18  ;;  %v4455_v34 = vpop.f32.mrb[106].mxu0  ;;  %v4731_v17 = vpack.c.bf16 %v4713_v57, %v4710_v43  ;;  %v4705_v48 = vmax.f32 %v4681_v58, 0.0 }
 0x6e1   : > { %v4691_v12 = vadd.f32 %v7412_v15, %v4571_v40  ;;  %v4574_v53 = vadd.f32 %v4455_v34, %v7372_v24  ;;  %v4457_v36 = vpop.f32.mrb[107].mxu0 }
 0x6e2   : > { %v4708_v29 = vmax.f32 %v4684_v10, 0.0  ;;  %v4575_v8 = vadd.f32 %v4457_v36, %v7374_v38  ;;  %4779 = vmatprep.subr.bf16.mxu0 %v4731_v17  ;;  %v4692_v23 = vadd.f32 %v7412_v15, %v4572_v50 }
 0x6e3   : > { %v4520_v19 = vpop.f32.mrb[96].mxu1  ;;  %v4694_v18 = vadd.f32 %v7418_v21, %v4574_v53  ;;  %4780 = vmatpush1.bf16.msra.mxu0 %v4730_v14  ;;  %v4715_v2 = vmax.f32 %v4691_v12, 0.0 }
 0x6e4   : > { %v4573_v62 = vadd.f32 %v4549_v46, %v4520_v19  ;;  %v4522_v13 = vpop.f32.mrb[97].mxu1  ;;  %v4729_v37 = vpack.c.bf16 %v4708_v29, %v4705_v48  ;;  %v4695_v24 = vadd.f32 %v7418_v21, %v4575_v8  ;;  %v4716_v6 = vmax.f32 %v4692_v23, 0.0  ;;  %v4751_v19 = vld [vmem:[%s7466_s7] sm:$0x1] }
 0x6e5   : > { %v4615_v7 = vld [vmem:[#allocation7 + $0x40] sm:$0xff]  ;;  %v4523_v9 = vpop.f32.mrb[98].mxu1  ;;  %v4718_v51 = vmax.f32 %v4694_v18, 0.0 }
 0x6e6   : > { %v4687_v38 = vadd.f32 %v7398_v39, %v4615_v7  ;;  %4597 = vst.msk [vmem:[#allocation7 + $0x70] sm:$0xff] %vm1050_vm14, %v4573_v62  ;;  %v4576_v61 = vadd.f32 %v4552_v35, %v4523_v9  ;;  %v4525_v0 = vpop.f32.mrb[99].mxu1  ;;  %v4461_v47 = vpop.f32.mrb[108].mxu0  ;;  %4741 = vst.msk [vmem:[#allocation6 + $0x10] sm:$0xff] %vm1050_vm14, %v4729_v37  ;;  %v4719_v28 = vmax.f32 %v4695_v24, 0.0 }
 0x6e7   : > { %v4618_v32 = vld [vmem:[#allocation7 + $0x58] sm:$0xff]  ;;  %v4577_v5 = vadd.f32 %v4461_v47, %v7378_v45  ;;  %v4463_v60 = vpop.f32.mrb[109].mxu0  ;;  %v4733_v56 = vpack.c.bf16 %v4718_v51, %v4715_v2  ;;  %v4768_v51 = vpop.permute.xlu0 %4767 }
 0x6e8   : > { %v4690_v44 = vadd.f32 %v7404_v42, %v4618_v32  ;;  %4600 = vst.msk [vmem:[#allocation7 + $0x88] sm:$0xff] %vm1050_vm14, %v4576_v61  ;;  %v4578_v39 = vadd.f32 %v4463_v60, %v7382_v33  ;;  %v4465_v3 = vpop.f32.mrb[110].mxu0  ;;  %v4734_v26 = vpack.c.bf16 %v4719_v28, %v4716_v6  ;;  %v4711_v11 = vmax.f32 %v4687_v38, 0.0 }
 0x6e9   : > { %v4697_v16 = vadd.f32 %v4672_v27, %v4577_v5  ;;  %v4580_v54 = vadd.f32 %v4465_v3, %v7385_v31  ;;  %v4467_v49 = vpop.f32.mrb[111].mxu0  ;;  %v4558_v31 = vld [vmem:[#allocation7 + $0xb8] sm:$0xff]  ;;  %v4773_v38 = vrot.slane %v4768_v51, %v1206_v59  ;;  %v5280_v60 = vmov 1966171168  }
 0x6ea   : > { %v4714_v58 = vmax.f32 %v4690_v44, 0.0  ;;  %v4581_v45 = vadd.f32 %v4467_v49, %v7388_v20  ;;  %4781 = vmatprep.subr.bf16.mxu0 %v4734_v26  ;;  %v4698_v30 = vadd.f32 %v4672_v27, %v4578_v39 }
 0x6eb   : > { %v4528_v25 = vpop.f32.mrb[100].mxu1  ;;  %v4700_v42 = vadd.f32 %v4677_v22, %v4580_v54  ;;  %4782 = vmatpush1.bf16.msra.mxu0 %v4733_v56  ;;  %v4721_v41 = vmax.f32 %v4697_v16, 0.0  ;;  %v4863_v56 = vunpack.c.l.s4 %v5280_v60 }
 0x6ec   : > { %v4579_v43 = vadd.f32 %v4555_v55, %v4528_v25  ;;  %v4530_v57 = vpop.f32.mrb[101].mxu1  ;;  %v4732_v33 = vpack.c.bf16 %v4714_v58, %v4711_v11  ;;  %v4701_v63 = vadd.f32 %v4677_v22, %v4581_v45  ;;  %v4722_v12 = vmax.f32 %v4698_v30, 0.0 }
 0x6ed   : > { %v4621_v40 = vld [vmem:[#allocation7 + $0x70] sm:$0xff]  ;;  %v4531_v14 = vpop.f32.mrb[102].mxu1  ;;  %v4724_v50 = vmax.f32 %v4700_v42, 0.0 }
 0x6ee   : > { %v4754_v10 = vld [vmem:[#allocation6 + $0x10] sm:$0xff]  ;;  %v4693_v34 = vadd.f32 %v7412_v15, %v4621_v40  ;;  %4603 = vst.msk [vmem:[#allocation7 + $0xa0] sm:$0xff] %vm1050_vm14, %v4579_v43  ;;  %v4582_v20 = vadd.f32 %v4558_v31, %v4531_v14  ;;  %v4533_v17 = vpop.f32.mrb[103].mxu1  ;;  %4744 = vst.msk [vmem:[#allocation6 + $0x28] sm:$0xff] %vm1050_vm14, %v4732_v33  ;;  %v4725_v53 = vmax.f32 %v4701_v63, 0.0 }
 0x6ef   : > { %5123 = vmatpush3.bf16.msra.mxu1 %v4754_v10  ;;  %v4624_v36 = vld [vmem:[#allocation7 + $0x88] sm:$0xff]  ;;  %v4736_v48 = vpack.c.bf16 %v4724_v50, %v4721_v41 }
 0x6f0   : > { %5124 = vmatprep.subr.bf16.mxu1 %v5278_v52  ;;  %v4696_v29 = vadd.f32 %v7418_v21, %v4624_v36  ;;  %4606 = vst.msk [vmem:[#allocation7 + $0xb8] sm:$0xff] %vm1050_vm14, %v4582_v20  ;;  %v4737_v8 = vpack.c.bf16 %v4725_v53, %v4722_v12  ;;  %v4717_v23 = vmax.f32 %v4693_v34, 0.0 }
 0x6f2   : > { %v4720_v15 = vmax.f32 %v4696_v29, 0.0  ;;  %4783 = vmatprep.subr.bf16.mxu0 %v4737_v8 }
 0x6f3   : > { %4784 = vmatpush1.bf16.msra.mxu0 %v4736_v48 }
 0x6f4   : > { %v4735_v46 = vpack.c.bf16 %v4720_v15, %v4717_v23 }
 0x6f5   : > { %v4627_v18 = vld [vmem:[#allocation7 + $0xa0] sm:$0xff]  ;;  %v4757_v62 = vld [vmem:[#allocation6 + $0x28] sm:$0xff] }
 0x6f6   : > { %v4699_v13 = vadd.f32 %v4672_v27, %v4627_v18  ;;  %5125 = vmatpush3.bf16.msra.mxu1 %v4757_v62  ;;  %4747 = vst.msk [vmem:[#allocation6 + $0x40] sm:$0xff] %vm1050_vm14, %v4735_v46  ;;  %5095 = vmatmul.mubr.msk.bf16.vlgmr.msra.gmra.mrb[112].mxu0 %vm1590_vm1, %v4751_v19  ;;  %v4864_v27 = vunpack.c.0.s8 %v4863_v56 }
 0x6f7   : > { %v4630_v21 = vld [vmem:[#allocation7 + $0xb8] sm:$0xff]  ;;  %5126 = vmatprep.subr.bf16.mxu1 %v5278_v52 }
 0x6f8   : > { %v4702_v37 = vadd.f32 %v4677_v22, %v4630_v21  ;;  %v4723_v24 = vmax.f32 %v4699_v13, 0.0 }
 0x6fa   : > { %v4726_v7 = vmax.f32 %v4702_v37, 0.0 }
 0x6fc   : > { %v4738_v2 = vpack.c.bf16 %v4726_v7, %v4723_v24 }
 0x6fd   : > { %v4760_v9 = vld [vmem:[#allocation6 + $0x40] sm:$0xff] }
 0x6fe   : > { %5127 = vmatpush3.bf16.msra.mxu1 %v4760_v9  ;;  %4750 = vst.msk [vmem:[#allocation6 + $0x58] sm:$0xff] %vm1050_vm14, %v4738_v2 }
 0x6ff   : > { %5128 = vmatprep.subr.bf16.mxu1 %v5278_v52  ;;  %v4867_v52 = vsub.s32 %v4864_v27, %v5350_v4 }
 0x705   : > { %v4763_v35 = vld [vmem:[#allocation6 + $0x58] sm:$0xff] }
 0x706   : > { %5129 = vmatpush3.bf16.msra.mxu1 %v4763_v35 }
 0x709   : > { %5131 = vmatmul.mubr.msk.bf16.vlgmr.msra.gmra.mrb[104].mxu1 %vm1590_vm1, %v4751_v19 }
 0x7c9   : > { %v4811_v61 = vpop.f32.mrb[112].mxu0 }
 0x7ca   : > { %v4812_v0 = vadd.f32 %v4811_v61, %v4773_v38  ;;  %v4813_v47 = vpop.f32.mrb[113].mxu0 }
 0x7cb   : > { %v4814_v6 = vadd.f32 %v4813_v47, %v4773_v38  ;;  %v4815_v28 = vpop.f32.mrb[114].mxu0 }
 0x7cc   : > { %v4816_v32 = vpop.f32.mrb[115].mxu0 }
 0x7cd   : > { %v4861_v5 = vcombine.low %v4812_v0, %v4814_v6 }
 0x7cf   : > { %v4868_v54 = vrot.slane %v4861_v5, %v4867_v52 }
 0x7dc   : > { %v4852_v44 = vpop.f32.mrb[104].mxu1 }
 0x7dd   : > { %v4853_v39 = vadd.f32 %v4852_v44, %v4773_v38  ;;  %v5132_v3 = vpop.f32.mrb[105].mxu1 }
 0x7de   : > { %v4855_v26 = vpop.f32.mrb[106].mxu1 }
 0x7df   : > { %v4875_v16 = vrot.slane %v4853_v39, %v4867_v52  ;;  %v5133_v59 = vpop.f32.mrb[107].mxu1 }
 0x7e1   : > { %v4876_v49 = vcombine.low %v4868_v54, %v4875_v16 }
 0x7e3   : > { %v4883_v22 = vrot.slane %v4876_v49, %v4867_v52 }
 0x7e5   : > { %4889 = vst.msk [vmem:[%s359_s11] sm:$0x7] %vm4887_vm8, %v4883_v22 }
 0x7e6 PF: > { %s22_s15 = sadd.s32 1, %s5264_s15  }
 0x7e7   : > { %p19_p4 = scmp.ge.s32.totalorder %s22_s15, 4  }
 0x7e9   :  { %21 = sbr.rel (!%p19_p4) target bundleno = 3 (0x3), region = 94 }

</bundles_post_ra>
